<compile_context>
chip_gen: v6e
topology: v6e:2x2x1
jax: 0.10.0
libtpu: 0.0.40
codegen_flags: <defaults>
</compile_context>

<pallas_src>
import functools

import numpy as np

import jax
import jax.numpy as jnp
from jax.experimental import pallas as pl
from jax.experimental.pallas import tpu as pltpu


_PAD = 128  # zero halo (in lanes) around the flattened activation; any value
            # >= W+1 works, 128 keeps the interior staging store lane-aligned.


# ---------------------------------------------------------------------------
# Fused Pallas kernel: conv1+ReLU -> conv2+ReLU -> conv3, plus 2 class. heads
# ---------------------------------------------------------------------------

def _fused_kernel(x_ref, w1_ref, b1_ref, w2_ref, b2_ref, w3_ref, b3_ref,
                  hw1_ref, hb1_ref, hw2_ref, hb2_ref, mask_ref, pool_ref,
                  o1_ref, o2_ref, fin_ref,
                  xp1_ref, xp2_ref, xp3_ref, *, shifts, pad):
    """Fused backbone + classification heads (all data resident in VMEM).

    x_ref    : (Cin, M)        f32, M = N*H*W, channel-major flattened input
    w*_ref   : (9, Cout, Cin)  f32 conv weights, tap-major (t = dy*3 + dx)
    b*_ref   : (Cout, 1)       f32 conv bias
    hw*_ref  : (classes, C)    f32 head Linear weight;  hb*: (classes, 1) bias
    mask_ref : (9, 1, M)       f32 {0,1} border-validity mask per tap
    pool_ref : (M, N)          f32 per-image mean selector (value 1/(H*W))
    o*_ref   : (classes, N)    head logits
    fin_ref  : (C3, M)         conv3 output ("final")
    xp*_ref  : (C, M + 2*pad)  VMEM staging rows for the shifted tap reads
    """
    m = x_ref.shape[-1]

    def conv3x3(x, xp_ref, w_ref, b_ref, relu):
        # Stage the input with `pad` zero lanes either side so each of the 9
        # taps is a plain statically-shifted lane slice; contributions that
        # cross an image/row border are zeroed by the per-tap mask.
        xp_ref[...] = jnp.zeros_like(xp_ref)
        xp_ref[:, pad:pad + m] = x
        acc = jnp.dot(w_ref[4], x, preferred_element_type=jnp.float32)  # centre tap
        for t, d in enumerate(shifts):
            if d == 0:
                continue
            xs = xp_ref[:, pad + d:pad + d + m] * mask_ref[t]
            acc = acc + jnp.dot(w_ref[t], xs, preferred_element_type=jnp.float32)
        acc = acc + b_ref[...]
        return jnp.maximum(acc, 0.0) if relu else acc

    def class_head(h, hw_ref, hb_ref):
        # AdaptiveAvgPool2d(1) + Flatten + Linear (dropout=None, act=Identity)
        pooled = jnp.dot(h, pool_ref[...], preferred_element_type=jnp.float32)   # (C, N)
        return jnp.dot(hw_ref[...], pooled,
                       preferred_element_type=jnp.float32) + hb_ref[...]

    h1 = conv3x3(x_ref[...], xp1_ref, w1_ref, b1_ref, relu=True)   # hook "layer1"
    h2 = conv3x3(h1, xp2_ref, w2_ref, b2_ref, relu=True)           # hook "layer2"
    fin = conv3x3(h2, xp3_ref, w3_ref, b3_ref, relu=False)         # "final"

    o1_ref[...] = class_head(h1, hw1_ref, hb1_ref).astype(o1_ref.dtype)
    o2_ref[...] = class_head(h2, hw2_ref, hb2_ref).astype(o2_ref.dtype)
    fin_ref[...] = fin.astype(fin_ref.dtype)


# ---------------------------------------------------------------------------
# Wrapper
# ---------------------------------------------------------------------------

def _geometry_constants(n, h, w):
    """Border masks (per 3x3 tap), mean-pool selector and flat tap shifts."""
    m = n * h * w
    idx = np.arange(m)
    yy = (idx // w) % h
    xx = idx % w
    masks = np.empty((9, 1, m), np.float32)
    for t, (dy, dx) in enumerate([(a, b) for a in range(3) for b in range(3)]):
        ok = ((yy + dy - 1 >= 0) & (yy + dy - 1 < h) &
              (xx + dx - 1 >= 0) & (xx + dx - 1 < w))
        masks[t, 0, :] = ok
    pool = np.zeros((m, n), np.float32)
    pool[idx, idx // (h * w)] = 1.0 / float(h * w)
    shifts = tuple((dy - 1) * w + (dx - 1) for dy in range(3) for dx in range(3))
    return masks, pool, shifts


def _forward_impl(p, x_nchw):
    """LayerEnsembles.forward with classification output heads active."""
    n, cin, h, w = x_nchw.shape
    m = n * h * w
    c1, c2, c3 = p["conv1_w"].shape[0], p["conv2_w"].shape[0], p["conv3_w"].shape[0]
    classes = p["head1_w"].shape[0]
    f32 = jnp.float32

    x_cm = jnp.transpose(x_nchw, (1, 0, 2, 3)).reshape(cin, m)      # (Cin, M)

    def prep_w(wt):   # (Cout, Cin, 3, 3) -> (9, Cout, Cin), tap-major t = dy*3 + dx
        return jnp.transpose(wt, (2, 3, 0, 1)).reshape(9, wt.shape[0], wt.shape[1])

    masks_np, pool_np, shifts = _geometry_constants(n, h, w)
    masks = jnp.asarray(masks_np)
    pool = jnp.asarray(pool_np)

    def full2(shape):
        return pl.BlockSpec(shape, lambda i: (0, 0))

    def full3(shape):
        return pl.BlockSpec(shape, lambda i: (0, 0, 0))

    flops = 2 * m * 9 * (cin * c1 + c1 * c2 + c2 * c3) + 2 * m * (c1 + c2) * n
    bytes_accessed = 4 * (x_cm.size + masks.size + pool.size
                          + 9 * (cin * c1 + c1 * c2 + c2 * c3)
                          + c3 * m + 2 * classes * n)

    o1, o2, fin = pl.pallas_call(
        functools.partial(_fused_kernel, shifts=shifts, pad=_PAD),
        out_shape=(jax.ShapeDtypeStruct((classes, n), f32),
                   jax.ShapeDtypeStruct((classes, n), f32),
                   jax.ShapeDtypeStruct((c3, m), f32)),
        grid=(1,),
        in_specs=[
            full2((cin, m)),                                   # x
            full3((9, c1, cin)), full2((c1, 1)),               # conv1 w, b
            full3((9, c2, c1)),  full2((c2, 1)),               # conv2 w, b
            full3((9, c3, c2)),  full2((c3, 1)),               # conv3 w, b
            full2((classes, c1)), full2((classes, 1)),         # head1 w, b
            full2((classes, c2)), full2((classes, 1)),         # head2 w, b
            full3((9, 1, m)),                                  # border masks
            full2((m, n)),                                     # mean-pool selector
        ],
        out_specs=(full2((classes, n)), full2((classes, n)), full2((c3, m))),
        scratch_shapes=[pltpu.VMEM((cin, m + 2 * _PAD), f32),
                        pltpu.VMEM((c1, m + 2 * _PAD), f32),
                        pltpu.VMEM((c2, m + 2 * _PAD), f32)],
        compiler_params=pltpu.CompilerParams(dimension_semantics=("arbitrary",)),
        cost_estimate=pl.CostEstimate(flops=flops, transcendentals=0,
                                      bytes_accessed=bytes_accessed),
    )(x_cm,
      prep_w(p["conv1_w"]).astype(f32), p["conv1_b"].reshape(c1, 1).astype(f32),
      prep_w(p["conv2_w"]).astype(f32), p["conv2_b"].reshape(c2, 1).astype(f32),
      prep_w(p["conv3_w"]).astype(f32), p["conv3_b"].reshape(c3, 1).astype(f32),
      p["head1_w"].astype(f32), p["head1_b"].reshape(classes, 1).astype(f32),
      p["head2_w"].astype(f32), p["head2_b"].reshape(classes, 1).astype(f32),
      masks, pool)

    final = jnp.transpose(fin.reshape(c3, n, h, w), (1, 0, 2, 3))   # back to NCHW
    return {"layer1": o1.T, "layer2": o2.T, "final": final}


# ---------------------------------------------------------------------------
# LayerEnsembles module (backbone + hooks + classification output heads)
# ---------------------------------------------------------------------------

class LayerEnsemblesJAX:
    """Mirrors LayerEnsembles.forward with classification output heads active.

    Backbone (stand-in for `model`):
        conv1: 3x3 Conv(Cin -> 8)  + ReLU   <- hooked as "layer1"
        conv2: 3x3 Conv(8   -> 16) + ReLU   <- hooked as "layer2"
        conv3: 3x3 Conv(16  -> 16)          -> "final"

    Heads: ClassificationHead(in_channels, classes, pooling='avg',
                              activation=None, dropout=None)  (eval mode).
    """

    def __init__(self, classes=3, in_ch=4, key=jax.random.PRNGKey(42)):
        self.layers = ("layer1", "layer2")
        self.classes = classes
        ks = jax.random.split(key, 8)

        def winit(k, shape, fan_in):
            return (jax.random.normal(k, shape, jnp.float32)
                    * (1.0 / jnp.sqrt(fan_in)))

        # PyTorch layouts: conv (Cout, Cin, kh, kw), linear (classes, in_ch)
        self.p = {
            "conv1_w": winit(ks[0], (8, in_ch, 3, 3), 9 * in_ch),
            "conv1_b": jnp.zeros((8,), jnp.float32),
            "conv2_w": winit(ks[1], (16, 8, 3, 3), 9 * 8),
            "conv2_b": jnp.zeros((16,), jnp.float32),
            "conv3_w": winit(ks[2], (16, 16, 3, 3), 9 * 16),
            "conv3_b": jnp.zeros((16,), jnp.float32),
            "head1_w": winit(ks[3], (classes, 8), 8),
            "head1_b": jnp.zeros((classes,), jnp.float32),
            "head2_w": winit(ks[4], (classes, 16), 16),
            "head2_b": jnp.zeros((classes,), jnp.float32),
        }
        self._fwd = jax.jit(_forward_impl)

    def forward(self, x_nchw):
        return self._fwd(self.p, x_nchw)


# ---------------------------------------------------------------------------
# Plain-JAX f32 reference (correctness check of the Pallas path)
# ---------------------------------------------------------------------------

def _conv_ref(x_nchw, w, b, relu):
    out = jax.lax.conv_general_dilated(
        x_nchw, w, window_strides=(1, 1), padding="SAME",
        dimension_numbers=("NCHW", "OIHW", "NCHW"))
    out = out + b.reshape(1, -1, 1, 1)
    return jnp.maximum(out, 0.0) if relu else out


def _forward_ref(p, x_nchw):
    h1 = _conv_ref(x_nchw, p["conv1_w"], p["conv1_b"], True)
    h2 = _conv_ref(h1, p["conv2_w"], p["conv2_b"], True)
    fin = _conv_ref(h2, p["conv3_w"], p["conv3_b"], False)

    def head(f, w, b):
        return jnp.mean(f, axis=(2, 3)) @ w.T + b

    return {
        "layer1": head(h1, p["head1_w"], p["head1_b"]),
        "layer2": head(h2, p["head2_w"], p["head2_b"]),
        "final": fin,
    }


if __name__ == "__main__":
    key = jax.random.PRNGKey(0)
    x = jax.random.normal(key, (2, 4, 16, 16), jnp.float32)   # NCHW

    model = LayerEnsemblesJAX(classes=3, in_ch=4)
    outs = model.forward(x)
    outs = jax.tree_util.tree_map(jax.block_until_ready, outs)

    assert outs["layer1"].shape == (2, 3)
    assert outs["layer2"].shape == (2, 3)
    assert outs["final"].shape == (2, 16, 16, 16)

    # Correctness vs. plain-JAX f32 reference.  Kernel keeps f32 end-to-end;
    # tolerance covers possible reduced-precision MXU passes for f32 dots.
    ref = _forward_ref(model.p, x)
    assert jnp.allclose(outs["final"], ref["final"], atol=5e-2, rtol=5e-2)
    assert jnp.allclose(outs["layer1"], ref["layer1"], atol=5e-2, rtol=5e-2)
    assert jnp.allclose(outs["layer2"], ref["layer2"], atol=5e-2, rtol=5e-2)

    print("KERNEL_OK")
</pallas_src>

<mosaic_0001>
module attributes {stable_mosaic.version = 11 : i64} {
  func.func @_fused_kernel(%arg0: i32, %arg1: memref<4x512xf32, #tpu.memory_space<vmem>>, %arg2: memref<9x8x4xf32, #tpu.memory_space<vmem>>, %arg3: memref<8x1xf32, #tpu.memory_space<vmem>>, %arg4: memref<9x16x8xf32, #tpu.memory_space<vmem>>, %arg5: memref<16x1xf32, #tpu.memory_space<vmem>>, %arg6: memref<9x16x16xf32, #tpu.memory_space<vmem>>, %arg7: memref<16x1xf32, #tpu.memory_space<vmem>>, %arg8: memref<3x8xf32, #tpu.memory_space<vmem>>, %arg9: memref<3x1xf32, #tpu.memory_space<vmem>>, %arg10: memref<3x16xf32, #tpu.memory_space<vmem>>, %arg11: memref<3x1xf32, #tpu.memory_space<vmem>>, %arg12: memref<9x1x512xf32, #tpu.memory_space<vmem>>, %arg13: memref<512x2xf32, #tpu.memory_space<vmem>>, %arg14: memref<3x2xf32, #tpu.memory_space<vmem>>, %arg15: memref<3x2xf32, #tpu.memory_space<vmem>>, %arg16: memref<16x512xf32, #tpu.memory_space<vmem>>, %arg17: memref<4x768xf32, #tpu.memory_space<vmem>>, %arg18: memref<8x768xf32, #tpu.memory_space<vmem>>, %arg19: memref<16x768xf32, #tpu.memory_space<vmem>>) attributes {dimension_semantics = [#tpu.dimension_semantics<arbitrary>], iteration_bounds = array<i64: 1>, scalar_prefetch = 0 : i64, scratch_operands = 3 : i64, tpu.core_type = #tpu.core_type<tc>, window_params = [{pipeline_mode = #tpu.pipeline_mode<synchronous>, transform_indices = @transform_0, window_bounds = array<i64: 4, 512>}, {pipeline_mode = #tpu.pipeline_mode<synchronous>, transform_indices = @transform_1, window_bounds = array<i64: 9, 8, 4>}, {pipeline_mode = #tpu.pipeline_mode<synchronous>, transform_indices = @transform_2, window_bounds = array<i64: 8, 1>}, {pipeline_mode = #tpu.pipeline_mode<synchronous>, transform_indices = @transform_3, window_bounds = array<i64: 9, 16, 8>}, {pipeline_mode = #tpu.pipeline_mode<synchronous>, transform_indices = @transform_4, window_bounds = array<i64: 16, 1>}, {pipeline_mode = #tpu.pipeline_mode<synchronous>, transform_indices = @transform_5, window_bounds = array<i64: 9, 16, 16>}, {pipeline_mode = #tpu.pipeline_mode<synchronous>, transform_indices = @transform_6, window_bounds = array<i64: 16, 1>}, {pipeline_mode = #tpu.pipeline_mode<synchronous>, transform_indices = @transform_7, window_bounds = array<i64: 3, 8>}, {pipeline_mode = #tpu.pipeline_mode<synchronous>, transform_indices = @transform_8, window_bounds = array<i64: 3, 1>}, {pipeline_mode = #tpu.pipeline_mode<synchronous>, transform_indices = @transform_9, window_bounds = array<i64: 3, 16>}, {pipeline_mode = #tpu.pipeline_mode<synchronous>, transform_indices = @transform_10, window_bounds = array<i64: 3, 1>}, {pipeline_mode = #tpu.pipeline_mode<synchronous>, transform_indices = @transform_11, window_bounds = array<i64: 9, 1, 512>}, {pipeline_mode = #tpu.pipeline_mode<synchronous>, transform_indices = @transform_12, window_bounds = array<i64: 512, 2>}, {pipeline_mode = #tpu.pipeline_mode<synchronous>, transform_indices = @transform_13, window_bounds = array<i64: 3, 2>}, {pipeline_mode = #tpu.pipeline_mode<synchronous>, transform_indices = @transform_14, window_bounds = array<i64: 3, 2>}, {pipeline_mode = #tpu.pipeline_mode<synchronous>, transform_indices = @transform_15, window_bounds = array<i64: 16, 512>}]} {
    %c0 = arith.constant 0 : index
    %c0_0 = arith.constant 0 : index
    %0 = vector.load %arg1[%c0, %c0_0] : memref<4x512xf32, #tpu.memory_space<vmem>>, vector<4x512xf32>
    %cst = arith.constant 0.000000e+00 : f32
    %1 = vector.broadcast %cst : f32 to vector<4x768xf32>
    %c0_1 = arith.constant 0 : index
    %c0_2 = arith.constant 0 : index
    %2 = vector.load %arg17[%c0_1, %c0_2] : memref<4x768xf32, #tpu.memory_space<vmem>>, vector<4x768xf32>
    tpu.vector_store %arg17[%c0_1, %c0_2], %1 {strides = array<i32>} : memref<4x768xf32, #tpu.memory_space<vmem>>, vector<4x768xf32>,
    %c0_3 = arith.constant 0 : index
    %c128 = arith.constant 128 : index
    %3 = vector.load %arg17[%c0_3, %c128] : memref<4x768xf32, #tpu.memory_space<vmem>>, vector<4x512xf32>
    tpu.vector_store %arg17[%c0_3, %c128], %0 {strides = array<i32>} : memref<4x768xf32, #tpu.memory_space<vmem>>, vector<4x512xf32>,
    %c4 = arith.constant 4 : index
    %c0_4 = arith.constant 0 : index
    %c0_5 = arith.constant 0 : index
    %4 = vector.load %arg2[%c4, %c0_4, %c0_5] : memref<9x8x4xf32, #tpu.memory_space<vmem>>, vector<1x8x4xf32>
    %5 = vector.shape_cast %4 : vector<1x8x4xf32> to vector<8x4xf32>
    %cst_6 = arith.constant dense<0.000000e+00> : vector<8x512xf32>
    %6 = tpu.matmul %5, %0, %cst_6 {dimension_numbers = #tpu.dot_dimension_numbers<[1], [0], [0], [1], [0, 0, 1, 1], [], []>} : vector<8x4xf32>, vector<4x512xf32>, vector<8x512xf32> -> vector<8x512xf32>
    %c0_7 = arith.constant 0 : index
    %c111 = arith.constant 111 : index
    %7 = vector.load %arg17[%c0_7, %c111] : memref<4x768xf32, #tpu.memory_space<vmem>>, vector<4x512xf32>
    %c0_8 = arith.constant 0 : index
    %c0_9 = arith.constant 0 : index
    %c0_10 = arith.constant 0 : index
    %8 = vector.load %arg12[%c0_8, %c0_9, %c0_10] : memref<9x1x512xf32, #tpu.memory_space<vmem>>, vector<1x1x512xf32>
    %9 = vector.shape_cast %8 : vector<1x1x512xf32> to vector<1x512xf32>
    %10 = vector.broadcast %9 : vector<1x512xf32> to vector<4x512xf32>
    %11 = arith.mulf %7, %10 : vector<4x512xf32>
    %c0_11 = arith.constant 0 : index
    %c0_12 = arith.constant 0 : index
    %c0_13 = arith.constant 0 : index
    %12 = vector.load %arg2[%c0_11, %c0_12, %c0_13] : memref<9x8x4xf32, #tpu.memory_space<vmem>>, vector<1x8x4xf32>
    %13 = vector.shape_cast %12 : vector<1x8x4xf32> to vector<8x4xf32>
    %cst_14 = arith.constant dense<0.000000e+00> : vector<8x512xf32>
    %14 = tpu.matmul %13, %11, %cst_14 {dimension_numbers = #tpu.dot_dimension_numbers<[1], [0], [0], [1], [0, 0, 1, 1], [], []>} : vector<8x4xf32>, vector<4x512xf32>, vector<8x512xf32> -> vector<8x512xf32>
    %15 = arith.addf %6, %14 : vector<8x512xf32>
    %c0_15 = arith.constant 0 : index
    %c112 = arith.constant 112 : index
    %16 = vector.load %arg17[%c0_15, %c112] : memref<4x768xf32, #tpu.memory_space<vmem>>, vector<4x512xf32>
    %c1 = arith.constant 1 : index
    %c0_16 = arith.constant 0 : index
    %c0_17 = arith.constant 0 : index
    %17 = vector.load %arg12[%c1, %c0_16, %c0_17] : memref<9x1x512xf32, #tpu.memory_space<vmem>>, vector<1x1x512xf32>
    %18 = vector.shape_cast %17 : vector<1x1x512xf32> to vector<1x512xf32>
    %19 = vector.broadcast %18 : vector<1x512xf32> to vector<4x512xf32>
    %20 = arith.mulf %16, %19 : vector<4x512xf32>
    %c1_18 = arith.constant 1 : index
    %c0_19 = arith.constant 0 : index
    %c0_20 = arith.constant 0 : index
    %21 = vector.load %arg2[%c1_18, %c0_19, %c0_20] : memref<9x8x4xf32, #tpu.memory_space<vmem>>, vector<1x8x4xf32>
    %22 = vector.shape_cast %21 : vector<1x8x4xf32> to vector<8x4xf32>
    %cst_21 = arith.constant dense<0.000000e+00> : vector<8x512xf32>
    %23 = tpu.matmul %22, %20, %cst_21 {dimension_numbers = #tpu.dot_dimension_numbers<[1], [0], [0], [1], [0, 0, 1, 1], [], []>} : vector<8x4xf32>, vector<4x512xf32>, vector<8x512xf32> -> vector<8x512xf32>
    %24 = arith.addf %15, %23 : vector<8x512xf32>
    %c0_22 = arith.constant 0 : index
    %c113 = arith.constant 113 : index
    %25 = vector.load %arg17[%c0_22, %c113] : memref<4x768xf32, #tpu.memory_space<vmem>>, vector<4x512xf32>
    %c2 = arith.constant 2 : index
    %c0_23 = arith.constant 0 : index
    %c0_24 = arith.constant 0 : index
    %26 = vector.load %arg12[%c2, %c0_23, %c0_24] : memref<9x1x512xf32, #tpu.memory_space<vmem>>, vector<1x1x512xf32>
    %27 = vector.shape_cast %26 : vector<1x1x512xf32> to vector<1x512xf32>
    %28 = vector.broadcast %27 : vector<1x512xf32> to vector<4x512xf32>
    %29 = arith.mulf %25, %28 : vector<4x512xf32>
    %c2_25 = arith.constant 2 : index
    %c0_26 = arith.constant 0 : index
    %c0_27 = arith.constant 0 : index
    %30 = vector.load %arg2[%c2_25, %c0_26, %c0_27] : memref<9x8x4xf32, #tpu.memory_space<vmem>>, vector<1x8x4xf32>
    %31 = vector.shape_cast %30 : vector<1x8x4xf32> to vector<8x4xf32>
    %cst_28 = arith.constant dense<0.000000e+00> : vector<8x512xf32>
    %32 = tpu.matmul %31, %29, %cst_28 {dimension_numbers = #tpu.dot_dimension_numbers<[1], [0], [0], [1], [0, 0, 1, 1], [], []>} : vector<8x4xf32>, vector<4x512xf32>, vector<8x512xf32> -> vector<8x512xf32>
    %33 = arith.addf %24, %32 : vector<8x512xf32>
    %c0_29 = arith.constant 0 : index
    %c127 = arith.constant 127 : index
    %34 = vector.load %arg17[%c0_29, %c127] : memref<4x768xf32, #tpu.memory_space<vmem>>, vector<4x512xf32>
    %c3 = arith.constant 3 : index
    %c0_30 = arith.constant 0 : index
    %c0_31 = arith.constant 0 : index
    %35 = vector.load %arg12[%c3, %c0_30, %c0_31] : memref<9x1x512xf32, #tpu.memory_space<vmem>>, vector<1x1x512xf32>
    %36 = vector.shape_cast %35 : vector<1x1x512xf32> to vector<1x512xf32>
    %37 = vector.broadcast %36 : vector<1x512xf32> to vector<4x512xf32>
    %38 = arith.mulf %34, %37 : vector<4x512xf32>
    %c3_32 = arith.constant 3 : index
    %c0_33 = arith.constant 0 : index
    %c0_34 = arith.constant 0 : index
    %39 = vector.load %arg2[%c3_32, %c0_33, %c0_34] : memref<9x8x4xf32, #tpu.memory_space<vmem>>, vector<1x8x4xf32>
    %40 = vector.shape_cast %39 : vector<1x8x4xf32> to vector<8x4xf32>
    %cst_35 = arith.constant dense<0.000000e+00> : vector<8x512xf32>
    %41 = tpu.matmul %40, %38, %cst_35 {dimension_numbers = #tpu.dot_dimension_numbers<[1], [0], [0], [1], [0, 0, 1, 1], [], []>} : vector<8x4xf32>, vector<4x512xf32>, vector<8x512xf32> -> vector<8x512xf32>
    %42 = arith.addf %33, %41 : vector<8x512xf32>
    %c0_36 = arith.constant 0 : index
    %c129 = arith.constant 129 : index
    %43 = vector.load %arg17[%c0_36, %c129] : memref<4x768xf32, #tpu.memory_space<vmem>>, vector<4x512xf32>
    %c5 = arith.constant 5 : index
    %c0_37 = arith.constant 0 : index
    %c0_38 = arith.constant 0 : index
    %44 = vector.load %arg12[%c5, %c0_37, %c0_38] : memref<9x1x512xf32, #tpu.memory_space<vmem>>, vector<1x1x512xf32>
    %45 = vector.shape_cast %44 : vector<1x1x512xf32> to vector<1x512xf32>
    %46 = vector.broadcast %45 : vector<1x512xf32> to vector<4x512xf32>
    %47 = arith.mulf %43, %46 : vector<4x512xf32>
    %c5_39 = arith.constant 5 : index
    %c0_40 = arith.constant 0 : index
    %c0_41 = arith.constant 0 : index
    %48 = vector.load %arg2[%c5_39, %c0_40, %c0_41] : memref<9x8x4xf32, #tpu.memory_space<vmem>>, vector<1x8x4xf32>
    %49 = vector.shape_cast %48 : vector<1x8x4xf32> to vector<8x4xf32>
    %cst_42 = arith.constant dense<0.000000e+00> : vector<8x512xf32>
    %50 = tpu.matmul %49, %47, %cst_42 {dimension_numbers = #tpu.dot_dimension_numbers<[1], [0], [0], [1], [0, 0, 1, 1], [], []>} : vector<8x4xf32>, vector<4x512xf32>, vector<8x512xf32> -> vector<8x512xf32>
    %51 = arith.addf %42, %50 : vector<8x512xf32>
    %c0_43 = arith.constant 0 : index
    %c143 = arith.constant 143 : index
    %52 = vector.load %arg17[%c0_43, %c143] : memref<4x768xf32, #tpu.memory_space<vmem>>, vector<4x512xf32>
    %c6 = arith.constant 6 : index
    %c0_44 = arith.constant 0 : index
    %c0_45 = arith.constant 0 : index
    %53 = vector.load %arg12[%c6, %c0_44, %c0_45] : memref<9x1x512xf32, #tpu.memory_space<vmem>>, vector<1x1x512xf32>
    %54 = vector.shape_cast %53 : vector<1x1x512xf32> to vector<1x512xf32>
    %55 = vector.broadcast %54 : vector<1x512xf32> to vector<4x512xf32>
    %56 = arith.mulf %52, %55 : vector<4x512xf32>
    %c6_46 = arith.constant 6 : index
    %c0_47 = arith.constant 0 : index
    %c0_48 = arith.constant 0 : index
    %57 = vector.load %arg2[%c6_46, %c0_47, %c0_48] : memref<9x8x4xf32, #tpu.memory_space<vmem>>, vector<1x8x4xf32>
    %58 = vector.shape_cast %57 : vector<1x8x4xf32> to vector<8x4xf32>
    %cst_49 = arith.constant dense<0.000000e+00> : vector<8x512xf32>
    %59 = tpu.matmul %58, %56, %cst_49 {dimension_numbers = #tpu.dot_dimension_numbers<[1], [0], [0], [1], [0, 0, 1, 1], [], []>} : vector<8x4xf32>, vector<4x512xf32>, vector<8x512xf32> -> vector<8x512xf32>
    %60 = arith.addf %51, %59 : vector<8x512xf32>
    %c0_50 = arith.constant 0 : index
    %c144 = arith.constant 144 : index
    %61 = vector.load %arg17[%c0_50, %c144] : memref<4x768xf32, #tpu.memory_space<vmem>>, vector<4x512xf32>
    %c7 = arith.constant 7 : index
    %c0_51 = arith.constant 0 : index
    %c0_52 = arith.constant 0 : index
    %62 = vector.load %arg12[%c7, %c0_51, %c0_52] : memref<9x1x512xf32, #tpu.memory_space<vmem>>, vector<1x1x512xf32>
    %63 = vector.shape_cast %62 : vector<1x1x512xf32> to vector<1x512xf32>
    %64 = vector.broadcast %63 : vector<1x512xf32> to vector<4x512xf32>
    %65 = arith.mulf %61, %64 : vector<4x512xf32>
    %c7_53 = arith.constant 7 : index
    %c0_54 = arith.constant 0 : index
    %c0_55 = arith.constant 0 : index
    %66 = vector.load %arg2[%c7_53, %c0_54, %c0_55] : memref<9x8x4xf32, #tpu.memory_space<vmem>>, vector<1x8x4xf32>
    %67 = vector.shape_cast %66 : vector<1x8x4xf32> to vector<8x4xf32>
    %cst_56 = arith.constant dense<0.000000e+00> : vector<8x512xf32>
    %68 = tpu.matmul %67, %65, %cst_56 {dimension_numbers = #tpu.dot_dimension_numbers<[1], [0], [0], [1], [0, 0, 1, 1], [], []>} : vector<8x4xf32>, vector<4x512xf32>, vector<8x512xf32> -> vector<8x512xf32>
    %69 = arith.addf %60, %68 : vector<8x512xf32>
    %c0_57 = arith.constant 0 : index
    %c145 = arith.constant 145 : index
    %70 = vector.load %arg17[%c0_57, %c145] : memref<4x768xf32, #tpu.memory_space<vmem>>, vector<4x512xf32>
    %c8 = arith.constant 8 : index
    %c0_58 = arith.constant 0 : index
    %c0_59 = arith.constant 0 : index
    %71 = vector.load %arg12[%c8, %c0_58, %c0_59] : memref<9x1x512xf32, #tpu.memory_space<vmem>>, vector<1x1x512xf32>
    %72 = vector.shape_cast %71 : vector<1x1x512xf32> to vector<1x512xf32>
    %73 = vector.broadcast %72 : vector<1x512xf32> to vector<4x512xf32>
    %74 = arith.mulf %70, %73 : vector<4x512xf32>
    %c8_60 = arith.constant 8 : index
    %c0_61 = arith.constant 0 : index
    %c0_62 = arith.constant 0 : index
    %75 = vector.load %arg2[%c8_60, %c0_61, %c0_62] : memref<9x8x4xf32, #tpu.memory_space<vmem>>, vector<1x8x4xf32>
    %76 = vector.shape_cast %75 : vector<1x8x4xf32> to vector<8x4xf32>
    %cst_63 = arith.constant dense<0.000000e+00> : vector<8x512xf32>
    %77 = tpu.matmul %76, %74, %cst_63 {dimension_numbers = #tpu.dot_dimension_numbers<[1], [0], [0], [1], [0, 0, 1, 1], [], []>} : vector<8x4xf32>, vector<4x512xf32>, vector<8x512xf32> -> vector<8x512xf32>
    %78 = arith.addf %69, %77 : vector<8x512xf32>
    %c0_64 = arith.constant 0 : index
    %c0_65 = arith.constant 0 : index
    %79 = vector.load %arg3[%c0_64, %c0_65] : memref<8x1xf32, #tpu.memory_space<vmem>>, vector<8x1xf32>
    %80 = vector.broadcast %79 : vector<8x1xf32> to vector<8x512xf32>
    %81 = arith.addf %78, %80 : vector<8x512xf32>
    %cst_66 = arith.constant 0.000000e+00 : f32
    %82 = vector.broadcast %cst_66 : f32 to vector<8x512xf32>
    %83 = arith.maximumf %81, %82 : vector<8x512xf32>
    %cst_67 = arith.constant 0.000000e+00 : f32
    %84 = vector.broadcast %cst_67 : f32 to vector<8x768xf32>
    %c0_68 = arith.constant 0 : index
    %c0_69 = arith.constant 0 : index
    %85 = vector.load %arg18[%c0_68, %c0_69] : memref<8x768xf32, #tpu.memory_space<vmem>>, vector<8x768xf32>
    tpu.vector_store %arg18[%c0_68, %c0_69], %84 {strides = array<i32>} : memref<8x768xf32, #tpu.memory_space<vmem>>, vector<8x768xf32>,
    %c0_70 = arith.constant 0 : index
    %c128_71 = arith.constant 128 : index
    %86 = vector.load %arg18[%c0_70, %c128_71] : memref<8x768xf32, #tpu.memory_space<vmem>>, vector<8x512xf32>
    tpu.vector_store %arg18[%c0_70, %c128_71], %83 {strides = array<i32>} : memref<8x768xf32, #tpu.memory_space<vmem>>, vector<8x512xf32>,
    %c4_72 = arith.constant 4 : index
    %c0_73 = arith.constant 0 : index
    %c0_74 = arith.constant 0 : index
    %87 = vector.load %arg4[%c4_72, %c0_73, %c0_74] : memref<9x16x8xf32, #tpu.memory_space<vmem>>, vector<1x16x8xf32>
    %88 = vector.shape_cast %87 : vector<1x16x8xf32> to vector<16x8xf32>
    %cst_75 = arith.constant dense<0.000000e+00> : vector<16x512xf32>
    %89 = tpu.matmul %88, %83, %cst_75 {dimension_numbers = #tpu.dot_dimension_numbers<[1], [0], [0], [1], [0, 0, 1, 1], [], []>} : vector<16x8xf32>, vector<8x512xf32>, vector<16x512xf32> -> vector<16x512xf32>
    %c0_76 = arith.constant 0 : index
    %c111_77 = arith.constant 111 : index
    %90 = vector.load %arg18[%c0_76, %c111_77] : memref<8x768xf32, #tpu.memory_space<vmem>>, vector<8x512xf32>
    %c0_78 = arith.constant 0 : index
    %c0_79 = arith.constant 0 : index
    %c0_80 = arith.constant 0 : index
    %91 = vector.load %arg12[%c0_78, %c0_79, %c0_80] : memref<9x1x512xf32, #tpu.memory_space<vmem>>, vector<1x1x512xf32>
    %92 = vector.shape_cast %91 : vector<1x1x512xf32> to vector<1x512xf32>
    %93 = vector.broadcast %92 : vector<1x512xf32> to vector<8x512xf32>
    %94 = arith.mulf %90, %93 : vector<8x512xf32>
    %c0_81 = arith.constant 0 : index
    %c0_82 = arith.constant 0 : index
    %c0_83 = arith.constant 0 : index
    %95 = vector.load %arg4[%c0_81, %c0_82, %c0_83] : memref<9x16x8xf32, #tpu.memory_space<vmem>>, vector<1x16x8xf32>
    %96 = vector.shape_cast %95 : vector<1x16x8xf32> to vector<16x8xf32>
    %cst_84 = arith.constant dense<0.000000e+00> : vector<16x512xf32>
    %97 = tpu.matmul %96, %94, %cst_84 {dimension_numbers = #tpu.dot_dimension_numbers<[1], [0], [0], [1], [0, 0, 1, 1], [], []>} : vector<16x8xf32>, vector<8x512xf32>, vector<16x512xf32> -> vector<16x512xf32>
    %98 = arith.addf %89, %97 : vector<16x512xf32>
    %c0_85 = arith.constant 0 : index
    %c112_86 = arith.constant 112 : index
    %99 = vector.load %arg18[%c0_85, %c112_86] : memref<8x768xf32, #tpu.memory_space<vmem>>, vector<8x512xf32>
    %c1_87 = arith.constant 1 : index
    %c0_88 = arith.constant 0 : index
    %c0_89 = arith.constant 0 : index
    %100 = vector.load %arg12[%c1_87, %c0_88, %c0_89] : memref<9x1x512xf32, #tpu.memory_space<vmem>>, vector<1x1x512xf32>
    %101 = vector.shape_cast %100 : vector<1x1x512xf32> to vector<1x512xf32>
    %102 = vector.broadcast %101 : vector<1x512xf32> to vector<8x512xf32>
    %103 = arith.mulf %99, %102 : vector<8x512xf32>
    %c1_90 = arith.constant 1 : index
    %c0_91 = arith.constant 0 : index
    %c0_92 = arith.constant 0 : index
    %104 = vector.load %arg4[%c1_90, %c0_91, %c0_92] : memref<9x16x8xf32, #tpu.memory_space<vmem>>, vector<1x16x8xf32>
    %105 = vector.shape_cast %104 : vector<1x16x8xf32> to vector<16x8xf32>
    %cst_93 = arith.constant dense<0.000000e+00> : vector<16x512xf32>
    %106 = tpu.matmul %105, %103, %cst_93 {dimension_numbers = #tpu.dot_dimension_numbers<[1], [0], [0], [1], [0, 0, 1, 1], [], []>} : vector<16x8xf32>, vector<8x512xf32>, vector<16x512xf32> -> vector<16x512xf32>
    %107 = arith.addf %98, %106 : vector<16x512xf32>
    %c0_94 = arith.constant 0 : index
    %c113_95 = arith.constant 113 : index
    %108 = vector.load %arg18[%c0_94, %c113_95] : memref<8x768xf32, #tpu.memory_space<vmem>>, vector<8x512xf32>
    %c2_96 = arith.constant 2 : index
    %c0_97 = arith.constant 0 : index
    %c0_98 = arith.constant 0 : index
    %109 = vector.load %arg12[%c2_96, %c0_97, %c0_98] : memref<9x1x512xf32, #tpu.memory_space<vmem>>, vector<1x1x512xf32>
    %110 = vector.shape_cast %109 : vector<1x1x512xf32> to vector<1x512xf32>
    %111 = vector.broadcast %110 : vector<1x512xf32> to vector<8x512xf32>
    %112 = arith.mulf %108, %111 : vector<8x512xf32>
    %c2_99 = arith.constant 2 : index
    %c0_100 = arith.constant 0 : index
    %c0_101 = arith.constant 0 : index
    %113 = vector.load %arg4[%c2_99, %c0_100, %c0_101] : memref<9x16x8xf32, #tpu.memory_space<vmem>>, vector<1x16x8xf32>
    %114 = vector.shape_cast %113 : vector<1x16x8xf32> to vector<16x8xf32>
    %cst_102 = arith.constant dense<0.000000e+00> : vector<16x512xf32>
    %115 = tpu.matmul %114, %112, %cst_102 {dimension_numbers = #tpu.dot_dimension_numbers<[1], [0], [0], [1], [0, 0, 1, 1], [], []>} : vector<16x8xf32>, vector<8x512xf32>, vector<16x512xf32> -> vector<16x512xf32>
    %116 = arith.addf %107, %115 : vector<16x512xf32>
    %c0_103 = arith.constant 0 : index
    %c127_104 = arith.constant 127 : index
    %117 = vector.load %arg18[%c0_103, %c127_104] : memref<8x768xf32, #tpu.memory_space<vmem>>, vector<8x512xf32>
    %c3_105 = arith.constant 3 : index
    %c0_106 = arith.constant 0 : index
    %c0_107 = arith.constant 0 : index
    %118 = vector.load %arg12[%c3_105, %c0_106, %c0_107] : memref<9x1x512xf32, #tpu.memory_space<vmem>>, vector<1x1x512xf32>
    %119 = vector.shape_cast %118 : vector<1x1x512xf32> to vector<1x512xf32>
    %120 = vector.broadcast %119 : vector<1x512xf32> to vector<8x512xf32>
    %121 = arith.mulf %117, %120 : vector<8x512xf32>
    %c3_108 = arith.constant 3 : index
    %c0_109 = arith.constant 0 : index
    %c0_110 = arith.constant 0 : index
    %122 = vector.load %arg4[%c3_108, %c0_109, %c0_110] : memref<9x16x8xf32, #tpu.memory_space<vmem>>, vector<1x16x8xf32>
    %123 = vector.shape_cast %122 : vector<1x16x8xf32> to vector<16x8xf32>
    %cst_111 = arith.constant dense<0.000000e+00> : vector<16x512xf32>
    %124 = tpu.matmul %123, %121, %cst_111 {dimension_numbers = #tpu.dot_dimension_numbers<[1], [0], [0], [1], [0, 0, 1, 1], [], []>} : vector<16x8xf32>, vector<8x512xf32>, vector<16x512xf32> -> vector<16x512xf32>
    %125 = arith.addf %116, %124 : vector<16x512xf32>
    %c0_112 = arith.constant 0 : index
    %c129_113 = arith.constant 129 : index
    %126 = vector.load %arg18[%c0_112, %c129_113] : memref<8x768xf32, #tpu.memory_space<vmem>>, vector<8x512xf32>
    %c5_114 = arith.constant 5 : index
    %c0_115 = arith.constant 0 : index
    %c0_116 = arith.constant 0 : index
    %127 = vector.load %arg12[%c5_114, %c0_115, %c0_116] : memref<9x1x512xf32, #tpu.memory_space<vmem>>, vector<1x1x512xf32>
    %128 = vector.shape_cast %127 : vector<1x1x512xf32> to vector<1x512xf32>
    %129 = vector.broadcast %128 : vector<1x512xf32> to vector<8x512xf32>
    %130 = arith.mulf %126, %129 : vector<8x512xf32>
    %c5_117 = arith.constant 5 : index
    %c0_118 = arith.constant 0 : index
    %c0_119 = arith.constant 0 : index
    %131 = vector.load %arg4[%c5_117, %c0_118, %c0_119] : memref<9x16x8xf32, #tpu.memory_space<vmem>>, vector<1x16x8xf32>
    %132 = vector.shape_cast %131 : vector<1x16x8xf32> to vector<16x8xf32>
    %cst_120 = arith.constant dense<0.000000e+00> : vector<16x512xf32>
    %133 = tpu.matmul %132, %130, %cst_120 {dimension_numbers = #tpu.dot_dimension_numbers<[1], [0], [0], [1], [0, 0, 1, 1], [], []>} : vector<16x8xf32>, vector<8x512xf32>, vector<16x512xf32> -> vector<16x512xf32>
    %134 = arith.addf %125, %133 : vector<16x512xf32>
    %c0_121 = arith.constant 0 : index
    %c143_122 = arith.constant 143 : index
    %135 = vector.load %arg18[%c0_121, %c143_122] : memref<8x768xf32, #tpu.memory_space<vmem>>, vector<8x512xf32>
    %c6_123 = arith.constant 6 : index
    %c0_124 = arith.constant 0 : index
    %c0_125 = arith.constant 0 : index
    %136 = vector.load %arg12[%c6_123, %c0_124, %c0_125] : memref<9x1x512xf32, #tpu.memory_space<vmem>>, vector<1x1x512xf32>
    %137 = vector.shape_cast %136 : vector<1x1x512xf32> to vector<1x512xf32>
    %138 = vector.broadcast %137 : vector<1x512xf32> to vector<8x512xf32>
    %139 = arith.mulf %135, %138 : vector<8x512xf32>
    %c6_126 = arith.constant 6 : index
    %c0_127 = arith.constant 0 : index
    %c0_128 = arith.constant 0 : index
    %140 = vector.load %arg4[%c6_126, %c0_127, %c0_128] : memref<9x16x8xf32, #tpu.memory_space<vmem>>, vector<1x16x8xf32>
    %141 = vector.shape_cast %140 : vector<1x16x8xf32> to vector<16x8xf32>
    %cst_129 = arith.constant dense<0.000000e+00> : vector<16x512xf32>
    %142 = tpu.matmul %141, %139, %cst_129 {dimension_numbers = #tpu.dot_dimension_numbers<[1], [0], [0], [1], [0, 0, 1, 1], [], []>} : vector<16x8xf32>, vector<8x512xf32>, vector<16x512xf32> -> vector<16x512xf32>
    %143 = arith.addf %134, %142 : vector<16x512xf32>
    %c0_130 = arith.constant 0 : index
    %c144_131 = arith.constant 144 : index
    %144 = vector.load %arg18[%c0_130, %c144_131] : memref<8x768xf32, #tpu.memory_space<vmem>>, vector<8x512xf32>
    %c7_132 = arith.constant 7 : index
    %c0_133 = arith.constant 0 : index
    %c0_134 = arith.constant 0 : index
    %145 = vector.load %arg12[%c7_132, %c0_133, %c0_134] : memref<9x1x512xf32, #tpu.memory_space<vmem>>, vector<1x1x512xf32>
    %146 = vector.shape_cast %145 : vector<1x1x512xf32> to vector<1x512xf32>
    %147 = vector.broadcast %146 : vector<1x512xf32> to vector<8x512xf32>
    %148 = arith.mulf %144, %147 : vector<8x512xf32>
    %c7_135 = arith.constant 7 : index
    %c0_136 = arith.constant 0 : index
    %c0_137 = arith.constant 0 : index
    %149 = vector.load %arg4[%c7_135, %c0_136, %c0_137] : memref<9x16x8xf32, #tpu.memory_space<vmem>>, vector<1x16x8xf32>
    %150 = vector.shape_cast %149 : vector<1x16x8xf32> to vector<16x8xf32>
    %cst_138 = arith.constant dense<0.000000e+00> : vector<16x512xf32>
    %151 = tpu.matmul %150, %148, %cst_138 {dimension_numbers = #tpu.dot_dimension_numbers<[1], [0], [0], [1], [0, 0, 1, 1], [], []>} : vector<16x8xf32>, vector<8x512xf32>, vector<16x512xf32> -> vector<16x512xf32>
    %152 = arith.addf %143, %151 : vector<16x512xf32>
    %c0_139 = arith.constant 0 : index
    %c145_140 = arith.constant 145 : index
    %153 = vector.load %arg18[%c0_139, %c145_140] : memref<8x768xf32, #tpu.memory_space<vmem>>, vector<8x512xf32>
    %c8_141 = arith.constant 8 : index
    %c0_142 = arith.constant 0 : index
    %c0_143 = arith.constant 0 : index
    %154 = vector.load %arg12[%c8_141, %c0_142, %c0_143] : memref<9x1x512xf32, #tpu.memory_space<vmem>>, vector<1x1x512xf32>
    %155 = vector.shape_cast %154 : vector<1x1x512xf32> to vector<1x512xf32>
    %156 = vector.broadcast %155 : vector<1x512xf32> to vector<8x512xf32>
    %157 = arith.mulf %153, %156 : vector<8x512xf32>
    %c8_144 = arith.constant 8 : index
    %c0_145 = arith.constant 0 : index
    %c0_146 = arith.constant 0 : index
    %158 = vector.load %arg4[%c8_144, %c0_145, %c0_146] : memref<9x16x8xf32, #tpu.memory_space<vmem>>, vector<1x16x8xf32>
    %159 = vector.shape_cast %158 : vector<1x16x8xf32> to vector<16x8xf32>
    %cst_147 = arith.constant dense<0.000000e+00> : vector<16x512xf32>
    %160 = tpu.matmul %159, %157, %cst_147 {dimension_numbers = #tpu.dot_dimension_numbers<[1], [0], [0], [1], [0, 0, 1, 1], [], []>} : vector<16x8xf32>, vector<8x512xf32>, vector<16x512xf32> -> vector<16x512xf32>
    %161 = arith.addf %152, %160 : vector<16x512xf32>
    %c0_148 = arith.constant 0 : index
    %c0_149 = arith.constant 0 : index
    %162 = vector.load %arg5[%c0_148, %c0_149] : memref<16x1xf32, #tpu.memory_space<vmem>>, vector<16x1xf32>
    %163 = vector.broadcast %162 : vector<16x1xf32> to vector<16x512xf32>
    %164 = arith.addf %161, %163 : vector<16x512xf32>
    %cst_150 = arith.constant 0.000000e+00 : f32
    %165 = vector.broadcast %cst_150 : f32 to vector<16x512xf32>
    %166 = arith.maximumf %164, %165 : vector<16x512xf32>
    %cst_151 = arith.constant 0.000000e+00 : f32
    %167 = vector.broadcast %cst_151 : f32 to vector<16x768xf32>
    %c0_152 = arith.constant 0 : index
    %c0_153 = arith.constant 0 : index
    %168 = vector.load %arg19[%c0_152, %c0_153] : memref<16x768xf32, #tpu.memory_space<vmem>>, vector<16x768xf32>
    tpu.vector_store %arg19[%c0_152, %c0_153], %167 {strides = array<i32>} : memref<16x768xf32, #tpu.memory_space<vmem>>, vector<16x768xf32>,
    %c0_154 = arith.constant 0 : index
    %c128_155 = arith.constant 128 : index
    %169 = vector.load %arg19[%c0_154, %c128_155] : memref<16x768xf32, #tpu.memory_space<vmem>>, vector<16x512xf32>
    tpu.vector_store %arg19[%c0_154, %c128_155], %166 {strides = array<i32>} : memref<16x768xf32, #tpu.memory_space<vmem>>, vector<16x512xf32>,
    %c4_156 = arith.constant 4 : index
    %c0_157 = arith.constant 0 : index
    %c0_158 = arith.constant 0 : index
    %170 = vector.load %arg6[%c4_156, %c0_157, %c0_158] : memref<9x16x16xf32, #tpu.memory_space<vmem>>, vector<1x16x16xf32>
    %171 = vector.shape_cast %170 : vector<1x16x16xf32> to vector<16x16xf32>
    %cst_159 = arith.constant dense<0.000000e+00> : vector<16x512xf32>
    %172 = tpu.matmul %171, %166, %cst_159 {dimension_numbers = #tpu.dot_dimension_numbers<[1], [0], [0], [1], [0, 0, 1, 1], [], []>} : vector<16x16xf32>, vector<16x512xf32>, vector<16x512xf32> -> vector<16x512xf32>
    %c0_160 = arith.constant 0 : index
    %c111_161 = arith.constant 111 : index
    %173 = vector.load %arg19[%c0_160, %c111_161] : memref<16x768xf32, #tpu.memory_space<vmem>>, vector<16x512xf32>
    %c0_162 = arith.constant 0 : index
    %c0_163 = arith.constant 0 : index
    %c0_164 = arith.constant 0 : index
    %174 = vector.load %arg12[%c0_162, %c0_163, %c0_164] : memref<9x1x512xf32, #tpu.memory_space<vmem>>, vector<1x1x512xf32>
    %175 = vector.shape_cast %174 : vector<1x1x512xf32> to vector<1x512xf32>
    %176 = vector.broadcast %175 : vector<1x512xf32> to vector<16x512xf32>
    %177 = arith.mulf %173, %176 : vector<16x512xf32>
    %c0_165 = arith.constant 0 : index
    %c0_166 = arith.constant 0 : index
    %c0_167 = arith.constant 0 : index
    %178 = vector.load %arg6[%c0_165, %c0_166, %c0_167] : memref<9x16x16xf32, #tpu.memory_space<vmem>>, vector<1x16x16xf32>
    %179 = vector.shape_cast %178 : vector<1x16x16xf32> to vector<16x16xf32>
    %cst_168 = arith.constant dense<0.000000e+00> : vector<16x512xf32>
    %180 = tpu.matmul %179, %177, %cst_168 {dimension_numbers = #tpu.dot_dimension_numbers<[1], [0], [0], [1], [0, 0, 1, 1], [], []>} : vector<16x16xf32>, vector<16x512xf32>, vector<16x512xf32> -> vector<16x512xf32>
    %181 = arith.addf %172, %180 : vector<16x512xf32>
    %c0_169 = arith.constant 0 : index
    %c112_170 = arith.constant 112 : index
    %182 = vector.load %arg19[%c0_169, %c112_170] : memref<16x768xf32, #tpu.memory_space<vmem>>, vector<16x512xf32>
    %c1_171 = arith.constant 1 : index
    %c0_172 = arith.constant 0 : index
    %c0_173 = arith.constant 0 : index
    %183 = vector.load %arg12[%c1_171, %c0_172, %c0_173] : memref<9x1x512xf32, #tpu.memory_space<vmem>>, vector<1x1x512xf32>
    %184 = vector.shape_cast %183 : vector<1x1x512xf32> to vector<1x512xf32>
    %185 = vector.broadcast %184 : vector<1x512xf32> to vector<16x512xf32>
    %186 = arith.mulf %182, %185 : vector<16x512xf32>
    %c1_174 = arith.constant 1 : index
    %c0_175 = arith.constant 0 : index
    %c0_176 = arith.constant 0 : index
    %187 = vector.load %arg6[%c1_174, %c0_175, %c0_176] : memref<9x16x16xf32, #tpu.memory_space<vmem>>, vector<1x16x16xf32>
    %188 = vector.shape_cast %187 : vector<1x16x16xf32> to vector<16x16xf32>
    %cst_177 = arith.constant dense<0.000000e+00> : vector<16x512xf32>
    %189 = tpu.matmul %188, %186, %cst_177 {dimension_numbers = #tpu.dot_dimension_numbers<[1], [0], [0], [1], [0, 0, 1, 1], [], []>} : vector<16x16xf32>, vector<16x512xf32>, vector<16x512xf32> -> vector<16x512xf32>
    %190 = arith.addf %181, %189 : vector<16x512xf32>
    %c0_178 = arith.constant 0 : index
    %c113_179 = arith.constant 113 : index
    %191 = vector.load %arg19[%c0_178, %c113_179] : memref<16x768xf32, #tpu.memory_space<vmem>>, vector<16x512xf32>
    %c2_180 = arith.constant 2 : index
    %c0_181 = arith.constant 0 : index
    %c0_182 = arith.constant 0 : index
    %192 = vector.load %arg12[%c2_180, %c0_181, %c0_182] : memref<9x1x512xf32, #tpu.memory_space<vmem>>, vector<1x1x512xf32>
    %193 = vector.shape_cast %192 : vector<1x1x512xf32> to vector<1x512xf32>
    %194 = vector.broadcast %193 : vector<1x512xf32> to vector<16x512xf32>
    %195 = arith.mulf %191, %194 : vector<16x512xf32>
    %c2_183 = arith.constant 2 : index
    %c0_184 = arith.constant 0 : index
    %c0_185 = arith.constant 0 : index
    %196 = vector.load %arg6[%c2_183, %c0_184, %c0_185] : memref<9x16x16xf32, #tpu.memory_space<vmem>>, vector<1x16x16xf32>
    %197 = vector.shape_cast %196 : vector<1x16x16xf32> to vector<16x16xf32>
    %cst_186 = arith.constant dense<0.000000e+00> : vector<16x512xf32>
    %198 = tpu.matmul %197, %195, %cst_186 {dimension_numbers = #tpu.dot_dimension_numbers<[1], [0], [0], [1], [0, 0, 1, 1], [], []>} : vector<16x16xf32>, vector<16x512xf32>, vector<16x512xf32> -> vector<16x512xf32>
    %199 = arith.addf %190, %198 : vector<16x512xf32>
    %c0_187 = arith.constant 0 : index
    %c127_188 = arith.constant 127 : index
    %200 = vector.load %arg19[%c0_187, %c127_188] : memref<16x768xf32, #tpu.memory_space<vmem>>, vector<16x512xf32>
    %c3_189 = arith.constant 3 : index
    %c0_190 = arith.constant 0 : index
    %c0_191 = arith.constant 0 : index
    %201 = vector.load %arg12[%c3_189, %c0_190, %c0_191] : memref<9x1x512xf32, #tpu.memory_space<vmem>>, vector<1x1x512xf32>
    %202 = vector.shape_cast %201 : vector<1x1x512xf32> to vector<1x512xf32>
    %203 = vector.broadcast %202 : vector<1x512xf32> to vector<16x512xf32>
    %204 = arith.mulf %200, %203 : vector<16x512xf32>
    %c3_192 = arith.constant 3 : index
    %c0_193 = arith.constant 0 : index
    %c0_194 = arith.constant 0 : index
    %205 = vector.load %arg6[%c3_192, %c0_193, %c0_194] : memref<9x16x16xf32, #tpu.memory_space<vmem>>, vector<1x16x16xf32>
    %206 = vector.shape_cast %205 : vector<1x16x16xf32> to vector<16x16xf32>
    %cst_195 = arith.constant dense<0.000000e+00> : vector<16x512xf32>
    %207 = tpu.matmul %206, %204, %cst_195 {dimension_numbers = #tpu.dot_dimension_numbers<[1], [0], [0], [1], [0, 0, 1, 1], [], []>} : vector<16x16xf32>, vector<16x512xf32>, vector<16x512xf32> -> vector<16x512xf32>
    %208 = arith.addf %199, %207 : vector<16x512xf32>
    %c0_196 = arith.constant 0 : index
    %c129_197 = arith.constant 129 : index
    %209 = vector.load %arg19[%c0_196, %c129_197] : memref<16x768xf32, #tpu.memory_space<vmem>>, vector<16x512xf32>
    %c5_198 = arith.constant 5 : index
    %c0_199 = arith.constant 0 : index
    %c0_200 = arith.constant 0 : index
    %210 = vector.load %arg12[%c5_198, %c0_199, %c0_200] : memref<9x1x512xf32, #tpu.memory_space<vmem>>, vector<1x1x512xf32>
    %211 = vector.shape_cast %210 : vector<1x1x512xf32> to vector<1x512xf32>
    %212 = vector.broadcast %211 : vector<1x512xf32> to vector<16x512xf32>
    %213 = arith.mulf %209, %212 : vector<16x512xf32>
    %c5_201 = arith.constant 5 : index
    %c0_202 = arith.constant 0 : index
    %c0_203 = arith.constant 0 : index
    %214 = vector.load %arg6[%c5_201, %c0_202, %c0_203] : memref<9x16x16xf32, #tpu.memory_space<vmem>>, vector<1x16x16xf32>
    %215 = vector.shape_cast %214 : vector<1x16x16xf32> to vector<16x16xf32>
    %cst_204 = arith.constant dense<0.000000e+00> : vector<16x512xf32>
    %216 = tpu.matmul %215, %213, %cst_204 {dimension_numbers = #tpu.dot_dimension_numbers<[1], [0], [0], [1], [0, 0, 1, 1], [], []>} : vector<16x16xf32>, vector<16x512xf32>, vector<16x512xf32> -> vector<16x512xf32>
    %217 = arith.addf %208, %216 : vector<16x512xf32>
    %c0_205 = arith.constant 0 : index
    %c143_206 = arith.constant 143 : index
    %218 = vector.load %arg19[%c0_205, %c143_206] : memref<16x768xf32, #tpu.memory_space<vmem>>, vector<16x512xf32>
    %c6_207 = arith.constant 6 : index
    %c0_208 = arith.constant 0 : index
    %c0_209 = arith.constant 0 : index
    %219 = vector.load %arg12[%c6_207, %c0_208, %c0_209] : memref<9x1x512xf32, #tpu.memory_space<vmem>>, vector<1x1x512xf32>
    %220 = vector.shape_cast %219 : vector<1x1x512xf32> to vector<1x512xf32>
    %221 = vector.broadcast %220 : vector<1x512xf32> to vector<16x512xf32>
    %222 = arith.mulf %218, %221 : vector<16x512xf32>
    %c6_210 = arith.constant 6 : index
    %c0_211 = arith.constant 0 : index
    %c0_212 = arith.constant 0 : index
    %223 = vector.load %arg6[%c6_210, %c0_211, %c0_212] : memref<9x16x16xf32, #tpu.memory_space<vmem>>, vector<1x16x16xf32>
    %224 = vector.shape_cast %223 : vector<1x16x16xf32> to vector<16x16xf32>
    %cst_213 = arith.constant dense<0.000000e+00> : vector<16x512xf32>
    %225 = tpu.matmul %224, %222, %cst_213 {dimension_numbers = #tpu.dot_dimension_numbers<[1], [0], [0], [1], [0, 0, 1, 1], [], []>} : vector<16x16xf32>, vector<16x512xf32>, vector<16x512xf32> -> vector<16x512xf32>
    %226 = arith.addf %217, %225 : vector<16x512xf32>
    %c0_214 = arith.constant 0 : index
    %c144_215 = arith.constant 144 : index
    %227 = vector.load %arg19[%c0_214, %c144_215] : memref<16x768xf32, #tpu.memory_space<vmem>>, vector<16x512xf32>
    %c7_216 = arith.constant 7 : index
    %c0_217 = arith.constant 0 : index
    %c0_218 = arith.constant 0 : index
    %228 = vector.load %arg12[%c7_216, %c0_217, %c0_218] : memref<9x1x512xf32, #tpu.memory_space<vmem>>, vector<1x1x512xf32>
    %229 = vector.shape_cast %228 : vector<1x1x512xf32> to vector<1x512xf32>
    %230 = vector.broadcast %229 : vector<1x512xf32> to vector<16x512xf32>
    %231 = arith.mulf %227, %230 : vector<16x512xf32>
    %c7_219 = arith.constant 7 : index
    %c0_220 = arith.constant 0 : index
    %c0_221 = arith.constant 0 : index
    %232 = vector.load %arg6[%c7_219, %c0_220, %c0_221] : memref<9x16x16xf32, #tpu.memory_space<vmem>>, vector<1x16x16xf32>
    %233 = vector.shape_cast %232 : vector<1x16x16xf32> to vector<16x16xf32>
    %cst_222 = arith.constant dense<0.000000e+00> : vector<16x512xf32>
    %234 = tpu.matmul %233, %231, %cst_222 {dimension_numbers = #tpu.dot_dimension_numbers<[1], [0], [0], [1], [0, 0, 1, 1], [], []>} : vector<16x16xf32>, vector<16x512xf32>, vector<16x512xf32> -> vector<16x512xf32>
    %235 = arith.addf %226, %234 : vector<16x512xf32>
    %c0_223 = arith.constant 0 : index
    %c145_224 = arith.constant 145 : index
    %236 = vector.load %arg19[%c0_223, %c145_224] : memref<16x768xf32, #tpu.memory_space<vmem>>, vector<16x512xf32>
    %c8_225 = arith.constant 8 : index
    %c0_226 = arith.constant 0 : index
    %c0_227 = arith.constant 0 : index
    %237 = vector.load %arg12[%c8_225, %c0_226, %c0_227] : memref<9x1x512xf32, #tpu.memory_space<vmem>>, vector<1x1x512xf32>
    %238 = vector.shape_cast %237 : vector<1x1x512xf32> to vector<1x512xf32>
    %239 = vector.broadcast %238 : vector<1x512xf32> to vector<16x512xf32>
    %240 = arith.mulf %236, %239 : vector<16x512xf32>
    %c8_228 = arith.constant 8 : index
    %c0_229 = arith.constant 0 : index
    %c0_230 = arith.constant 0 : index
    %241 = vector.load %arg6[%c8_228, %c0_229, %c0_230] : memref<9x16x16xf32, #tpu.memory_space<vmem>>, vector<1x16x16xf32>
    %242 = vector.shape_cast %241 : vector<1x16x16xf32> to vector<16x16xf32>
    %cst_231 = arith.constant dense<0.000000e+00> : vector<16x512xf32>
    %243 = tpu.matmul %242, %240, %cst_231 {dimension_numbers = #tpu.dot_dimension_numbers<[1], [0], [0], [1], [0, 0, 1, 1], [], []>} : vector<16x16xf32>, vector<16x512xf32>, vector<16x512xf32> -> vector<16x512xf32>
    %244 = arith.addf %235, %243 : vector<16x512xf32>
    %c0_232 = arith.constant 0 : index
    %c0_233 = arith.constant 0 : index
    %245 = vector.load %arg7[%c0_232, %c0_233] : memref<16x1xf32, #tpu.memory_space<vmem>>, vector<16x1xf32>
    %246 = vector.broadcast %245 : vector<16x1xf32> to vector<16x512xf32>
    %247 = arith.addf %244, %246 : vector<16x512xf32>
    %c0_234 = arith.constant 0 : index
    %c0_235 = arith.constant 0 : index
    %248 = vector.load %arg13[%c0_234, %c0_235] : memref<512x2xf32, #tpu.memory_space<vmem>>, vector<512x2xf32>
    %cst_236 = arith.constant dense<0.000000e+00> : vector<8x2xf32>
    %249 = tpu.matmul %83, %248, %cst_236 {dimension_numbers = #tpu.dot_dimension_numbers<[1], [0], [0], [1], [0, 0, 1, 1], [], []>} : vector<8x512xf32>, vector<512x2xf32>, vector<8x2xf32> -> vector<8x2xf32>
    %c0_237 = arith.constant 0 : index
    %c0_238 = arith.constant 0 : index
    %250 = vector.load %arg8[%c0_237, %c0_238] : memref<3x8xf32, #tpu.memory_space<vmem>>, vector<3x8xf32>
    %cst_239 = arith.constant dense<0.000000e+00> : vector<3x2xf32>
    %251 = tpu.matmul %250, %249, %cst_239 {dimension_numbers = #tpu.dot_dimension_numbers<[1], [0], [0], [1], [0, 0, 1, 1], [], []>} : vector<3x8xf32>, vector<8x2xf32>, vector<3x2xf32> -> vector<3x2xf32>
    %c0_240 = arith.constant 0 : index
    %c0_241 = arith.constant 0 : index
    %252 = vector.load %arg9[%c0_240, %c0_241] : memref<3x1xf32, #tpu.memory_space<vmem>>, vector<3x1xf32>
    %253 = vector.broadcast %252 : vector<3x1xf32> to vector<3x2xf32>
    %254 = arith.addf %251, %253 : vector<3x2xf32>
    %c0_242 = arith.constant 0 : index
    %c0_243 = arith.constant 0 : index
    %255 = vector.load %arg14[%c0_242, %c0_243] : memref<3x2xf32, #tpu.memory_space<vmem>>, vector<3x2xf32>
    tpu.vector_store %arg14[%c0_242, %c0_243], %254 {strides = array<i32>} : memref<3x2xf32, #tpu.memory_space<vmem>>, vector<3x2xf32>,
    %c0_244 = arith.constant 0 : index
    %c0_245 = arith.constant 0 : index
    %256 = vector.load %arg13[%c0_244, %c0_245] : memref<512x2xf32, #tpu.memory_space<vmem>>, vector<512x2xf32>
    %cst_246 = arith.constant dense<0.000000e+00> : vector<16x2xf32>
    %257 = tpu.matmul %166, %256, %cst_246 {dimension_numbers = #tpu.dot_dimension_numbers<[1], [0], [0], [1], [0, 0, 1, 1], [], []>} : vector<16x512xf32>, vector<512x2xf32>, vector<16x2xf32> -> vector<16x2xf32>
    %c0_247 = arith.constant 0 : index
    %c0_248 = arith.constant 0 : index
    %258 = vector.load %arg10[%c0_247, %c0_248] : memref<3x16xf32, #tpu.memory_space<vmem>>, vector<3x16xf32>
    %cst_249 = arith.constant dense<0.000000e+00> : vector<3x2xf32>
    %259 = tpu.matmul %258, %257, %cst_249 {dimension_numbers = #tpu.dot_dimension_numbers<[1], [0], [0], [1], [0, 0, 1, 1], [], []>} : vector<3x16xf32>, vector<16x2xf32>, vector<3x2xf32> -> vector<3x2xf32>
    %c0_250 = arith.constant 0 : index
    %c0_251 = arith.constant 0 : index
    %260 = vector.load %arg11[%c0_250, %c0_251] : memref<3x1xf32, #tpu.memory_space<vmem>>, vector<3x1xf32>
    %261 = vector.broadcast %260 : vector<3x1xf32> to vector<3x2xf32>
    %262 = arith.addf %259, %261 : vector<3x2xf32>
    %c0_252 = arith.constant 0 : index
    %c0_253 = arith.constant 0 : index
    %263 = vector.load %arg15[%c0_252, %c0_253] : memref<3x2xf32, #tpu.memory_space<vmem>>, vector<3x2xf32>
    tpu.vector_store %arg15[%c0_252, %c0_253], %262 {strides = array<i32>} : memref<3x2xf32, #tpu.memory_space<vmem>>, vector<3x2xf32>,
    %c0_254 = arith.constant 0 : index
    %c0_255 = arith.constant 0 : index
    %264 = vector.load %arg16[%c0_254, %c0_255] : memref<16x512xf32, #tpu.memory_space<vmem>>, vector<16x512xf32>
    tpu.vector_store %arg16[%c0_254, %c0_255], %247 {strides = array<i32>} : memref<16x512xf32, #tpu.memory_space<vmem>>, vector<16x512xf32>,
    return
  }
  func.func @transform_0(%arg0: i32) -> (i32, i32) {
    %c0_i32 = arith.constant 0 : i32
    %c0_i32_0 = arith.constant 0 : i32
    %c0_i32_1 = arith.constant 0 : i32
    return %c0_i32, %c0_i32_0 : i32, i32
  }
  func.func @transform_1(%arg0: i32) -> (i32, i32, i32) {
    %c0_i32 = arith.constant 0 : i32
    %c0_i32_0 = arith.constant 0 : i32
    %c0_i32_1 = arith.constant 0 : i32
    %c0_i32_2 = arith.constant 0 : i32
    return %c0_i32, %c0_i32_0, %c0_i32_1 : i32, i32, i32
  }
  func.func @transform_2(%arg0: i32) -> (i32, i32) {
    %c0_i32 = arith.constant 0 : i32
    %c0_i32_0 = arith.constant 0 : i32
    %c0_i32_1 = arith.constant 0 : i32
    return %c0_i32, %c0_i32_0 : i32, i32
  }
  func.func @transform_3(%arg0: i32) -> (i32, i32, i32) {
    %c0_i32 = arith.constant 0 : i32
    %c0_i32_0 = arith.constant 0 : i32
    %c0_i32_1 = arith.constant 0 : i32
    %c0_i32_2 = arith.constant 0 : i32
    return %c0_i32, %c0_i32_0, %c0_i32_1 : i32, i32, i32
  }
  func.func @transform_4(%arg0: i32) -> (i32, i32) {
    %c0_i32 = arith.constant 0 : i32
    %c0_i32_0 = arith.constant 0 : i32
    %c0_i32_1 = arith.constant 0 : i32
    return %c0_i32, %c0_i32_0 : i32, i32
  }
  func.func @transform_5(%arg0: i32) -> (i32, i32, i32) {
    %c0_i32 = arith.constant 0 : i32
    %c0_i32_0 = arith.constant 0 : i32
    %c0_i32_1 = arith.constant 0 : i32
    %c0_i32_2 = arith.constant 0 : i32
    return %c0_i32, %c0_i32_0, %c0_i32_1 : i32, i32, i32
  }
  func.func @transform_6(%arg0: i32) -> (i32, i32) {
    %c0_i32 = arith.constant 0 : i32
    %c0_i32_0 = arith.constant 0 : i32
    %c0_i32_1 = arith.constant 0 : i32
    return %c0_i32, %c0_i32_0 : i32, i32
  }
  func.func @transform_7(%arg0: i32) -> (i32, i32) {
    %c0_i32 = arith.constant 0 : i32
    %c0_i32_0 = arith.constant 0 : i32
    %c0_i32_1 = arith.constant 0 : i32
    return %c0_i32, %c0_i32_0 : i32, i32
  }
  func.func @transform_8(%arg0: i32) -> (i32, i32) {
    %c0_i32 = arith.constant 0 : i32
    %c0_i32_0 = arith.constant 0 : i32
    %c0_i32_1 = arith.constant 0 : i32
    return %c0_i32, %c0_i32_0 : i32, i32
  }
  func.func @transform_9(%arg0: i32) -> (i32, i32) {
    %c0_i32 = arith.constant 0 : i32
    %c0_i32_0 = arith.constant 0 : i32
    %c0_i32_1 = arith.constant 0 : i32
    return %c0_i32, %c0_i32_0 : i32, i32
  }
  func.func @transform_10(%arg0: i32) -> (i32, i32) {
    %c0_i32 = arith.constant 0 : i32
    %c0_i32_0 = arith.constant 0 : i32
    %c0_i32_1 = arith.constant 0 : i32
    return %c0_i32, %c0_i32_0 : i32, i32
  }
  func.func @transform_11(%arg0: i32) -> (i32, i32, i32) {
    %c0_i32 = arith.constant 0 : i32
    %c0_i32_0 = arith.constant 0 : i32
    %c0_i32_1 = arith.constant 0 : i32
    %c0_i32_2 = arith.constant 0 : i32
    return %c0_i32, %c0_i32_0, %c0_i32_1 : i32, i32, i32
  }
  func.func @transform_12(%arg0: i32) -> (i32, i32) {
    %c0_i32 = arith.constant 0 : i32
    %c0_i32_0 = arith.constant 0 : i32
    %c0_i32_1 = arith.constant 0 : i32
    return %c0_i32, %c0_i32_0 : i32, i32
  }
  func.func @transform_13(%arg0: i32) -> (i32, i32) {
    %c0_i32 = arith.constant 0 : i32
    %c0_i32_0 = arith.constant 0 : i32
    %c0_i32_1 = arith.constant 0 : i32
    return %c0_i32, %c0_i32_0 : i32, i32
  }
  func.func @transform_14(%arg0: i32) -> (i32, i32) {
    %c0_i32 = arith.constant 0 : i32
    %c0_i32_0 = arith.constant 0 : i32
    %c0_i32_1 = arith.constant 0 : i32
    return %c0_i32, %c0_i32_0 : i32, i32
  }
  func.func @transform_15(%arg0: i32) -> (i32, i32) {
    %c0_i32 = arith.constant 0 : i32
    %c0_i32_0 = arith.constant 0 : i32
    %c0_i32_1 = arith.constant 0 : i32
    return %c0_i32, %c0_i32_0 : i32, i32
  }
}

</mosaic_0001>

<bundles_post_ra>
// kernel: _forward_impl.1
= control target key start
LH: loop header
LB: loop body
LE: loop exit
PB: predicated region body
PF: predicated region fallthrough
CT: control target
= control target key end

     0   :  { %v61_v0 = vlaneseq  ;;  %v9623_v14 = vmov 0.0   ;;  %s7306_s28 = smov 111   ;;  %s7307_s18 = smov 113   ;;  %vm85_vm0 = vcmask 908288   ;;  %vm458_vm1 = vcmask 916480   ;;  %s9607_s11 = inlined_call_operand.vmem [shape: f32[9,1,512], index: 11, kind: input, shape index: {}]   ;;  %s9608_s0 = inlined_call_operand.vmem [shape: f32[4,512], index: 0, kind: input, shape index: {}]   ;;  %s9609_s2 = inlined_call_operand.vmem [shape: f32[8,1], index: 2, kind: input, shape index: {}]   ;;  %s9610_s1 = inlined_call_operand.vmem [shape: f32[9,8,4], index: 1, kind: input, shape index: {}]   ;;  %s9611_s4 = inlined_call_operand.vmem [shape: f32[16,1], index: 4, kind: input, shape index: {}]   ;;  %s9612_s3 = inlined_call_operand.vmem [shape: f32[9,16,8], index: 3, kind: input, shape index: {}]   ;;  %s9613_s6 = inlined_call_operand.vmem [shape: f32[16,1], index: 6, kind: input, shape index: {}]   ;;  %s9614_s8 = inlined_call_operand.vmem [shape: f32[3,1], index: 8, kind: input, shape index: {}]   ;;  %s9615_s10 = inlined_call_operand.vmem [shape: f32[3,1], index: 10, kind: input, shape index: {}]   ;;  %s9616_s5 = inlined_call_operand.vmem [shape: f32[9,16,16], index: 5, kind: input, shape index: {}]   ;;  %s9617_s12 = inlined_call_operand.vmem [shape: f32[512,2], index: 12, kind: input, shape index: {}]   ;;  %s9618_s15 = inlined_call_operand.vmem [shape: f32[16,512], index: 15, kind: output, shape index: {2}]   ;;  %s9619_s7 = inlined_call_operand.vmem [shape: f32[3,8], index: 7, kind: input, shape index: {}]   ;;  %s9620_s13 = inlined_call_operand.vmem [shape: f32[3,2], index: 13, kind: output, shape index: {0}]   ;;  %s9621_s9 = inlined_call_operand.vmem [shape: f32[3,16], index: 9, kind: input, shape index: {}]   ;;  %s9622_s14 = inlined_call_operand.vmem [shape: f32[3,2], index: 14, kind: output, shape index: {1}]  }
   0x1   :  { %v6950_v2 = vld [vmem:[%s9607_s11 + $0x4] sm:$0xf]  ;;  %v59_v3 = vld [vmem:[%s9607_s11] sm:$0xf]  ;;  %v7412_v8 = vld [vmem:[%s9608_s0 + $0x8] sm:$0xff]  ;;  %50 = vst [vmem:[#allocation2 + $0x8] sm:$0xff] %v9623_v14  ;;  %193 = vmatprep.mubr.f32.mxu0 %v9623_v14  ;;  %264 = vmatprep.mubr.f32.mxu1 %v9623_v14 }
   0x2   :  { %v62_v1 = vshrl.u32 %v61_v0, 7  ;;  %v6958_v13 = vld [vmem:[%s9607_s11 + $0x8] sm:$0xf]  ;;  %51 = vst [vmem:[#allocation2 + $0x10] sm:$0xff] %v9623_v14  ;;  %49 = vst [vmem:[#allocation2] sm:$0xff] %v9623_v14  ;;  %v7427_v15 = vld [vmem:[%s9608_s0] sm:$0xff] }
   0x3   :  { %53 = vst [vmem:[#allocation2 + $0xc] sm:$0xff] %v7412_v8  ;;  %52 = vst [vmem:[#allocation2 + $0x4] sm:$0xff] %v7427_v15  ;;  %s7305_s0 = smov 112   ;;  %v6966_v28 = vld [vmem:[%s9607_s11 + $0xc] sm:$0xf]  ;;  %s7308_s21 = smov 127  }
   0x4   :  { %v7401_v4 = vsub.s32 0, %v62_v1  ;;  %v7403_v5 = vsub.s32 1, %v62_v1  ;;  %v7405_v6 = vsub.s32 2, %v62_v1  ;;  %v7407_v7 = vsub.s32 3, %v62_v1  ;;  %v6974_v35 = vld [vmem:[%s9607_s11 + $0x14] sm:$0xf] }
   0x5   :  { %v6982_v42 = vld [vmem:[%s9607_s11 + $0x18] sm:$0xf]  ;;  %v6990_v49 = vld [vmem:[%s9607_s11 + $0x1c] sm:$0xf]  ;;  %s7309_s24 = smov 1   ;;  %s7310_s27 = smov 15  }
   0x6   :  { %v437_v9 = vrot.slane %v6950_v2, %v7401_v4  ;;  %v441_v10 = vrot.slane %v6950_v2, %v7403_v5  ;;  %v64_v11 = vrot.slane %v59_v3, %v7401_v4  ;;  %v68_v12 = vrot.slane %v59_v3, %v7403_v5  ;;  %v6998_v56 = vld [vmem:[%s9607_s11 + $0x20] sm:$0xf]  ;;  %s7311_s29 = smov 16   ;;  %s7312_s30 = smov 17  }
   0x7   :  { %v445_v16 = vrot.slane %v6950_v2, %v7405_v6  ;;  %v449_v17 = vrot.slane %v6950_v2, %v7407_v7  ;;  %v72_v18 = vrot.slane %v59_v3, %v7405_v6  ;;  %v76_v19 = vrot.slane %v59_v3, %v7407_v7 }
   0x8   :  { %v450_v20 = vcombine.low %v437_v9, %v441_v10  ;;  %v77_v21 = vcombine.low %v64_v11, %v68_v12  ;;  %v664_v23 = vrot.slane %v6958_v13, %v7405_v6  ;;  %v668_v24 = vrot.slane %v6958_v13, %v7407_v7 }
   0x9   :  { %v451_v22 = vcombine.low %v445_v16, %v449_v17  ;;  %v78_v25 = vcombine.low %v72_v18, %v76_v19  ;;  %v656_v26 = vrot.slane %v6958_v13, %v7401_v4  ;;  %v660_v27 = vrot.slane %v6958_v13, %v7403_v5 }
   0xa   :  { %452 = vrot.lane.b32.xlu1 %v450_v20, %s7305_s0  ;;  %79 = vrot.lane.b32.xlu0 %v77_v21, %s7306_s28  ;;  %v670_v29 = vcombine.low %v664_v23, %v668_v24  ;;  %v883_v30 = vrot.slane %v6966_v28, %v7405_v6  ;;  %v887_v31 = vrot.slane %v6966_v28, %v7407_v7  ;;  %v430_v10 = vld [vmem:[#allocation2 + $0x10] sm:$0xf]  ;;  %vm677_vm2 = vcmask 924672  }
   0xb   :  { %v669_v32 = vcombine.low %v656_v26, %v660_v27  ;;  %v875_v33 = vrot.slane %v6966_v28, %v7401_v4  ;;  %v879_v34 = vrot.slane %v6966_v28, %v7403_v5  ;;  %v1102_v37 = vrot.slane %v6974_v35, %v7405_v6  ;;  %v58_v11 = vld [vmem:[#allocation2 + $0x10] sm:$0xf] }
   0xc   :  { %v889_v36 = vcombine.low %v883_v30, %v887_v31  ;;  %v1106_v38 = vrot.slane %v6974_v35, %v7407_v7  ;;  %v1094_v40 = vrot.slane %v6974_v35, %v7401_v4  ;;  %v1098_v41 = vrot.slane %v6974_v35, %v7403_v5  ;;  %v649_v20 = vld [vmem:[#allocation2 + $0x10] sm:$0xf] }
   0xd   :  { %v888_v39 = vcombine.low %v875_v33, %v879_v34  ;;  %v1319_v43 = vrot.slane %v6982_v42, %v7405_v6  ;;  %v1323_v44 = vrot.slane %v6982_v42, %v7407_v7  ;;  %v1311_v45 = vrot.slane %v6982_v42, %v7401_v4  ;;  %v868_v26 = vld [vmem:[#allocation2 + $0x10] sm:$0xf] }
   0xe   :  { %454 = vrot.lane.b32.xlu1 %v451_v22, %s7305_s0  ;;  %81 = vrot.lane.b32.xlu0 %v78_v25, %s7306_s28  ;;  %v1108_v46 = vcombine.low %v1102_v37, %v1106_v38  ;;  %v1107_v47 = vcombine.low %v1094_v40, %v1098_v41  ;;  %v1315_v48 = vrot.slane %v6982_v42, %v7403_v5  ;;  %vm923_vm3 = vcmask 7168  }
   0xf   :  { %v1325_v50 = vcombine.low %v1319_v43, %v1323_v44  ;;  %v1536_v51 = vrot.slane %v6990_v49, %v7405_v6  ;;  %v1540_v52 = vrot.slane %v6990_v49, %v7407_v7  ;;  %v1528_v54 = vrot.slane %v6990_v49, %v7401_v4 }
  0x10   :  { %v1324_v53 = vcombine.low %v1311_v45, %v1315_v48  ;;  %v1532_v55 = vrot.slane %v6990_v49, %v7403_v5  ;;  %v1745_v58 = vrot.slane %v6998_v56, %v7401_v4  ;;  %v1749_v59 = vrot.slane %v6998_v56, %v7403_v5 }
  0x11   :  { %v1542_v57 = vcombine.low %v1536_v51, %v1540_v52  ;;  %v1753_v61 = vrot.slane %v6998_v56, %v7405_v6  ;;  %v1757_v62 = vrot.slane %v6998_v56, %v7407_v7  ;;  %vm87_vm4 = vcmask 1043456  }
  0x12   :  { %673 = vrot.lane.b32.xlu1 %v670_v29, %s7307_s18  ;;  %671 = vrot.lane.b32.xlu0 %v669_v32, %s7307_s18  ;;  %v1541_v60 = vcombine.low %v1528_v54, %v1532_v55  ;;  %v1758_v63 = vcombine.low %v1745_v58, %v1749_v59  ;;  %v1087_v32 = vld [vmem:[#allocation2 + $0x14] sm:$0xf]  ;;  %vm896_vm5 = vcmask 1039360   ;;  %vm704_vm6 = vcmask 121856  }
  0x13   :  { %v1759_v0 = vcombine.low %v1753_v61, %v1757_v62  ;;  %vm485_vm7 = vcmask 130048   ;;  %vm112_vm8 = vcmask 138240   ;;  %vm117_vm9 = vcmask 31744  }
  0x14   :  { %vm2049_vm10 = vcmask 64512   ;;  %vm7314_vm11 = vmmov 0   ;;  %vm6620_vm12 = vcmask 10240  }
  0x16   :  { %892 = vrot.lane.b32.xlu1 %v889_v36, %s7308_s21  ;;  %890 = vrot.lane.b32.xlu0 %v888_v39, %s7308_s21  ;;  %v56_v36 = vld [vmem:[#allocation2] sm:$0xff] }
  0x1a   :  { %1111 = vrot.lane.b32.xlu1 %v1108_v46, %s7309_s24  ;;  %1109 = vrot.lane.b32.xlu0 %v1107_v47, %s7309_s24 }
  0x1e   :  { %1328 = vrot.lane.b32.xlu1 %v1325_v50, %s7310_s27  ;;  %1326 = vrot.lane.b32.xlu0 %v1324_v53, %s7310_s27 }
  0x22   :  { %1545 = vrot.lane.b32.xlu1 %v1542_v57, %s7311_s29  ;;  %1543 = vrot.lane.b32.xlu0 %v1541_v60, %s7311_s29  ;;  %v57_v57 = vld [vmem:[#allocation2 + $0x8] sm:$0xff] }
  0x26   :  { %1760 = vrot.lane.b32.xlu0 %v1758_v63, %s7312_s30  ;;  %1762 = vrot.lane.b32.xlu1 %v1759_v0, %s7312_s30 }
  0x7c   :  { %v453_v1 = vpop.permute.xlu1 %452  ;;  %v80_v2 = vpop.permute.xlu0 %79 }
  0x7d   :  { %v83_v23 = vrot.slane %v80_v2, 4  ;;  %v456_v29 = vrot.slane %v453_v1, 4 }
  0x7f   :  { %v86_v30 = vsel %vm85_vm0, %v83_v23, %v80_v2  ;;  %v459_v39 = vsel %vm458_vm1, %v456_v29, %v453_v1 }
  0x80   :  { %v455_v3 = vpop.permute.xlu1 %454  ;;  %v82_v9 = vpop.permute.xlu0 %81  ;;  %v93_v38 = vmul.f32 %v86_v30, %v56_v36  ;;  %v465_v44 = vmul.f32 %v459_v39, %v56_v36 }
  0x81   :  { %v457_v12 = vrot.slane %v455_v3, 4  ;;  %v84_v13 = vrot.slane %v82_v9, 4 }
  0x83   :  { %v467_v16 = vmul.f32 %v457_v12, %v430_v10  ;;  %v95_v17 = vmul.f32 %v84_v13, %v58_v11  ;;  %v460_v49 = vsel %vm87_vm4, %v456_v29, %v457_v12  ;;  %v88_v50 = vsel %vm87_vm4, %v83_v23, %v84_v13  ;;  %v1304_v29 = vld [vmem:[#allocation2 + $0x14] sm:$0xf] }
  0x84   :  { %v7492_v18 = vpop.permute.xlu1 %673  ;;  %v672_v19 = vpop.permute.xlu0 %671  ;;  %v461_v55 = vsel %vm458_vm1, %v460_v49, %v455_v3  ;;  %v89_v56 = vsel %vm85_vm0, %v88_v50, %v82_v9  ;;  %v473_v13 = vcombine.high %v465_v44, %v465_v44 }
  0x85   :  { %v676_v21 = vrot.slane %v7492_v18, 4  ;;  %483 = vrot.lane.b32.xlu0 %v467_v16, %s7311_s29  ;;  %110 = vrot.lane.b32.xlu1 %v95_v17, %s7312_s30  ;;  %v675_v35 = vrot.slane %v672_v19, 4  ;;  %v94_v60 = vmul.f32 %v89_v56, %v57_v57  ;;  %v466_v61 = vmul.f32 %v461_v55, %v57_v57  ;;  %v1738_v56 = vld [vmem:[#allocation2 + $0x14] sm:$0xf] }
  0x86   :  { %v100_v16 = vcombine.high %v93_v38, %v93_v38 }
  0x87   :  { %v686_v22 = vmul.f32 %v676_v21, %v649_v20  ;;  %v678_v40 = vsel %vm677_vm2, %v675_v35, %v672_v19  ;;  %v679_v58 = vsel %vm87_vm4, %v675_v35, %v676_v21 }
  0x88   :  { %v893_v24 = vpop.permute.xlu1 %892  ;;  %v891_v25 = vpop.permute.xlu0 %890  ;;  %v684_v45 = vmul.f32 %v678_v40, %v56_v36  ;;  %v680_v63 = vsel %vm677_vm2, %v679_v58, %v7492_v18 }
  0x89   :  { %v895_v27 = vrot.slane %v893_v24, 4  ;;  %702 = vrot.lane.b32.xlu1 %v686_v22, %s7310_s27  ;;  %v894_v42 = vrot.slane %v891_v25, 4  ;;  %v685_v3 = vmul.f32 %v680_v63, %v57_v57  ;;  %v7016_v63 = vld [vmem:[%s9607_s11 + $0x4] sm:$0xf] }
  0x8a   :  { %v692_v20 = vcombine.high %v684_v45, %v684_v45 }
  0x8b   :  { %v905_v28 = vmul.f32 %v895_v27, %v868_v26  ;;  %v897_v46 = vsel %vm896_vm5, %v894_v42, %v891_v25  ;;  %v898_v59 = vsel %vm87_vm4, %v894_v42, %v895_v27  ;;  %v693_v40 = vcombine.high %v685_v3, %v685_v3 }
  0x8c   :  { %v1112_v31 = vpop.permute.xlu1 %1111  ;;  %v1110_v34 = vpop.permute.xlu0 %1109  ;;  %v903_v52 = vmul.f32 %v897_v46, %v56_v36  ;;  %v899_v0 = vsel %vm896_vm5, %v898_v59, %v893_v24 }
  0x8d   :  { %v1114_v33 = vrot.slane %v1112_v31, 4  ;;  %921 = vrot.lane.b32.xlu0 %v905_v28, %s7309_s24  ;;  %v1113_v41 = vrot.slane %v1110_v34, 4  ;;  %v904_v9 = vmul.f32 %v899_v0, %v57_v57  ;;  %v101_v28 = vcombine.high %v94_v60, %v94_v60  ;;  %v1985_v57 = vld [vmem:[%s9607_s11] sm:$0xf] }
  0x8e   :  { %v911_v19 = vcombine.high %v903_v52, %v903_v52  ;;  %v1990_v59 = vrot.slane %v1985_v57, %v7401_v4  ;;  %v2002_v0 = vrot.slane %v1985_v57, %v7407_v7 }
  0x8f   :  { %v1123_v37 = vmul.f32 %v1114_v33, %v1087_v32  ;;  %v1115_v43 = vsel %vm923_vm3, %v1113_v41, %v1110_v34  ;;  %v1116_v1 = vsel %vm87_vm4, %v1113_v41, %v1114_v33  ;;  %v474_v32 = vcombine.high %v466_v61, %v466_v61 }
  0x90   :  { %v7506_v47 = vpop.permute.xlu1 %1328  ;;  %v1327_v48 = vpop.permute.xlu0 %1326  ;;  %v1121_v51 = vmul.f32 %v1115_v43, %v7427_v15  ;;  %v1117_v10 = vsel %vm923_vm3, %v1116_v1, %v1112_v31  ;;  %v912_v39 = vcombine.high %v904_v9, %v904_v9  ;;  %v1521_v43 = vld [vmem:[#allocation2 + $0x14] sm:$0xf]  ;;  %v2375_v1 = vrot.slane %v7016_v63, %v7401_v4 }
  0x91   :  { %1139 = vrot.lane.b32.xlu1 %v1123_v37, %s7308_s21  ;;  %102 = vrot.lane.b32.xlu0 %v93_v38, %s7312_s30  ;;  %v1331_v53 = vrot.slane %v7506_v47, 4  ;;  %v1330_v54 = vrot.slane %v1327_v48, 4  ;;  %v1122_v12 = vmul.f32 %v1117_v10, %v7412_v8  ;;  %v2387_v10 = vrot.slane %v7016_v63, %v7407_v7 }
  0x92   :  { %v1129_v25 = vcombine.high %v1121_v51, %v1121_v51 }
  0x93   :  { %v1333_v62 = vsel %vm87_vm4, %v1330_v54, %v1331_v53  ;;  %v1332_v17 = vsel %vm704_vm6, %v1330_v54, %v1327_v48  ;;  %v1340_v33 = vmul.f32 %v1331_v53, %v1304_v29  ;;  %v1130_v50 = vcombine.high %v1122_v12, %v1122_v12 }
  0x94   :  { %v1334_v2 = vsel %vm704_vm6, %v1333_v62, %v7506_v47  ;;  %v1338_v18 = vmul.f32 %v1332_v17, %v7427_v15  ;;  %v1544_v21 = vpop.permute.xlu0 %1543  ;;  %v1546_v22 = vpop.permute.xlu1 %1545  ;;  %v7313_v53 = vmov 0   ;;  %v1998_v62 = vrot.slane %v1985_v57, %v7405_v6 }
  0x95   :  { %475 = vrot.lane.b32.xlu1 %v465_v44, %s7311_s29  ;;  %694 = vrot.lane.b32.xlu0 %v684_v45, %s7310_s27  ;;  %v1339_v11 = vmul.f32 %v1334_v2, %v7412_v8  ;;  %v1547_v23 = vrot.slane %v1544_v21, 4  ;;  %v1548_v26 = vrot.slane %v1546_v22, 4  ;;  %v2379_v2 = vrot.slane %v7016_v63, %v7403_v5 }
  0x96   :  { %v1346_v24 = vcombine.high %v1338_v18, %v1338_v18  ;;  %7300 = vset.pattern.permute.xlu0 %v7313_v53  ;;  %7301 = vset.pattern.permute.xlu1 %v7313_v53 }
  0x97   :  { %v1549_v27 = vsel %vm485_vm7, %v1547_v23, %v1544_v21  ;;  %v1550_v31 = vsel %vm87_vm4, %v1547_v23, %v1548_v26  ;;  %v1557_v45 = vmul.f32 %v1548_v26, %v1521_v43  ;;  %v1347_v49 = vcombine.high %v1339_v11, %v1339_v11  ;;  %v7037_v21 = vld [vmem:[%s9607_s11 + $0x14] sm:$0xf] }
  0x98   :  { %v1555_v30 = vmul.f32 %v1549_v27, %v7427_v15  ;;  %v1551_v34 = vsel %vm485_vm7, %v1550_v31, %v1546_v22  ;;  %v1763_v37 = vpop.permute.xlu1 %1762  ;;  %v1761_v38 = vpop.permute.xlu0 %1760  ;;  %v3079_v23 = vrot.slane %v7037_v21, %v7401_v4  ;;  %v3087_v26 = vrot.slane %v7037_v21, %v7405_v6  ;;  %v7044_v27 = vld [vmem:[%s9607_s11 + $0x18] sm:$0xf] }
  0x99   :  { %913 = vrot.lane.b32.xlu1 %v903_v52, %s7309_s24  ;;  %1131 = vrot.lane.b32.xlu0 %v1121_v51, %s7308_s21  ;;  %v1556_v36 = vmul.f32 %v1551_v34, %v7412_v8  ;;  %v1765_v41 = vrot.slane %v1763_v37, 4  ;;  %v1764_v42 = vrot.slane %v1761_v38, 4  ;;  %v3091_v29 = vrot.slane %v7037_v21, %v7407_v7 }
  0x9a   :  { %v1563_v35 = vcombine.high %v1555_v30, %v1555_v30  ;;  %v3320_v34 = vrot.slane %v7044_v27, %v7405_v6 }
  0x9b   :  { %v1767_v44 = vsel %vm87_vm4, %v1764_v42, %v1765_v41  ;;  %v1766_v46 = vsel %vm112_vm8, %v1764_v42, %v1761_v38  ;;  %v1564_v55 = vcombine.high %v1556_v36, %v1556_v36  ;;  %v1774_v58 = vmul.f32 %v1765_v41, %v1738_v56 }
  0x9c   :  { %v1768_v47 = vsel %vm112_vm8, %v1767_v44, %v1763_v37  ;;  %v1772_v48 = vmul.f32 %v1766_v46, %v7427_v15  ;;  %v3324_v38 = vrot.slane %v7044_v27, %v7407_v7 }
  0x9d   :  { %106 = vrot.lane.b32.xlu1 %v94_v60, %s7312_s30  ;;  %479 = vrot.lane.b32.xlu0 %v466_v61, %s7311_s29  ;;  %v1773_v51 = vmul.f32 %v1768_v47, %v7412_v8  ;;  %v1953_v60 = vld [vmem:[%s9609_s2] sm:$0xff]  ;;  %v1994_v61 = vrot.slane %v1985_v57, %v7403_v5 }
  0x9e   :  { %v1780_v52 = vcombine.high %v1772_v48, %v1772_v48  ;;  %v7668_v47 = vld [vmem:[%s9607_s11 + $0x20] sm:$0xf] }
  0x9f   :  { %v1781_v54 = vcombine.high %v1773_v51, %v1773_v51  ;;  %v3786_v53 = vrot.slane %v7668_v47, %v7405_v6 }
  0xa1   :  { %698 = vrot.lane.b32.xlu1 %v685_v3, %s7310_s27  ;;  %917 = vrot.lane.b32.xlu0 %v904_v9, %s7309_s24  ;;  %v2383_v3 = vrot.slane %v7016_v63, %v7405_v6  ;;  %v7023_v9 = vld [vmem:[%s9607_s11 + $0x8] sm:$0xf] }
  0xa2   :  { %v2620_v17 = vrot.slane %v7023_v9, %v7407_v7 }
  0xa5   :  { %1135 = vrot.lane.b32.xlu1 %v1122_v12, %s7308_s21  ;;  %1352 = vrot.lane.b32.xlu0 %v1339_v11, %s7307_s18  ;;  %v2608_v11 = vrot.slane %v7023_v9, %v7401_v4  ;;  %v2612_v12 = vrot.slane %v7023_v9, %v7403_v5 }
  0xa9   :  { %477 = vrot.lane.b32.xlu1 %v473_v13, %s7311_s29  ;;  %104 = vrot.lane.b32.xlu0 %v100_v16, %s7312_s30  ;;  %v2616_v13 = vrot.slane %v7023_v9, %v7405_v6  ;;  %v7030_v16 = vld [vmem:[%s9607_s11 + $0xc] sm:$0xf] }
  0xaa   :  { %v2853_v22 = vrot.slane %v7030_v16, %v7407_v7 }
  0xad   :  { %915 = vrot.lane.b32.xlu1 %v911_v19, %s7309_s24  ;;  %696 = vrot.lane.b32.xlu0 %v692_v20, %s7310_s27  ;;  %v2845_v19 = vrot.slane %v7030_v16, %v7403_v5  ;;  %v2849_v20 = vrot.slane %v7030_v16, %v7405_v6 }
  0xb1   :  { %1350 = vrot.lane.b32.xlu1 %v1346_v24, %s7307_s18  ;;  %1133 = vrot.lane.b32.xlu0 %v1129_v25, %s7308_s21  ;;  %v3083_v25 = vrot.slane %v7037_v21, %v7403_v5 }
  0xb5   :  { %1348 = vrot.lane.b32.xlu1 %v1338_v18, %s7307_s18  ;;  %108 = vrot.lane.b32.xlu0 %v101_v28, %s7312_s30  ;;  %v2841_v18 = vrot.slane %v7030_v16, %v7401_v4  ;;  %v274_v16 = vcombine.high %v7412_v8, %v7412_v8 }
  0xb9   :  { %481 = vrot.lane.b32.xlu1 %v474_v32, %s7311_s29  ;;  %1356 = vrot.lane.b32.xlu0 %v1340_v33, %s7307_s18  ;;  %v3316_v33 = vrot.slane %v7044_v27, %v7403_v5 }
  0xbd   :  { %1569 = vrot.lane.b32.xlu1 %v1556_v36, %s7305_s0  ;;  %1567 = vrot.lane.b32.xlu0 %v1563_v35, %s7305_s0  ;;  %v7051_v35 = vld [vmem:[%s9607_s11 + $0x1c] sm:$0xf] }
  0xbe   :  { %v3549_v42 = vrot.slane %v7051_v35, %v7403_v5  ;;  %v3553_v43 = vrot.slane %v7051_v35, %v7405_v6  ;;  %v3557_v46 = vrot.slane %v7051_v35, %v7407_v7 }
  0xc1   :  { %919 = vrot.lane.b32.xlu1 %v912_v39, %s7309_s24  ;;  %700 = vrot.lane.b32.xlu0 %v693_v40, %s7310_s27  ;;  %v3545_v39 = vrot.slane %v7051_v35, %v7401_v4 }
  0xc5   :  { %1573 = vrot.lane.b32.xlu1 %v1557_v45, %s7305_s0  ;;  %1565 = vrot.lane.b32.xlu0 %v1555_v30, %s7305_s0  ;;  %v3312_v30 = vrot.slane %v7044_v27, %v7401_v4 }
  0xc9   :  { %1354 = vrot.lane.b32.xlu1 %v1347_v49, %s7307_s18  ;;  %1137 = vrot.lane.b32.xlu0 %v1130_v50, %s7308_s21  ;;  %v3778_v50 = vrot.slane %v7668_v47, %v7401_v4 }
  0xcd   :  { %1784 = vrot.lane.b32.xlu1 %v1780_v52, %s7306_s28  ;;  %1786 = vrot.lane.b32.xlu0 %v1773_v51, %s7306_s28 }
  0xd1   :  { %1788 = vrot.lane.b32.xlu1 %v1781_v54, %s7306_s28  ;;  %1571 = vrot.lane.b32.xlu0 %v1564_v55, %s7305_s0 }
  0xd5   :  { %1782 = vrot.lane.b32.xlu1 %v1772_v48, %s7306_s28  ;;  %1790 = vrot.lane.b32.xlu0 %v1774_v58, %s7306_s28  ;;  %v273_v58 = vcombine.high %v7427_v15, %v7427_v15 }
  0xd9   :  { %2003 = vrot.lane.b32.xlu1 %v1990_v59, %s7306_s28  ;;  %1956 = vperm.xlu0 %7300, %v1953_v60  }
  0xdd   :  { %2005 = vrot.lane.b32.xlu1 %v1994_v61, %s7306_s28  ;;  %2007 = vrot.lane.b32.xlu0 %v1998_v62, %s7306_s28  ;;  %v96_v61 = vld [vmem:[%s9610_s1] sm:$0xff] }
  0xe1   :  { %2009 = vrot.lane.b32.xlu1 %v2002_v0, %s7306_s28  ;;  %2388 = vrot.lane.b32.xlu0 %v2375_v1, %s7305_s0  ;;  %v6937_v1 = vld [vmem:[%s9610_s1 + $0x20] sm:$0xff] }
  0xe5   :  { %2390 = vrot.lane.b32.xlu1 %v2379_v2, %s7305_s0  ;;  %2392 = vrot.lane.b32.xlu0 %v2383_v3, %s7305_s0 }
  0xe9   :  { %2394 = vrot.lane.b32.xlu1 %v2387_v10, %s7305_s0  ;;  %2621 = vrot.lane.b32.xlu0 %v2608_v11, %s7307_s18  ;;  %v6951_v10 = vld [vmem:[%s9610_s1 + $0x8] sm:$0xff] }
  0xed   :  { %2623 = vrot.lane.b32.xlu1 %v2612_v12, %s7307_s18  ;;  %2625 = vrot.lane.b32.xlu0 %v2616_v13, %s7307_s18 }
  0xf1   :  { %2627 = vrot.lane.b32.xlu1 %v2620_v17, %s7307_s18  ;;  %2854 = vrot.lane.b32.xlu0 %v2841_v18, %s7308_s21 }
  0xf5   :  { %2856 = vrot.lane.b32.xlu1 %v2845_v19, %s7308_s21  ;;  %2858 = vrot.lane.b32.xlu0 %v2849_v20, %s7308_s21  ;;  %v6959_v20 = vld [vmem:[%s9610_s1 + $0x10] sm:$0xff] }
  0xf7   :  { %v7622_v24 = vpop.permute.xlu1 %110  ;;  %v7631_v28 = vpop.permute.xlu0 %483 }
  0xf9   :  { %2860 = vrot.lane.b32.xlu1 %v2853_v22, %s7308_s21  ;;  %3092 = vrot.lane.b32.xlu0 %v3079_v23, %s7309_s24 }
  0xfb   :  { %v7637_v31 = vpop.permute.xlu1 %702 }
  0xfd   :  { %3094 = vrot.lane.b32.xlu1 %v3083_v25, %s7309_s24  ;;  %3096 = vrot.lane.b32.xlu0 %v3087_v26, %s7309_s24  ;;  %v6967_v26 = vld [vmem:[%s9610_s1 + $0x18] sm:$0xff] }
  0xff   :  { %v7639_v32 = vpop.permute.xlu0 %921 }
 0x101   :  { %3098 = vrot.lane.b32.xlu1 %v3091_v29, %s7309_s24  ;;  %3325 = vrot.lane.b32.xlu0 %v3312_v30, %s7310_s27 }
 0x103   :  { %v7648_v36 = vpop.permute.xlu1 %1139  ;;  %v103_v37 = vpop.permute.xlu0 %102 }
 0x105   :  { %3327 = vrot.lane.b32.xlu1 %v3316_v33, %s7310_s27  ;;  %3329 = vrot.lane.b32.xlu0 %v3320_v34, %s7310_s27  ;;  %v6975_v33 = vld [vmem:[%s9610_s1 + $0x28] sm:$0xff] }
 0x107   :  { %v476_v40 = vpop.permute.xlu1 %475  ;;  %v695_v41 = vpop.permute.xlu0 %694 }
 0x109   :  { %3331 = vrot.lane.b32.xlu1 %v3324_v38, %s7310_s27  ;;  %3558 = vrot.lane.b32.xlu0 %v3545_v39, %s7311_s29 }
 0x10b   :  { %v7658_v44 = vpop.permute.xlu1 %913  ;;  %v7660_v45 = vpop.permute.xlu0 %1131 }
 0x10d   :  { %3560 = vrot.lane.b32.xlu1 %v3549_v42, %s7311_s29  ;;  %3562 = vrot.lane.b32.xlu0 %v3553_v43, %s7311_s29 }
 0x10f   :  { %v107_v48 = vpop.permute.xlu1 %106  ;;  %v7670_v49 = vpop.permute.xlu0 %479 }
 0x111   :  { %3564 = vrot.lane.b32.xlu1 %v3557_v46, %s7311_s29  ;;  %v6991_v46 = vld [vmem:[%s9610_s1 + $0x38] sm:$0xff] }
 0x113   :  { %v7675_v51 = vpop.permute.xlu1 %698  ;;  %v7677_v52 = vpop.permute.xlu0 %917 }
 0x115   :  { %3791 = vrot.lane.b32.xlu1 %v3778_v50, %s7312_s30 }
 0x117   :  { %v7682_v54 = vpop.permute.xlu1 %1135  ;;  %v7684_v55 = vpop.permute.xlu0 %1352 }
 0x119   :  { %3795 = vrot.lane.b32.xlu1 %v3786_v53, %s7312_s30 }
 0x11b   :  { %v478_v56 = vpop.permute.xlu1 %477  ;;  %v105_v57 = vpop.permute.xlu0 %104 }
 0x11c   :  { %v114_v59 = vsel %vm112_vm8, %v105_v57, %v107_v48  ;;  %v113_v60 = vsel %vm112_vm8, %v103_v37, %v105_v57  ;;  %v487_v0 = vsel %vm485_vm7, %v478_v56, %v7670_v49  ;;  %v486_v2 = vsel %vm485_vm7, %v476_v40, %v478_v56 }
 0x11d   :  { %6938 = vmatprep.subr.msk.mxu0 %vm87_vm4, %v114_v59 }
 0x11e   :  { %6939 = vmatpush1.msk.msra.mxu0 %vm87_vm4, %v113_v60 }
 0x11f   :  { %v916_v62 = vpop.permute.xlu1 %915  ;;  %6940 = vmatmul.mubr.msk.f32.vlgmr.msra.gmra.mxu0 %vm117_vm9, %v96_v61  ;;  %6944 = vmatprep.subr.msk.mxu0 %vm87_vm4, %v273_v58  ;;  %v697_v63 = vpop.permute.xlu0 %696 }
 0x120   :  { %6945 = vmatpush1.msk.msra.mxu0 %vm87_vm4, %v7427_v15  ;;  %350 = vmatprep.mubr.f32.mxu0 %v9623_v14  ;;  %v706_v15 = vsel %vm704_vm6, %v697_v63, %v7675_v51  ;;  %v705_v11 = vsel %vm704_vm6, %v695_v41, %v697_v63  ;;  %v925_v17 = vsel %vm923_vm3, %v916_v62, %v7677_v52  ;;  %v6983_v41 = vld [vmem:[%s9610_s1 + $0x30] sm:$0xff] }
 0x121   :  { %6952 = vmatprep.subr.msk.mxu0 %vm87_vm4, %v487_v0  ;;  %v924_v23 = vsel %vm923_vm3, %v7658_v44, %v916_v62 }
 0x123   :  { %v1351_v3 = vpop.permute.xlu1 %1350  ;;  %6946 = vmatmul.mubr.msk.f32.vlgmr.msra.gmra.mxu0 %vm117_vm9, %v6937_v1  ;;  %v1134_v9 = vpop.permute.xlu0 %1133 }
 0x124   :  { %6953 = vmatpush1.msk.msra.mxu0 %vm87_vm4, %v486_v2  ;;  %565 = vmatprep.mubr.f32.mxu0 %v9623_v14  ;;  %v1142_v25 = vsel %vm896_vm5, %v1134_v9, %v7682_v54  ;;  %v1141_v29 = vsel %vm896_vm5, %v7660_v45, %v1134_v9  ;;  %v1359_v30 = vsel %vm677_vm2, %v1351_v3, %v7684_v55 }
 0x125   :  { %6960 = vmatprep.subr.msk.mxu0 %vm87_vm4, %v706_v15  ;;  %v3790_v9 = vrot.slane %v7668_v47, %v7407_v7 }
 0x127   :  { %v1349_v12 = vpop.permute.xlu1 %1348  ;;  %6954 = vmatmul.mubr.msk.f32.vlgmr.msra.gmra.mxu0 %vm117_vm9, %v6951_v10  ;;  %v109_v13 = vpop.permute.xlu0 %108 }
 0x128   :  { %6961 = vmatpush1.msk.msra.mxu0 %vm87_vm4, %v705_v11  ;;  %v116_v18 = vsel %vm112_vm8, %v109_v13, %v7622_v24  ;;  %v115_v19 = vsel %vm112_vm8, %v107_v48, %v109_v13  ;;  %784 = vmatprep.mubr.f32.mxu0 %v9623_v14  ;;  %v1358_v37 = vsel %vm677_vm2, %v1349_v12, %v1351_v3 }
 0x129   :  { %6968 = vmatprep.subr.msk.mxu0 %vm87_vm4, %v925_v17  ;;  %6941 = vmatprep.subr.msk.mxu1 %vm87_vm4, %v116_v18  ;;  %v3782_v3 = vrot.slane %v7668_v47, %v7403_v5 }
 0x12a   :  { %6942 = vmatpush1.msk.msra.mxu1 %vm87_vm4, %v115_v19 }
 0x12b   :  { %v482_v21 = vpop.permute.xlu1 %481  ;;  %6943 = vmatmul.mubr.msk.f32.vlgmr.msra.gmra.mxu1 %vm117_vm9, %v96_v61  ;;  %6947 = vmatprep.subr.msk.mxu1 %vm87_vm4, %v274_v16  ;;  %v7736_v22 = vpop.permute.xlu0 %1356  ;;  %v6999_v61 = vld [vmem:[%s9610_s1 + $0x40] sm:$0xff] }
 0x12c   :  { %6962 = vmatmul.mubr.msk.f32.vlgmr.msra.gmra.mxu0 %vm117_vm9, %v6959_v20  ;;  %6948 = vmatpush1.msk.msra.mxu1 %vm87_vm4, %v7412_v8  ;;  %v489_v24 = vsel %vm485_vm7, %v482_v21, %v7631_v28  ;;  %v488_v8 = vsel %vm485_vm7, %v7670_v49, %v482_v21 }
 0x12d   :  { %6969 = vmatpush1.msk.msra.mxu0 %vm87_vm4, %v924_v23  ;;  %6955 = vmatprep.subr.msk.mxu1 %vm87_vm4, %v489_v24 }
 0x12e   :  { %6976 = vmatprep.subr.msk.mxu0 %vm87_vm4, %v1142_v25  ;;  %421 = vmatprep.mubr.f32.mxu1 %v9623_v14 }
 0x12f   :  { %1003 = vmatprep.mubr.f32.mxu0 %v9623_v14  ;;  %v7757_v27 = vpop.permute.xlu1 %1569  ;;  %6949 = vmatmul.mubr.msk.f32.vlgmr.msra.gmra.mxu1 %vm117_vm9, %v6937_v1  ;;  %v1568_v28 = vpop.permute.xlu0 %1567 }
 0x130   :  { %6956 = vmatpush1.msk.msra.mxu1 %vm87_vm4, %v488_v8  ;;  %6970 = vmatmul.mubr.msk.f32.vlgmr.msra.gmra.mxu0 %vm117_vm9, %v6967_v26  ;;  %v1576_v40 = vsel %vm458_vm1, %v1568_v28, %v7757_v27 }
 0x131   :  { %6977 = vmatpush1.msk.msra.mxu0 %vm87_vm4, %v1141_v29  ;;  %636 = vmatprep.mubr.f32.mxu1 %v9623_v14 }
 0x132   :  { %6984 = vmatprep.subr.msk.mxu0 %vm87_vm4, %v1359_v30  ;;  %1220 = vmatprep.mubr.f32.mxu0 %v9623_v14 }
 0x133   :  { %v920_v34 = vpop.permute.xlu1 %919  ;;  %6957 = vmatmul.mubr.msk.f32.vlgmr.msra.gmra.mxu1 %vm117_vm9, %v6951_v10  ;;  %v701_v35 = vpop.permute.xlu0 %700 }
 0x134   :  { %6978 = vmatmul.mubr.msk.f32.vlgmr.msra.gmra.mxu0 %vm117_vm9, %v6975_v33  ;;  %v707_v38 = vsel %vm704_vm6, %v7675_v51, %v701_v35  ;;  %v708_v39 = vsel %vm704_vm6, %v701_v35, %v7637_v31  ;;  %855 = vmatprep.mubr.f32.mxu1 %v9623_v14  ;;  %v927_v42 = vsel %vm923_vm3, %v920_v34, %v7639_v32 }
 0x135   :  { %6985 = vmatpush1.msk.msra.mxu0 %vm87_vm4, %v1358_v37  ;;  %6963 = vmatprep.subr.msk.mxu1 %vm87_vm4, %v708_v39  ;;  %v926_v44 = vsel %vm923_vm3, %v7677_v52, %v920_v34 }
 0x136   :  { %6992 = vmatprep.subr.msk.mxu0 %vm87_vm4, %v1576_v40  ;;  %6964 = vmatpush1.msk.msra.mxu1 %vm87_vm4, %v707_v38 }
 0x137   :  { %1437 = vmatprep.mubr.f32.mxu0 %v9623_v14  ;;  %v1574_v31 = vpop.permute.xlu1 %1573  ;;  %6965 = vmatmul.mubr.msk.f32.vlgmr.msra.gmra.mxu1 %vm117_vm9, %v6959_v20  ;;  %v1566_v43 = vpop.permute.xlu0 %1565 }
 0x138   :  { %6971 = vmatprep.subr.msk.mxu1 %vm87_vm4, %v927_v42  ;;  %6986 = vmatmul.mubr.msk.f32.vlgmr.msra.gmra.mxu0 %vm117_vm9, %v6983_v41  ;;  %v1575_v45 = vsel %vm458_vm1, %v1566_v43, %v1568_v28 }
 0x139   :  { %6972 = vmatpush1.msk.msra.mxu1 %vm87_vm4, %v926_v44  ;;  %6993 = vmatpush1.msk.msra.mxu0 %vm87_vm4, %v1575_v45 }
 0x13a   :  { %1074 = vmatprep.mubr.f32.mxu1 %v9623_v14  ;;  %1654 = vmatprep.mubr.f32.mxu0 %v9623_v14 }
 0x13b   :  { %v1355_v32 = vpop.permute.xlu1 %1354  ;;  %6973 = vmatmul.mubr.msk.f32.vlgmr.msra.gmra.mxu1 %vm117_vm9, %v6967_v26  ;;  %v1138_v48 = vpop.permute.xlu0 %1137 }
 0x13c   :  { %6994 = vmatmul.mubr.msk.f32.vlgmr.msra.gmra.mxu0 %vm117_vm9, %v6991_v46  ;;  %v1143_v49 = vsel %vm896_vm5, %v7682_v54, %v1138_v48  ;;  %v1144_v50 = vsel %vm896_vm5, %v1138_v48, %v7648_v36  ;;  %1291 = vmatprep.mubr.f32.mxu1 %v9623_v14  ;;  %v1361_v51 = vsel %vm677_vm2, %v1355_v32, %v7736_v22 }
 0x13d   :  { %6979 = vmatprep.subr.msk.mxu1 %vm87_vm4, %v1144_v50  ;;  %1871 = vmatprep.mubr.f32.mxu0 %v9623_v14  ;;  %v1360_v52 = vsel %vm677_vm2, %v7684_v55, %v1355_v32 }
 0x13e   :  { %6980 = vmatpush1.msk.msra.mxu1 %vm87_vm4, %v1143_v49 }
 0x13f   :  { %v1785_v53 = vpop.permute.xlu1 %1784  ;;  %6981 = vmatmul.mubr.msk.f32.vlgmr.msra.gmra.mxu1 %vm117_vm9, %v6975_v33  ;;  %6987 = vmatprep.subr.msk.mxu1 %vm87_vm4, %v1361_v51  ;;  %v1787_v36 = vpop.permute.xlu0 %1786 }
 0x140   :  { %6988 = vmatpush1.msk.msra.mxu1 %vm87_vm4, %v1360_v52  ;;  %v1793_v54 = vsel %vm85_vm0, %v1785_v53, %v1787_v36  ;;  %1508 = vmatprep.mubr.f32.mxu1 %v9623_v14 }
 0x141   :  { %7000 = vmatprep.subr.msk.mxu0 %vm87_vm4, %v1793_v54 }
 0x143   :  { %v1789_v56 = vpop.permute.xlu1 %1788  ;;  %6989 = vmatmul.mubr.msk.f32.vlgmr.msra.gmra.mxu1 %vm117_vm9, %v6983_v41  ;;  %v1572_v57 = vpop.permute.xlu0 %1571 }
 0x144   :  { %v1577_v55 = vsel %vm458_vm1, %v7757_v27, %v1572_v57  ;;  %v1578_v58 = vsel %vm458_vm1, %v1572_v57, %v1574_v31  ;;  %1725 = vmatprep.mubr.f32.mxu1 %v9623_v14  ;;  %v1794_v0 = vsel %vm85_vm0, %v1787_v36, %v1789_v56 }
 0x145   :  { %6995 = vmatprep.subr.msk.mxu1 %vm87_vm4, %v1578_v58 }
 0x146   :  { %6996 = vmatpush1.msk.msra.mxu1 %vm87_vm4, %v1577_v55 }
 0x147   :  { %v1783_v59 = vpop.permute.xlu1 %1782  ;;  %6997 = vmatmul.mubr.msk.f32.vlgmr.msra.gmra.mxu1 %vm117_vm9, %v6991_v46  ;;  %v1791_v60 = vpop.permute.xlu0 %1790 }
 0x148   :  { %v1792_v62 = vsel %vm85_vm0, %v1783_v59, %v1785_v53  ;;  %v1795_v63 = vsel %vm85_vm0, %v1789_v56, %v1791_v60  ;;  %1942 = vmatprep.mubr.f32.mxu1 %v9623_v14 }
 0x149   :  { %7001 = vmatpush1.msk.msra.mxu0 %vm87_vm4, %v1792_v62  ;;  %7003 = vmatprep.subr.msk.mxu1 %vm87_vm4, %v1795_v63 }
 0x14a   :  { %7002 = vmatmul.mubr.msk.f32.vlgmr.msra.gmra.mxu0 %vm117_vm9, %v6999_v61  ;;  %7004 = vmatpush1.msk.msra.mxu1 %vm87_vm4, %v1794_v0 }
 0x14b   :  { %7005 = vmatmul.mubr.msk.f32.vlgmr.msra.gmra.mxu1 %vm117_vm9, %v6999_v61  ;;  %v7846_v1 = vpop.permute.xlu1 %2003  ;;  %2120 = vmatprep.mubr.f32.mxu0 %v9623_v14 }
 0x14c   :  { %v2019_v2 = vmul.f32 0.0, %v7846_v1  ;;  %2197 = vmatprep.mubr.f32.mxu1 %v9623_v14 }
 0x14e   :  { %2031 = vrot.lane.b32.xlu0 %v2019_v2, %s7312_s30 }
 0x14f   :  { %v7860_v8 = vpop.permute.xlu1 %2005 }
 0x152   :  { %3793 = vrot.lane.b32.xlu0 %v3782_v3, %s7312_s30 }
 0x153   :  { %v7864_v38 = vpop.permute.xlu1 %2009 }
 0x154   :  { %v7858_v25 = vpop.permute.xlu0 %1956 }
 0x156   :  { %3797 = vrot.lane.b32.xlu0 %v3790_v9, %s7312_s30 }
 0x157   :  { %v7868_v49 = vpop.permute.xlu1 %2390 }
 0x158   :  { %v7862_v33 = vpop.permute.xlu0 %2007 }
 0x15b   :  { %v7870_v0 = vpop.permute.xlu1 %2394 }
 0x15c   :  { %v7866_v44 = vpop.permute.xlu0 %2388 }
 0x160   :  { %v2393_v58 = vpop.permute.xlu0 %2392 }
 0x1df   :  { %v195_v15 = vpop.f32.mrf.mxu0 }
 0x1e1   :  { %v197_v10 = vpop.f32.mrf.mxu0 }
 0x1e3   :  { %v352_v11 = vpop.f32.mrf.mxu0 }
 0x1e4   :  { %v353_v27 = vadd.f32 %v352_v11, %v195_v15 }
 0x1e5   :  { %v354_v12 = vpop.f32.mrf.mxu0 }
 0x1e6   :  { %v355_v34 = vadd.f32 %v354_v12, %v197_v10 }
 0x1e7   :  { %v567_v13 = vpop.f32.mrf.mxu0 }
 0x1e8   :  { %v643_v35 = vadd.f32 %v567_v13, %v353_v27  ;;  %v2624_v27 = vpop.permute.xlu1 %2623 }
 0x1e9   :  { %v569_v16 = vpop.f32.mrf.mxu0 }
 0x1ea   :  { %v644_v31 = vadd.f32 %v569_v16, %v355_v34  ;;  %v2396_v34 = vsel %vm458_vm1, %v7866_v44, %v7868_v49 }
 0x1eb   :  { %v266_v17 = vpop.f32.mrf.mxu1 }
 0x1ec   :  { %v786_v18 = vpop.f32.mrf.mxu0 }
 0x1ed   :  { %v268_v19 = vpop.f32.mrf.mxu1  ;;  %v862_v42 = vadd.f32 %v786_v18, %v643_v35 }
 0x1ee   :  { %v788_v20 = vpop.f32.mrf.mxu0 }
 0x1ef   :  { %v423_v21 = vpop.f32.mrf.mxu1  ;;  %v863_v50 = vadd.f32 %v788_v20, %v644_v31  ;;  %v2622_v20 = vpop.permute.xlu0 %2621 }
 0x1f0   :  { %v1005_v22 = vpop.f32.mrf.mxu0  ;;  %v424_v40 = vadd.f32 %v423_v21, %v266_v17 }
 0x1f1   :  { %v425_v23 = vpop.f32.mrf.mxu1  ;;  %v1081_v51 = vadd.f32 %v1005_v22, %v862_v42 }
 0x1f2   :  { %v1007_v24 = vpop.f32.mrf.mxu0  ;;  %v426_v46 = vadd.f32 %v425_v23, %v268_v19 }
 0x1f3   :  { %v638_v26 = vpop.f32.mrf.mxu1  ;;  %v1082_v59 = vadd.f32 %v1007_v24, %v863_v50  ;;  %v2626_v42 = vpop.permute.xlu0 %2625  ;;  %v2013_v50 = vsel %vm85_vm0, %v7862_v33, %v7864_v38 }
 0x1f4   :  { %v1222_v47 = vpop.f32.mrf.mxu0  ;;  %v645_v32 = vadd.f32 %v638_v26, %v424_v40 }
 0x1f5   :  { %v640_v28 = vpop.f32.mrf.mxu1  ;;  %v1298_v60 = vadd.f32 %v1222_v47, %v1081_v51 }
 0x1f6   :  { %v1224_v30 = vpop.f32.mrf.mxu0  ;;  %v646_v53 = vadd.f32 %v640_v28, %v426_v46 }
 0x1f7   :  { %v857_v29 = vpop.f32.mrf.mxu1  ;;  %v1299_v2 = vadd.f32 %v1224_v30, %v1082_v59 }
 0x1f8   :  { %v1439_v41 = vpop.f32.mrf.mxu0  ;;  %v864_v36 = vadd.f32 %v857_v29, %v645_v32 }
 0x1f9   :  { %v859_v37 = vpop.f32.mrf.mxu1  ;;  %v1515_v3 = vadd.f32 %v1439_v41, %v1298_v60  ;;  %v2011_v41 = vsel %vm85_vm0, %v7846_v1, %v7860_v8  ;;  %v2012_v1 = vsel %vm85_vm0, %v7860_v8, %v7862_v33 }
 0x1fa   :  { %v1441_v48 = vpop.f32.mrf.mxu0  ;;  %v865_v56 = vadd.f32 %v859_v37, %v646_v53  ;;  %v2855_v53 = vpop.permute.xlu0 %2854 }
 0x1fb   :  { %v1076_v39 = vpop.f32.mrf.mxu1  ;;  %v1516_v12 = vadd.f32 %v1441_v48, %v1299_v2  ;;  %v2628_v48 = vpop.permute.xlu1 %2627  ;;  %v2637_v2 = vmul.f32 0.0, %v2622_v20 }
 0x1fc   :  { %v1083_v57 = vadd.f32 %v1076_v39, %v864_v36  ;;  %v1656_v55 = vpop.f32.mrf.mxu0  ;;  %v2397_v36 = vsel %vm458_vm1, %v7868_v49, %v2393_v58  ;;  %v2631_v60 = vsel %vm677_vm2, %v2626_v42, %v2628_v48 }
 0x1fd   :  { %v1078_v43 = vpop.f32.mrf.mxu1  ;;  %v1732_v13 = vadd.f32 %v1656_v55, %v1515_v3 }
 0x1fe   :  { %v1084_v62 = vadd.f32 %v1078_v43, %v865_v56  ;;  %v1658_v15 = vpop.f32.mrf.mxu0  ;;  %v2398_v56 = vsel %vm458_vm1, %v2393_v58, %v7870_v0  ;;  %v2859_v55 = vpop.permute.xlu0 %2858 }
 0x1ff   :  { %v1293_v45 = vpop.f32.mrf.mxu1  ;;  %v1733_v21 = vadd.f32 %v1658_v15, %v1516_v12 }
 0x200   :  { %v1300_v63 = vadd.f32 %v1293_v45, %v1083_v57  ;;  %v2629_v57 = vsel %vm677_vm2, %v2622_v20, %v2624_v27 }
 0x201   :  { %v1295_v52 = vpop.f32.mrf.mxu1 }
 0x202   :  { %v1301_v10 = vadd.f32 %v1295_v52, %v1084_v62  ;;  %v2630_v62 = vsel %vm677_vm2, %v2624_v27, %v2626_v42 }
 0x203   :  { %v1510_v54 = vpop.f32.mrf.mxu1 }
 0x204   :  { %v1517_v11 = vadd.f32 %v1510_v54, %v1300_v63  ;;  %v2857_v54 = vpop.permute.xlu1 %2856  ;;  %v3093_v63 = vpop.permute.xlu0 %3092 }
 0x205   :  { %v1512_v61 = vpop.f32.mrf.mxu1  ;;  %v2862_v15 = vsel %vm896_vm5, %v2855_v53, %v2857_v54  ;;  %v2863_v12 = vsel %vm896_vm5, %v2857_v54, %v2859_v55 }
 0x206   :  { %v1518_v17 = vadd.f32 %v1512_v61, %v1301_v10 }
 0x207   :  { %v1727_v9 = vpop.f32.mrf.mxu1 }
 0x208   :  { %v1734_v18 = vadd.f32 %v1727_v9, %v1517_v11  ;;  %v2861_v61 = vpop.permute.xlu1 %2860 }
 0x209   :  { %v1729_v16 = vpop.f32.mrf.mxu1 }
 0x20a   :  { %v1873_v19 = vpop.f32.mrf.mxu0  ;;  %v1735_v24 = vadd.f32 %v1729_v16, %v1518_v17 }
 0x20b   :  { %v1949_v22 = vadd.f32 %v1873_v19, %v1732_v13  ;;  %v1944_v23 = vpop.f32.mrf.mxu1  ;;  %v2864_v13 = vsel %vm896_vm5, %v2859_v55, %v2861_v61 }
 0x20c   :  { %v1951_v26 = vadd.f32 %v1944_v23, %v1734_v18  ;;  %v1875_v47 = vpop.f32.mrf.mxu0  ;;  %v3095_v3 = vpop.permute.xlu1 %3094  ;;  %v2870_v23 = vmul.f32 0.0, %v2855_v53 }
 0x20d   :  { %v1959_v28 = vadd.f32 %v7858_v25, %v1949_v22  ;;  %v1950_v29 = vadd.f32 %v1875_v47, %v1733_v21  ;;  %v1946_v30 = vpop.f32.mrf.mxu1  ;;  %v3100_v19 = vsel %vm923_vm3, %v3093_v63, %v3095_v3 }
 0x20e   :  { %v1961_v35 = vadd.f32 %v7858_v25, %v1951_v26  ;;  %v1952_v37 = vadd.f32 %v1946_v30, %v1735_v24 }
 0x20f   :  { %v7877_v39 = vmax.f32 %v1959_v28, 0.0  ;;  %v1960_v40 = vadd.f32 %v7858_v25, %v1950_v29 }
 0x210   :  { %v7883_v31 = vmax.f32 %v1961_v35, 0.0  ;;  %v1962_v45 = vadd.f32 %v7858_v25, %v1952_v37  ;;  %v3099_v16 = vpop.permute.xlu1 %3098 }
 0x211   :  { %9670 = vst [vmem:[#allocation5_spill] sm:$0xff] %v7877_v39  ;;  %v7885_v43 = vmax.f32 %v1960_v40, 0.0  ;;  %v2020_v46 = vmul.f32 %v2011_v41, %v7877_v39  ;;  %v2405_v32 = vmul.f32 %v2396_v34, %v7877_v39  ;;  %v2638_v49 = vmul.f32 %v2629_v57, %v7877_v39 }
 0x212   :  { %9671 = vst [vmem:[#allocation6_spill] sm:$0xff] %v7883_v31  ;;  %v7898_v51 = vmax.f32 %v1962_v45, 0.0  ;;  %v2022_v25 = vmul.f32 %v2013_v50, %v7883_v31  ;;  %v2407_v59 = vmul.f32 %v2398_v56, %v7883_v31  ;;  %v2640_v58 = vmul.f32 %v2631_v60, %v7883_v31 }
 0x213   :  { %9672 = vst [vmem:[#allocation7_spill] sm:$0xff] %v7885_v43  ;;  %2033 = vrot.lane.b32.xlu0 %v2020_v46, %s7312_s30  ;;  %2419 = vrot.lane.b32.xlu1 %v2405_v32, %s7311_s29  ;;  %v2021_v52 = vmul.f32 %v2012_v1, %v7885_v43  ;;  %v2406_v33 = vmul.f32 %v2397_v36, %v7885_v43  ;;  %v3112_v35 = vmul.f32 0.0, %v3099_v16 }
 0x214   :  { %9673 = vst [vmem:[#allocation8_spill] sm:$0xff] %v7898_v51  ;;  %v2023_v8 = vmul.f32 %v7864_v38, %v7898_v51  ;;  %v2404_v38 = vmul.f32 0.0, %v7866_v44  ;;  %v2639_v9 = vmul.f32 %v2630_v62, %v7885_v43  ;;  %v3097_v44 = vpop.permute.xlu0 %3096  ;;  %v2408_v10 = vmul.f32 %v7870_v0, %v7898_v51  ;;  %v3328_v0 = vpop.permute.xlu1 %3327 }
 0x215   :  { %v2871_v11 = vmul.f32 %v2862_v15, %v7877_v39  ;;  %v2873_v17 = vmul.f32 %v2864_v13, %v7883_v31  ;;  %v2872_v18 = vmul.f32 %v2863_v12, %v7885_v43  ;;  %v2641_v21 = vmul.f32 %v2628_v48, %v7898_v51  ;;  %v4006_v13 = vld [vmem:[%s9611_s4] sm:$0xff] }
 0x216   :  { %v3109_v22 = vmul.f32 %v3100_v19, %v7885_v43  ;;  %v3108_v26 = vmul.f32 %v3093_v63, %v7877_v39  ;;  %v3101_v47 = vsel %vm923_vm3, %v3095_v3, %v3097_v44  ;;  %v2874_v28 = vmul.f32 %v2861_v61, %v7898_v51 }
 0x217   :  { %2037 = vrot.lane.b32.xlu0 %v2022_v25, %s7312_s30  ;;  %2035 = vrot.lane.b32.xlu1 %v2021_v52, %s7312_s30  ;;  %v3110_v29 = vmul.f32 %v3101_v47, %v7883_v31  ;;  %v3102_v41 = vsel %vm923_vm3, %v3097_v44, %v3099_v16  ;;  %v4007_v44 = vld [vmem:[%s9611_s4 + $0x8] sm:$0xff] }
 0x218   :  { %v3326_v20 = vpop.permute.xlu0 %3325  ;;  %v3332_v27 = vpop.permute.xlu1 %3331  ;;  %v3111_v32 = vmul.f32 %v3102_v41, %v7898_v51 }
 0x219   :  { %v3333_v42 = vsel %vm704_vm6, %v3326_v20, %v3328_v0  ;;  %v3345_v48 = vmul.f32 0.0, %v3332_v27  ;;  %v3341_v50 = vmul.f32 %v3326_v20, %v7877_v39 }
 0x21a   :  { %v3342_v46 = vmul.f32 %v3333_v42, %v7885_v43 }
 0x21b   :  { %2039 = vrot.lane.b32.xlu1 %v2023_v8, %s7312_s30  ;;  %2421 = vrot.lane.b32.xlu0 %v2406_v33, %s7311_s29 }
 0x21c   :  { %v3330_v24 = vpop.permute.xlu0 %3329  ;;  %v3561_v37 = vpop.permute.xlu1 %3560 }
 0x21d   :  { %v3334_v30 = vsel %vm704_vm6, %v3328_v0, %v3330_v24  ;;  %v3335_v25 = vsel %vm704_vm6, %v3330_v24, %v3332_v27  ;;  %v7089_v27 = vld [vmem:[%s9607_s11 + $0xc] sm:$0xf] }
 0x21e   :  { %v3343_v40 = vmul.f32 %v3334_v30, %v7883_v31  ;;  %v3344_v54 = vmul.f32 %v3335_v25, %v7898_v51  ;;  %v5010_v30 = vrot.slane %v7089_v27, %v7403_v5 }
 0x21f   :  { %2423 = vrot.lane.b32.xlu1 %v2407_v59, %s7311_s29  ;;  %2652 = vrot.lane.b32.xlu0 %v2638_v49, %s7310_s27 }
 0x220   :  { %v3559_v34 = vpop.permute.xlu0 %3558  ;;  %v3565_v1 = vpop.permute.xlu1 %3564 }
 0x221   :  { %v3566_v52 = vsel %vm485_vm7, %v3559_v34, %v3561_v37  ;;  %v3574_v57 = vmul.f32 %v3559_v34, %v7877_v39  ;;  %v3578_v60 = vmul.f32 0.0, %v3565_v1  ;;  %v5014_v34 = vrot.slane %v7089_v27, %v7405_v6 }
 0x222   :  { %v3575_v8 = vmul.f32 %v3566_v52, %v7885_v43 }
 0x223   :  { %2417 = vrot.lane.b32.xlu1 %v2404_v38, %s7311_s29  ;;  %2656 = vrot.lane.b32.xlu0 %v2640_v58, %s7310_s27 }
 0x224   :  { %v3563_v45 = vpop.permute.xlu0 %3562  ;;  %v3792_v36 = vpop.permute.xlu1 %3791 }
 0x225   :  { %v3567_v33 = vsel %vm485_vm7, %v3561_v37, %v3563_v45  ;;  %v3568_v59 = vsel %vm485_vm7, %v3563_v45, %v3565_v1  ;;  %v5018_v37 = vrot.slane %v7089_v27, %v7407_v7 }
 0x226   :  { %v3576_v55 = vmul.f32 %v3567_v33, %v7883_v31  ;;  %v3577_v61 = vmul.f32 %v3568_v59, %v7898_v51 }
 0x227   :  { %2650 = vrot.lane.b32.xlu0 %v2637_v2, %s7310_s27  ;;  %2654 = vrot.lane.b32.xlu1 %v2639_v9, %s7310_s27 }
 0x228   :  { %v7965_v53 = vpop.permute.xlu0 %2031  ;;  %v3796_v49 = vpop.permute.xlu1 %3795 }
 0x22b   :  { %2425 = vrot.lane.b32.xlu0 %v2408_v10, %s7311_s29  ;;  %2885 = vrot.lane.b32.xlu1 %v2871_v11, %s7309_s24  ;;  %v4067_v10 = vld [vmem:[%s9607_s11] sm:$0xf]  ;;  %v3807_v11 = vmul.f32 %v3792_v36, %v7877_v39 }
 0x22c   :  { %v3794_v56 = vpop.permute.xlu0 %3793  ;;  %v4072_v12 = vrot.slane %v4067_v10, %v7401_v4  ;;  %v4076_v16 = vrot.slane %v4067_v10, %v7403_v5  ;;  %v4084_v19 = vrot.slane %v4067_v10, %v7407_v7 }
 0x22d   :  { %v3799_v38 = vsel %vm112_vm8, %v3792_v36, %v3794_v56  ;;  %v3800_v58 = vsel %vm112_vm8, %v3794_v56, %v3796_v49  ;;  %v2024_v36 = vld [vmem:[%s9612_s3] sm:$0xff] }
 0x22e   :  { %v3808_v63 = vmul.f32 %v3799_v38, %v7885_v43  ;;  %v3809_v2 = vmul.f32 %v3800_v58, %v7883_v31  ;;  %v7110_v58 = vld [vmem:[%s9607_s11 + $0x1c] sm:$0xf] }
 0x22f   :  { %2889 = vrot.lane.b32.xlu1 %v2873_v17, %s7309_s24  ;;  %2887 = vrot.lane.b32.xlu0 %v2872_v18, %s7309_s24  ;;  %v4080_v17 = vrot.slane %v4067_v10, %v7405_v6  ;;  %v7075_v18 = vld [vmem:[%s9607_s11 + $0x4] sm:$0xf]  ;;  %v5807_v10 = vrot.slane %v7110_v58, %v7405_v6 }
 0x230   :  { %v3798_v62 = vpop.permute.xlu0 %3797  ;;  %v4484_v20 = vrot.slane %v7075_v18, %v7401_v4  ;;  %v4488_v0 = vrot.slane %v7075_v18, %v7403_v5 }
 0x231   :  { %v3801_v3 = vsel %vm112_vm8, %v3796_v49, %v3798_v62  ;;  %v3811_v9 = vmul.f32 0.0, %v3798_v62  ;;  %v7006_v62 = vld [vmem:[%s9612_s3 + $0x40] sm:$0xff] }
 0x232   :  { %v3810_v15 = vmul.f32 %v3801_v3, %v7898_v51 }
 0x233   :  { %2658 = vrot.lane.b32.xlu1 %v2641_v21, %s7310_s27  ;;  %3123 = vrot.lane.b32.xlu0 %v3109_v22, %s7308_s21  ;;  %v4492_v21 = vrot.slane %v7075_v18, %v7405_v6  ;;  %v7082_v22 = vld [vmem:[%s9607_s11 + $0x8] sm:$0xf] }
 0x234   :  { %v4745_v24 = vrot.slane %v7082_v22, %v7401_v4  ;;  %v4753_v47 = vrot.slane %v7082_v22, %v7405_v6 }
 0x237   :  { %2883 = vrot.lane.b32.xlu1 %v2870_v23, %s7309_s24  ;;  %3121 = vrot.lane.b32.xlu0 %v3108_v26, %s7308_s21  ;;  %v4496_v23 = vrot.slane %v7075_v18, %v7407_v7  ;;  %v4749_v26 = vrot.slane %v7082_v22, %v7403_v5  ;;  %v7017_v18 = vld [vmem:[%s9612_s3 + $0x10] sm:$0xff] }
 0x23b   :  { %2891 = vrot.lane.b32.xlu0 %v2874_v28, %s7309_s24  ;;  %3125 = vrot.lane.b32.xlu1 %v3110_v29, %s7308_s21  ;;  %v4757_v28 = vrot.slane %v7082_v22, %v7407_v7  ;;  %v5006_v29 = vrot.slane %v7089_v27, %v7401_v4 }
 0x23f   :  { %3129 = vrot.lane.b32.xlu1 %v3112_v35, %s7308_s21  ;;  %3358 = vrot.lane.b32.xlu0 %v3343_v40, %s7307_s18  ;;  %v7096_v35 = vld [vmem:[%s9607_s11 + $0x14] sm:$0xf] }
 0x240   :  { %v5277_v40 = vrot.slane %v7096_v35, %v7401_v4  ;;  %v5281_v41 = vrot.slane %v7096_v35, %v7403_v5  ;;  %v5285_v42 = vrot.slane %v7096_v35, %v7405_v6 }
 0x243   :  { %3356 = vrot.lane.b32.xlu1 %v3342_v46, %s7307_s18  ;;  %3127 = vrot.lane.b32.xlu0 %v3111_v32, %s7308_s21  ;;  %v7103_v32 = vld [vmem:[%s9607_s11 + $0x18] sm:$0xf] }
 0x244   :  { %v5538_v1 = vrot.slane %v7103_v32, %v7401_v4  ;;  %v5546_v49 = vrot.slane %v7103_v32, %v7405_v6 }
 0x247   :  { %3354 = vrot.lane.b32.xlu1 %v3341_v50, %s7307_s18  ;;  %3362 = vrot.lane.b32.xlu0 %v3345_v48, %s7307_s18  ;;  %v5289_v48 = vrot.slane %v7096_v35, %v7407_v7 }
 0x24b   :  { %3360 = vrot.lane.b32.xlu1 %v3344_v54, %s7307_s18  ;;  %3589 = vrot.lane.b32.xlu0 %v3575_v8, %s7305_s0  ;;  %v5542_v8 = vrot.slane %v7103_v32, %v7403_v5 }
 0x24f   :  { %3587 = vrot.lane.b32.xlu0 %v3574_v57, %s7305_s0  ;;  %3591 = vrot.lane.b32.xlu1 %v3576_v55, %s7305_s0  ;;  %v2025_v55 = vld [vmem:[%s9612_s3 + $0x8] sm:$0xff] }
 0x253   :  { %3593 = vrot.lane.b32.xlu0 %v3577_v61, %s7305_s0  ;;  %3595 = vrot.lane.b32.xlu1 %v3578_v60, %s7305_s0  ;;  %v5550_v60 = vrot.slane %v7103_v32, %v7407_v7 }
 0x257   :  { %3824 = vrot.lane.b32.xlu0 %v3809_v2, %s7306_s28  ;;  %3822 = vrot.lane.b32.xlu1 %v3808_v63, %s7306_s28  ;;  %v5799_v63 = vrot.slane %v7110_v58, %v7401_v4  ;;  %v5803_v2 = vrot.slane %v7110_v58, %v7403_v5 }
 0x25b   :  { %3828 = vrot.lane.b32.xlu0 %v3811_v9, %s7306_s28  ;;  %3826 = vrot.lane.b32.xlu1 %v3810_v15, %s7306_s28 }
 0x25f   :  { %4015 = vperm.xlu0 %7300, %v4007_v44   ;;  %3820 = vrot.lane.b32.xlu1 %v3807_v11, %s7306_s28  ;;  %v7007_v44 = vld [vmem:[%s9612_s3 + $0x48] sm:$0xff]  ;;  %v5811_v11 = vrot.slane %v7110_v58, %v7407_v7 }
 0x263   :  { %4085 = vrot.lane.b32.xlu0 %v4072_v12, %s7306_s28  ;;  %4010 = vperm.xlu1 %7301, %v4006_v13  }
 0x267   :  { %4087 = vrot.lane.b32.xlu1 %v4076_v16, %s7306_s28  ;;  %4089 = vrot.lane.b32.xlu0 %v4080_v17, %s7306_s28  ;;  %v8116_v16 = vld [vmem:[%s9607_s11 + $0x20] sm:$0xf] }
 0x26b   :  { %4091 = vrot.lane.b32.xlu1 %v4084_v19, %s7306_s28  ;;  %4497 = vrot.lane.b32.xlu0 %v4484_v20, %s7305_s0  ;;  %v6060_v19 = vrot.slane %v8116_v16, %v7401_v4 }
 0x26f   :  { %4499 = vrot.lane.b32.xlu1 %v4488_v0, %s7305_s0  ;;  %4501 = vrot.lane.b32.xlu0 %v4492_v21, %s7305_s0 }
 0x273   :  { %4503 = vrot.lane.b32.xlu1 %v4496_v23, %s7305_s0  ;;  %4758 = vrot.lane.b32.xlu0 %v4745_v24, %s7307_s18  ;;  %v7018_v23 = vld [vmem:[%s9612_s3 + $0x18] sm:$0xff]  ;;  %v6068_v24 = vrot.slane %v8116_v16, %v7405_v6 }
 0x277   :  { %4760 = vrot.lane.b32.xlu1 %v4749_v26, %s7307_s18  ;;  %4762 = vrot.lane.b32.xlu0 %v4753_v47, %s7307_s18 }
 0x27b   :  { %4764 = vrot.lane.b32.xlu1 %v4757_v28, %s7307_s18  ;;  %5019 = vrot.lane.b32.xlu0 %v5006_v29, %s7308_s21  ;;  %v7024_v28 = vld [vmem:[%s9612_s3 + $0x20] sm:$0xff] }
 0x27f   :  { %5021 = vrot.lane.b32.xlu1 %v5010_v30, %s7308_s21  ;;  %5023 = vrot.lane.b32.xlu0 %v5014_v34, %s7308_s21  ;;  %v7025_v34 = vld [vmem:[%s9612_s3 + $0x28] sm:$0xff] }
 0x283   :  { %5025 = vrot.lane.b32.xlu1 %v5018_v37, %s7308_s21  ;;  %5290 = vrot.lane.b32.xlu0 %v5277_v40, %s7309_s24 }
 0x285   :  { %v2420_v45 = vpop.permute.xlu1 %2419  ;;  %v2034_v46 = vpop.permute.xlu0 %2033 }
 0x286   :  { %v2041_v54 = vsel %vm112_vm8, %v7965_v53, %v2034_v46 }
 0x287   :  { %5292 = vrot.lane.b32.xlu1 %v5281_v41, %s7309_s24  ;;  %5294 = vrot.lane.b32.xlu0 %v5285_v42, %s7309_s24  ;;  %v7031_v42 = vld [vmem:[%s9612_s3 + $0x30] sm:$0xff] }
 0x289   :  { %v2036_v50 = vpop.permute.xlu1 %2035  ;;  %v2038_v25 = vpop.permute.xlu0 %2037 }
 0x28a   :  { %v2042_v52 = vsel %vm112_vm8, %v2034_v46, %v2036_v50  ;;  %v2043_v59 = vsel %vm112_vm8, %v2036_v50, %v2038_v25 }
 0x28b   :  { %2086 = vmatprep.subr.mxu0 %v2042_v52  ;;  %5296 = vrot.lane.b32.xlu1 %v5289_v48, %s7309_s24 }
 0x28c   :  { %2087 = vmatpush1.msra.mxu0 %v2041_v54  ;;  %5551 = vrot.lane.b32.xlu0 %v5538_v1, %s7310_s27  ;;  %v7032_v1 = vld [vmem:[%s9612_s3 + $0x38] sm:$0xff]  ;;  %v7038_v54 = vld [vmem:[%s9612_s3 + $0x50] sm:$0xff] }
 0x28d   :  { %v2040_v33 = vpop.permute.xlu1 %2039  ;;  %7008 = vmatmul.mubr.msk.f32.vlgmr.msra.gmra.mxu0 %vm2049_vm10, %v2024_v36  ;;  %2246 = vmatprep.subr.mxu0 %v7885_v43  ;;  %v8069_v56 = vpop.permute.xlu0 %2421 }
 0x28e   :  { %2247 = vmatpush1.msra.mxu0 %v7877_v39  ;;  %v2044_v57 = vsel %vm112_vm8, %v2038_v25, %v2040_v33  ;;  %v2428_v53 = vsel %vm485_vm7, %v2420_v45, %v8069_v56  ;;  %2126 = vmatprep.mubr.f32.mxu0 %v9623_v14 }
 0x28f   :  { %2163 = vmatprep.subr.mxu1 %v2044_v57  ;;  %2471 = vmatprep.subr.mxu0 %v2428_v53 }
 0x290   :  { %2164 = vmatpush1.msra.mxu1 %v2043_v59  ;;  %5553 = vrot.lane.b32.xlu1 %v5542_v8, %s7310_s27 }
 0x291   :  { %v2424_v61 = vpop.permute.xlu1 %2423  ;;  %7009 = vmatmul.mubr.msk.f32.gmra.mxu0 %vm2049_vm10, %v2025_v55  ;;  %7010 = vmatmul.mubr.msk.f32.vlgmr.msra.gmra.mxu1 %vm2049_vm10, %v2024_v36  ;;  %v2653_v38 = vpop.permute.xlu0 %2652 }
 0x292   :  { %2323 = vmatprep.subr.mxu1 %v7898_v51  ;;  %2203 = vmatprep.mubr.f32.mxu1 %v9623_v14  ;;  %v2429_v4 = vsel %vm485_vm7, %v8069_v56, %v2424_v61 }
 0x293   :  { %2324 = vmatpush1.msra.mxu1 %v7883_v31  ;;  %2280 = vmatprep.mubr.f32.mxu0 %v9623_v14 }
 0x294   :  { %5555 = vrot.lane.b32.xlu0 %v5546_v49, %s7310_s27  ;;  %5557 = vrot.lane.b32.xlu1 %v5550_v60, %s7310_s27 }
 0x295   :  { %v2418_v3 = vpop.permute.xlu1 %2417  ;;  %7011 = vmatmul.mubr.msk.f32.gmra.mxu1 %vm2049_vm10, %v2025_v55  ;;  %7012 = vmatmul.mubr.msk.f32.vlgmr.msra.gmra.mxu0 %vm2049_vm10, %v7006_v62  ;;  %v2657_v9 = vpop.permute.xlu0 %2656  ;;  %v7039_v55 = vld [vmem:[%s9612_s3 + $0x58] sm:$0xff] }
 0x296   :  { %v2427_v15 = vsel %vm485_vm7, %v2418_v3, %v2420_v45  ;;  %2286 = vmatprep.mubr.f32.mxu0 %v9623_v14  ;;  %2357 = vmatprep.mubr.f32.mxu1 %v9623_v14 }
 0x297   :  { %2472 = vmatpush1.msra.mxu0 %v2427_v15 }
 0x298   :  { %5812 = vrot.lane.b32.xlu0 %v5799_v63, %s7311_s29  ;;  %5814 = vrot.lane.b32.xlu1 %v5803_v2, %s7311_s29  ;;  %v7046_v2 = vld [vmem:[%s9612_s3 + $0x68] sm:$0xff] }
 0x299   :  { %v2655_v12 = vpop.permute.xlu1 %2654  ;;  %7013 = vmatmul.mubr.msk.f32.gmra.mxu0 %vm2049_vm10, %v7007_v44  ;;  %7014 = vmatmul.mubr.msk.f32.vlgmr.msra.gmra.mxu1 %vm2049_vm10, %v7006_v62  ;;  %v2651_v13 = vpop.permute.xlu0 %2650 }
 0x29a   :  { %v2661_v17 = vsel %vm704_vm6, %v2653_v38, %v2655_v12  ;;  %2363 = vmatprep.mubr.f32.mxu1 %v9623_v14  ;;  %2505 = vmatprep.mubr.f32.mxu0 %v9623_v14  ;;  %v2660_v20 = vsel %vm704_vm6, %v2651_v13, %v2653_v38  ;;  %v2662_v35 = vsel %vm704_vm6, %v2655_v12, %v2657_v9 }
 0x29b   :  { %2704 = vmatprep.subr.mxu0 %v2661_v17 }
 0x29c   :  { %5816 = vrot.lane.b32.xlu0 %v5807_v10, %s7311_s29  ;;  %5818 = vrot.lane.b32.xlu1 %v5811_v11, %s7311_s29  ;;  %v7052_v10 = vld [vmem:[%s9612_s3 + $0x70] sm:$0xff] }
 0x29d   :  { %v2886_v0 = vpop.permute.xlu1 %2885  ;;  %7015 = vmatmul.mubr.msk.f32.gmra.mxu1 %vm2049_vm10, %v7007_v44  ;;  %7019 = vmatmul.mubr.msk.f32.vlgmr.msra.gmra.mxu0 %vm2049_vm10, %v7017_v18  ;;  %v2426_v21 = vpop.permute.xlu0 %2425 }
 0x29e   :  { %2705 = vmatpush1.msra.mxu0 %v2660_v20  ;;  %v2430_v22 = vsel %vm485_vm7, %v2424_v61, %v2426_v21  ;;  %2511 = vmatprep.mubr.f32.mxu0 %v9623_v14  ;;  %v7045_v61 = vld [vmem:[%s9612_s3 + $0x60] sm:$0xff] }
 0x29f   :  { %2548 = vmatprep.subr.mxu1 %v2430_v22  ;;  %2582 = vmatprep.mubr.f32.mxu1 %v9623_v14 }
 0x2a0   :  { %2549 = vmatpush1.msra.mxu1 %v2429_v4  ;;  %6073 = vrot.lane.b32.xlu1 %v6060_v19, %s7312_s30 }
 0x2a1   :  { %v2890_v26 = vpop.permute.xlu1 %2889  ;;  %7020 = vmatmul.mubr.msk.f32.gmra.mxu0 %vm2049_vm10, %v7018_v23  ;;  %7021 = vmatmul.mubr.msk.f32.vlgmr.msra.gmra.mxu1 %vm2049_vm10, %v7017_v18  ;;  %v2888_v47 = vpop.permute.xlu0 %2887  ;;  %v7053_v18 = vld [vmem:[%s9612_s3 + $0x78] sm:$0xff] }
 0x2a2   :  { %v2894_v27 = vsel %vm923_vm3, %v2886_v0, %v2888_v47  ;;  %2588 = vmatprep.mubr.f32.mxu1 %v9623_v14  ;;  %2738 = vmatprep.mubr.f32.mxu0 %v9623_v14  ;;  %v2895_v25 = vsel %vm923_vm3, %v2888_v47, %v2890_v26 }
 0x2a3   :  { %2937 = vmatprep.subr.mxu0 %v2894_v27  ;;  %v7060_v27 = vld [vmem:[%s9612_s3 + $0x88] sm:$0xff] }
 0x2a4   :  { %6077 = vrot.lane.b32.xlu1 %v6068_v24, %s7312_s30  ;;  %v7059_v24 = vld [vmem:[%s9612_s3 + $0x80] sm:$0xff] }
 0x2a5   :  { %v2659_v6 = vpop.permute.xlu1 %2658  ;;  %7022 = vmatmul.mubr.msk.f32.gmra.mxu1 %vm2049_vm10, %v7018_v23  ;;  %7026 = vmatmul.mubr.msk.f32.vlgmr.msra.gmra.mxu0 %vm2049_vm10, %v7024_v28  ;;  %v3124_v29 = vpop.permute.xlu0 %3123 }
 0x2a6   :  { %v2663_v30 = vsel %vm704_vm6, %v2657_v9, %v2659_v6  ;;  %2744 = vmatprep.mubr.f32.mxu0 %v9623_v14  ;;  %2815 = vmatprep.mubr.f32.mxu1 %v9623_v14 }
 0x2a7   :  { %2781 = vmatprep.subr.mxu1 %v2663_v30 }
 0x2a8   :  { %2782 = vmatpush1.msra.mxu1 %v2662_v35 }
 0x2a9   :  { %v2884_v37 = vpop.permute.xlu1 %2883  ;;  %7027 = vmatmul.mubr.msk.f32.gmra.mxu0 %vm2049_vm10, %v7025_v34  ;;  %7028 = vmatmul.mubr.msk.f32.vlgmr.msra.gmra.mxu1 %vm2049_vm10, %v7024_v28  ;;  %v3122_v40 = vpop.permute.xlu0 %3121 }
 0x2aa   :  { %v2893_v41 = vsel %vm923_vm3, %v2884_v37, %v2886_v0  ;;  %2821 = vmatprep.mubr.f32.mxu1 %v9623_v14  ;;  %2971 = vmatprep.mubr.f32.mxu0 %v9623_v14  ;;  %v3131_v50 = vsel %vm896_vm5, %v3122_v40, %v3124_v29  ;;  %v6072_v40 = vrot.slane %v8116_v16, %v7407_v7 }
 0x2ab   :  { %2938 = vmatpush1.msra.mxu0 %v2893_v41 }
 0x2ad   :  { %v3126_v45 = vpop.permute.xlu1 %3125  ;;  %7029 = vmatmul.mubr.msk.f32.gmra.mxu1 %vm2049_vm10, %v7025_v34  ;;  %7033 = vmatmul.mubr.msk.f32.vlgmr.msra.gmra.mxu0 %vm2049_vm10, %v7031_v42  ;;  %v2892_v46 = vpop.permute.xlu0 %2891  ;;  %v6064_v34 = vrot.slane %v8116_v16, %v7403_v5 }
 0x2ae   :  { %v2896_v32 = vsel %vm923_vm3, %v2890_v26, %v2892_v46  ;;  %v3132_v48 = vsel %vm896_vm5, %v3124_v29, %v3126_v45  ;;  %2977 = vmatprep.mubr.f32.mxu0 %v9623_v14  ;;  %3048 = vmatprep.mubr.f32.mxu1 %v9623_v14 }
 0x2af   :  { %3014 = vmatprep.subr.mxu1 %v2896_v32  ;;  %3175 = vmatprep.subr.mxu0 %v3132_v48 }
 0x2b0   :  { %3015 = vmatpush1.msra.mxu1 %v2895_v25  ;;  %3176 = vmatpush1.msra.mxu0 %v3131_v50 }
 0x2b1   :  { %v3130_v52 = vpop.permute.xlu1 %3129  ;;  %7034 = vmatmul.mubr.msk.f32.gmra.mxu0 %vm2049_vm10, %v7032_v1  ;;  %7035 = vmatmul.mubr.msk.f32.vlgmr.msra.gmra.mxu1 %vm2049_vm10, %v7031_v42  ;;  %v3359_v36 = vpop.permute.xlu0 %3358 }
 0x2b2   :  { %3054 = vmatprep.mubr.f32.mxu1 %v9623_v14  ;;  %3209 = vmatprep.mubr.f32.mxu0 %v9623_v14 }
 0x2b5   :  { %v3357_v8 = vpop.permute.xlu1 %3356  ;;  %7036 = vmatmul.mubr.msk.f32.gmra.mxu1 %vm2049_vm10, %v7032_v1  ;;  %7040 = vmatmul.mubr.msk.f32.vlgmr.msra.gmra.mxu0 %vm2049_vm10, %v7038_v54  ;;  %v3128_v33 = vpop.permute.xlu0 %3127 }
 0x2b6   :  { %v3134_v56 = vsel %vm896_vm5, %v3128_v33, %v3130_v52  ;;  %v3365_v57 = vsel %vm677_vm2, %v3357_v8, %v3359_v36  ;;  %3215 = vmatprep.mubr.f32.mxu0 %v9623_v14  ;;  %v3133_v53 = vsel %vm896_vm5, %v3126_v45, %v3128_v33  ;;  %3286 = vmatprep.mubr.f32.mxu1 %v9623_v14 }
 0x2b7   :  { %3252 = vmatprep.subr.mxu1 %v3134_v56  ;;  %3408 = vmatprep.subr.mxu0 %v3365_v57 }
 0x2b8   :  { %3253 = vmatpush1.msra.mxu1 %v3133_v53 }
 0x2b9   :  { %v3355_v59 = vpop.permute.xlu1 %3354  ;;  %7041 = vmatmul.mubr.msk.f32.gmra.mxu0 %vm2049_vm10, %v7039_v55  ;;  %7042 = vmatmul.mubr.msk.f32.vlgmr.msra.gmra.mxu1 %vm2049_vm10, %v7038_v54  ;;  %v3363_v49 = vpop.permute.xlu0 %3362 }
 0x2ba   :  { %v3364_v60 = vsel %vm677_vm2, %v3355_v59, %v3357_v8  ;;  %3292 = vmatprep.mubr.f32.mxu1 %v9623_v14  ;;  %3442 = vmatprep.mubr.f32.mxu0 %v9623_v14 }
 0x2bb   :  { %3409 = vmatpush1.msra.mxu0 %v3364_v60 }
 0x2bd   :  { %v3361_v38 = vpop.permute.xlu1 %3360  ;;  %7043 = vmatmul.mubr.msk.f32.gmra.mxu1 %vm2049_vm10, %v7039_v55  ;;  %7047 = vmatmul.mubr.msk.f32.vlgmr.msra.gmra.mxu0 %vm2049_vm10, %v7045_v61  ;;  %v3590_v58 = vpop.permute.xlu0 %3589 }
 0x2be   :  { %v3367_v62 = vsel %vm677_vm2, %v3361_v38, %v3363_v49  ;;  %3448 = vmatprep.mubr.f32.mxu0 %v9623_v14  ;;  %v3366_v63 = vsel %vm677_vm2, %v3359_v36, %v3361_v38  ;;  %3519 = vmatprep.mubr.f32.mxu1 %v9623_v14 }
 0x2bf   :  { %3485 = vmatprep.subr.mxu1 %v3367_v62 }
 0x2c0   :  { %3486 = vmatpush1.msra.mxu1 %v3366_v63 }
 0x2c1   :  { %v3592_v3 = vpop.permute.xlu1 %3591  ;;  %7048 = vmatmul.mubr.msk.f32.gmra.mxu0 %vm2049_vm10, %v7046_v2  ;;  %7049 = vmatmul.mubr.msk.f32.vlgmr.msra.gmra.mxu1 %vm2049_vm10, %v7045_v61  ;;  %v3588_v9 = vpop.permute.xlu0 %3587 }
 0x2c2   :  { %v3597_v15 = vsel %vm458_vm1, %v3588_v9, %v3590_v58  ;;  %v3598_v44 = vsel %vm458_vm1, %v3590_v58, %v3592_v3  ;;  %3525 = vmatprep.mubr.f32.mxu1 %v9623_v14  ;;  %3675 = vmatprep.mubr.f32.mxu0 %v9623_v14 }
 0x2c3   :  { %3641 = vmatprep.subr.mxu0 %v3598_v44 }
 0x2c4   :  { %3642 = vmatpush1.msra.mxu0 %v3597_v15 }
 0x2c5   :  { %v3596_v11 = vpop.permute.xlu1 %3595  ;;  %7050 = vmatmul.mubr.msk.f32.gmra.mxu1 %vm2049_vm10, %v7046_v2  ;;  %7054 = vmatmul.mubr.msk.f32.vlgmr.msra.gmra.mxu0 %vm2049_vm10, %v7052_v10  ;;  %v3594_v12 = vpop.permute.xlu0 %3593 }
 0x2c6   :  { %v3600_v13 = vsel %vm458_vm1, %v3594_v12, %v3596_v11  ;;  %3681 = vmatprep.mubr.f32.mxu0 %v9623_v14  ;;  %v3599_v17 = vsel %vm458_vm1, %v3592_v3, %v3594_v12  ;;  %3752 = vmatprep.mubr.f32.mxu1 %v9623_v14 }
 0x2c7   :  { %3718 = vmatprep.subr.mxu1 %v3600_v13 }
 0x2c8   :  { %3719 = vmatpush1.msra.mxu1 %v3599_v17 }
 0x2c9   :  { %v3823_v19 = vpop.permute.xlu1 %3822  ;;  %7055 = vmatmul.mubr.msk.f32.gmra.mxu0 %vm2049_vm10, %v7053_v18  ;;  %7056 = vmatmul.mubr.msk.f32.vlgmr.msra.gmra.mxu1 %vm2049_vm10, %v7052_v10  ;;  %v3825_v20 = vpop.permute.xlu0 %3824 }
 0x2ca   :  { %v3831_v0 = vsel %vm85_vm0, %v3823_v19, %v3825_v20  ;;  %3758 = vmatprep.mubr.f32.mxu1 %v9623_v14  ;;  %3908 = vmatprep.mubr.f32.mxu0 %v9623_v14 }
 0x2cb   :  { %3874 = vmatprep.subr.mxu0 %v3831_v0 }
 0x2cd   :  { %v3827_v21 = vpop.permute.xlu1 %3826  ;;  %7057 = vmatmul.mubr.msk.f32.gmra.mxu1 %vm2049_vm10, %v7053_v18  ;;  %v3829_v22 = vpop.permute.xlu0 %3828 }
 0x2ce   :  { %v3833_v23 = vsel %vm85_vm0, %v3827_v21, %v3829_v22  ;;  %v3832_v4 = vsel %vm85_vm0, %v3825_v20, %v3827_v21  ;;  %3985 = vmatprep.mubr.f32.mxu1 %v9623_v14 }
 0x2cf   :  { %3951 = vmatprep.subr.mxu1 %v3833_v23 }
 0x2d0   :  { %3952 = vmatpush1.msra.mxu1 %v3832_v4 }
 0x2d1   :  { %v3821_v26 = vpop.permute.xlu1 %3820  ;;  %7063 = vmatmul.mubr.msk.f32.vlgmr.msra.gmra.mxu1 %vm2049_vm10, %v7059_v24 }
 0x2d2   :  { %v3830_v47 = vsel %vm85_vm0, %v3821_v26, %v3823_v19  ;;  %3991 = vmatprep.mubr.f32.mxu1 %v9623_v14 }
 0x2d3   :  { %3875 = vmatpush1.msra.mxu0 %v3830_v47 }
 0x2d4   :  { %7061 = vmatmul.mubr.msk.f32.vlgmr.msra.gmra.mxu0 %vm2049_vm10, %v7059_v24 }
 0x2d5   :  { %7064 = vmatmul.mubr.msk.f32.gmra.mxu1 %vm2049_vm10, %v7060_v27  ;;  %3914 = vmatprep.mubr.f32.mxu0 %v9623_v14 }
 0x2d6   :  { %4306 = vmatprep.mubr.f32.mxu1 %v9623_v14 }
 0x2d8   :  { %7062 = vmatmul.mubr.msk.f32.gmra.mxu0 %vm2049_vm10, %v7060_v27 }
 0x2d9   :  { %4229 = vmatprep.mubr.f32.mxu0 %v9623_v14 }
 0x2da   :  { %v8255_v28 = vpop.permute.xlu0 %4015 }
 0x2db   :  { %9674 = vst [vmem:[#allocation9_spill] sm:$0xff] %v8255_v28 }
 0x2de   :  { %v8257_v6 = vpop.permute.xlu0 %4085  ;;  %v8259_v29 = vpop.permute.xlu1 %4010 }
 0x2df   :  { %v4101_v30 = vmul.f32 0.0, %v8257_v6 }
 0x2e1   :  { %4133 = vrot.lane.b32.xlu0 %v4101_v30, %s7312_s30  ;;  %4123 = vrot.lane.b32.xlu1 %v4101_v30, %s7312_s30 }
 0x2e2   :  { %v8266_v35 = vpop.permute.xlu1 %4087  ;;  %v8268_v37 = vpop.permute.xlu0 %4089 }
 0x2e5   :  { %6075 = vrot.lane.b32.xlu0 %v6064_v34, %s7312_s30 }
 0x2e6   :  { %v8273_v41 = vpop.permute.xlu1 %4091  ;;  %v8275_v42 = vpop.permute.xlu0 %4497 }
 0x2e7   :  { %v4513_v45 = vmul.f32 0.0, %v8275_v42 }
 0x2e9   :  { %6079 = vrot.lane.b32.xlu0 %v6072_v40, %s7312_s30  ;;  %4536 = vrot.lane.b32.xlu1 %v4513_v45, %s7311_s29 }
 0x2ea   :  { %v8280_v5 = vpop.permute.xlu1 %4499  ;;  %v8282_v46 = vpop.permute.xlu0 %4501 }
 0x2ed   :  { %4546 = vrot.lane.b32.xlu0 %v4513_v45, %s7311_s29 }
 0x2ee   :  { %v8285_v32 = vpop.permute.xlu1 %4503  ;;  %v8287_v48 = vpop.permute.xlu0 %4758 }
 0x2ef   :  { %v4774_v7 = vmul.f32 0.0, %v8287_v48 }
 0x2f1   :  { %4797 = vrot.lane.b32.xlu1 %v4774_v7, %s7310_s27  ;;  %4807 = vrot.lane.b32.xlu0 %v4774_v7, %s7310_s27 }
 0x2f2   :  { %v8292_v16 = vpop.permute.xlu1 %4760  ;;  %v8294_v1 = vpop.permute.xlu0 %4762 }
 0x2f6   :  { %v8296_v50 = vpop.permute.xlu1 %4764  ;;  %v8298_v25 = vpop.permute.xlu0 %5019 }
 0x2f7   :  { %9675 = vst [vmem:[#allocation10_spill] sm:$0xff] %v8296_v50  ;;  %v5035_v52 = vmul.f32 0.0, %v8298_v25 }
 0x2f9   :  { %5058 = vrot.lane.b32.xlu1 %v5035_v52, %s7309_s24  ;;  %5068 = vrot.lane.b32.xlu0 %v5035_v52, %s7309_s24 }
 0x2fa   :  { %v8303_v36 = vpop.permute.xlu1 %5021 }
 0x2fe   :  { %v8305_v54 = vpop.permute.xlu1 %5025 }
 0x2ff   :  { %9676 = vst [vmem:[#allocation11_spill] sm:$0xff] %v8305_v54 }
 0x302   :  { %v8307_v8 = vpop.permute.xlu1 %5292 }
 0x306   :  { %v8309_v33 = vpop.permute.xlu1 %5296 }
 0x307   :  { %9677 = vst [vmem:[#allocation12_spill] sm:$0xff] %v8309_v33  ;;  %v5310_v56 = vmul.f32 0.0, %v8309_v33 }
 0x309   :  { %5337 = vrot.lane.b32.xlu0 %v5310_v56, %s7308_s21  ;;  %5347 = vrot.lane.b32.xlu1 %v5310_v56, %s7308_s21 }
 0x34d   :  { %v8314_v57 = vpop.f32.mrf.mxu0 }
 0x34f   :  { %v8316_v53 = vpop.f32.mrf.mxu0 }
 0x351   :  { %v2128_v55 = vpop.f32.mrf.mxu0  ;;  %v8318_v59 = vpop.f32.mrf.mxu1 }
 0x353   :  { %v2130_v49 = vpop.f32.mrf.mxu0  ;;  %v8320_v60 = vpop.f32.mrf.mxu1 }
 0x355   :  { %v2205_v61 = vpop.f32.mrf.mxu1  ;;  %v8322_v38 = vpop.f32.mrf.mxu0 }
 0x357   :  { %v2207_v58 = vpop.f32.mrf.mxu1  ;;  %v8324_v62 = vpop.f32.mrf.mxu0 }
 0x359   :  { %v2288_v63 = vpop.f32.mrf.mxu0  ;;  %v2359_v2 = vpop.f32.mrf.mxu1 }
 0x35a   :  { %v2289_v3 = vadd.f32 %v2288_v63, %v2128_v55 }
 0x35b   :  { %v2290_v9 = vpop.f32.mrf.mxu0  ;;  %v8326_v15 = vpop.f32.mrf.mxu1 }
 0x35c   :  { %v2291_v44 = vadd.f32 %v2290_v9, %v2130_v49 }
 0x35d   :  { %v2365_v10 = vpop.f32.mrf.mxu1  ;;  %v2507_v11 = vpop.f32.mrf.mxu0 }
 0x35e   :  { %v2366_v12 = vadd.f32 %v2365_v10, %v2205_v61 }
 0x35f   :  { %v2367_v13 = vpop.f32.mrf.mxu1  ;;  %v8328_v17 = vpop.f32.mrf.mxu0 }
 0x360   :  { %v2368_v18 = vadd.f32 %v2367_v13, %v2207_v58 }
 0x361   :  { %v2513_v19 = vpop.f32.mrf.mxu0  ;;  %v2584_v20 = vpop.f32.mrf.mxu1 }
 0x362   :  { %v8330_v0 = vadd.f32 %v2513_v19, %v2289_v3 }
 0x363   :  { %v2515_v21 = vpop.f32.mrf.mxu0  ;;  %v8332_v22 = vpop.f32.mrf.mxu1 }
 0x364   :  { %v2600_v23 = vadd.f32 %v2515_v21, %v2291_v44 }
 0x365   :  { %v2590_v4 = vpop.f32.mrf.mxu1  ;;  %v2740_v24 = vpop.f32.mrf.mxu0 }
 0x366   :  { %v2601_v26 = vadd.f32 %v2590_v4, %v2366_v12 }
 0x367   :  { %v2592_v47 = vpop.f32.mrf.mxu1  ;;  %v2742_v27 = vpop.f32.mrf.mxu0 }
 0x368   :  { %v2602_v30 = vadd.f32 %v2592_v47, %v2368_v18 }
 0x369   :  { %v8334_v34 = vpop.f32.mrf.mxu0  ;;  %v2817_v40 = vpop.f32.mrf.mxu1 }
 0x36b   :  { %v2748_v45 = vpop.f32.mrf.mxu0  ;;  %v8336_v7 = vpop.f32.mrf.mxu1 }
 0x36c   :  { %v2833_v52 = vadd.f32 %v2748_v45, %v2600_v23 }
 0x36d   :  { %v2823_v56 = vpop.f32.mrf.mxu1  ;;  %v2973_v55 = vpop.f32.mrf.mxu0 }
 0x36e   :  { %v2834_v49 = vadd.f32 %v2823_v56, %v2601_v26 }
 0x36f   :  { %v2825_v61 = vpop.f32.mrf.mxu1  ;;  %v2975_v58 = vpop.f32.mrf.mxu0 }
 0x370   :  { %v2835_v63 = vadd.f32 %v2825_v61, %v2602_v30 }
 0x371   :  { %v8338_v3 = vpop.f32.mrf.mxu0  ;;  %v3050_v9 = vpop.f32.mrf.mxu1 }
 0x373   :  { %v2981_v44 = vpop.f32.mrf.mxu0  ;;  %v8340_v10 = vpop.f32.mrf.mxu1 }
 0x374   :  { %v3066_v12 = vadd.f32 %v2981_v44, %v2833_v52 }
 0x375   :  { %v3056_v13 = vpop.f32.mrf.mxu1  ;;  %v3211_v18 = vpop.f32.mrf.mxu0 }
 0x376   :  { %v8342_v19 = vadd.f32 %v3056_v13, %v2834_v49 }
 0x377   :  { %v3058_v21 = vpop.f32.mrf.mxu1  ;;  %v3213_v4 = vpop.f32.mrf.mxu0 }
 0x378   :  { %9678 = vst [vmem:[#allocation13_spill] sm:$0xff] %v8342_v19  ;;  %v3068_v23 = vadd.f32 %v3058_v21, %v2835_v63  ;;  %v2360_v21 = vadd.f32 %v2359_v2, %v8318_v59  ;;  %v8364_v2 = vpop.permute.xlu0 %5023 }
 0x379   :  { %v8344_v47 = vpop.f32.mrf.mxu0  ;;  %v3288_v26 = vpop.f32.mrf.mxu1 }
 0x37a   :  { %v2597_v51 = vadd.f32 %v2584_v20, %v2360_v21 }
 0x37b   :  { %v3219_v45 = vpop.f32.mrf.mxu0  ;;  %v8346_v56 = vpop.f32.mrf.mxu1 }
 0x37c   :  { %v8348_v30 = vadd.f32 %v3219_v45, %v3066_v12  ;;  %v2283_v12 = vadd.f32 %v8322_v38, %v8314_v57 }
 0x37d   :  { %v8350_v61 = vpop.f32.mrf.mxu1  ;;  %v3444_v14 = vpop.f32.mrf.mxu0 }
 0x37e   :  { %9679 = vst [vmem:[#allocation14_spill] sm:$0xff] %v8348_v30  ;;  %9680 = vst [vmem:[#allocation15_spill] sm:$0xff] %v8350_v61  ;;  %v2830_v30 = vadd.f32 %v2817_v40, %v2597_v51 }
 0x37f   :  { %v3296_v39 = vpop.f32.mrf.mxu1  ;;  %v3446_v52 = vpop.f32.mrf.mxu0 }
 0x380   :  { %v3306_v44 = vadd.f32 %v3296_v39, %v3068_v23  ;;  %v2285_v39 = vadd.f32 %v8324_v62, %v8316_v53  ;;  %v2595_v23 = vadd.f32 %v2507_v11, %v2283_v12  ;;  %v3063_v28 = vadd.f32 %v3050_v9, %v2830_v30 }
 0x381   :  { %v8352_v31 = vpop.f32.mrf.mxu0  ;;  %v3521_v49 = vpop.f32.mrf.mxu1 }
 0x382   :  { %v2596_v61 = vadd.f32 %v8328_v17, %v2285_v39  ;;  %v2828_v59 = vadd.f32 %v2740_v24, %v2595_v23  ;;  %v3301_v21 = vadd.f32 %v3288_v26, %v3063_v28  ;;  %v8372_v17 = vpop.permute.xlu0 %5290  ;;  %v8411_v23 = vsel %vm85_vm0, %v8266_v35, %v8268_v37 }
 0x383   :  { %v8354_v13 = vpop.f32.mrf.mxu0  ;;  %v3523_v63 = vpop.f32.mrf.mxu1 }
 0x384   :  { %9681 = vst [vmem:[#allocation16_spill] sm:$0xff] %v8354_v13  ;;  %v3061_v19 = vadd.f32 %v2973_v55, %v2828_v59  ;;  %v3534_v51 = vadd.f32 %v3521_v49, %v3301_v21 }
 0x385   :  { %v8357_v43 = vpop.f32.mrf.mxu1  ;;  %v3677_v33 = vpop.f32.mrf.mxu0 }
 0x386   :  { %9682 = vst [vmem:[#allocation17_spill] sm:$0xff] %v8357_v43  ;;  %v2829_v43 = vadd.f32 %v2742_v27, %v2596_v61  ;;  %v3299_v53 = vadd.f32 %v3211_v18, %v3061_v19  ;;  %v2362_v27 = vadd.f32 %v8326_v15, %v8320_v60  ;;  %v8383_v61 = vpop.permute.xlu0 %5294 }
 0x387   :  { %v3529_v45 = vpop.f32.mrf.mxu1  ;;  %v3679_v13 = vpop.f32.mrf.mxu0 }
 0x388   :  { %v3539_v54 = vadd.f32 %v3529_v45, %v3306_v44  ;;  %v3062_v40 = vadd.f32 %v2975_v58, %v2829_v43  ;;  %v3532_v24 = vadd.f32 %v3444_v14, %v3299_v53 }
 0x389   :  { %v3754_v50 = vpop.f32.mrf.mxu1  ;;  %v8368_v38 = vpop.f32.mrf.mxu0 }
 0x38a   :  { %v3767_v11 = vadd.f32 %v3754_v50, %v3534_v51  ;;  %v3300_v30 = vadd.f32 %v3213_v4, %v3062_v40  ;;  %v3765_v26 = vadd.f32 %v3677_v33, %v3532_v24  ;;  %v2598_v50 = vadd.f32 %v8332_v22, %v2362_v27 }
 0x38b   :  { %v3756_v20 = vpop.f32.mrf.mxu1  ;;  %v8374_v12 = vpop.f32.mrf.mxu0  ;;  %v8389_v33 = vsel %vm923_vm3, %v8307_v8, %v8383_v61 }
 0x38c   :  { %v3533_v55 = vadd.f32 %v3446_v52, %v3300_v30  ;;  %v2831_v14 = vadd.f32 %v8336_v7, %v2598_v50  ;;  %v8400_v7 = vsel %vm85_vm0, %v8257_v6, %v8266_v35  ;;  %v8427_v35 = vsel %vm458_vm1, %v8280_v5, %v8282_v46 }
 0x38d   :  { %v8366_v57 = vpop.f32.mrf.mxu1  ;;  %v2832_v30 = vadd.f32 %v8334_v34, %v8330_v0 }
 0x38e   :  { %v3064_v60 = vadd.f32 %v8340_v10, %v2831_v14 }
 0x38f   :  { %v3762_v62 = vpop.f32.mrf.mxu1  ;;  %v3065_v24 = vadd.f32 %v8338_v3, %v2832_v30  ;;  %v8481_v3 = vsel %vm85_vm0, %v8268_v37, %v8273_v41  ;;  %v9693_v30 = vld [vmem:[#allocation12_spill] sm:$0xff] }
 0x390   :  { %v8370_v9 = vadd.f32 %v3762_v62, %v3539_v54  ;;  %v3766_v54 = vadd.f32 %v3679_v13, %v3533_v55  ;;  %v3302_v13 = vadd.f32 %v8346_v56, %v3064_v60  ;;  %v8419_v56 = vsel %vm458_vm1, %v8275_v42, %v8280_v5 }
 0x391   :  { %v3987_v44 = vpop.f32.mrf.mxu1  ;;  %v8435_v42 = vsel %vm677_vm2, %v8287_v48, %v8292_v16  ;;  %v8443_v5 = vsel %vm677_vm2, %v8292_v16, %v8294_v1  ;;  %v8452_v48 = vsel %vm896_vm5, %v8298_v25, %v8303_v36  ;;  %v3303_v0 = vadd.f32 %v8344_v47, %v3065_v24 }
 0x392   :  { %v4000_v28 = vadd.f32 %v3987_v44, %v3767_v11  ;;  %v3535_v59 = vadd.f32 %v3523_v63, %v3302_v13 }
 0x393   :  { %v3989_v21 = vpop.f32.mrf.mxu1 }
 0x394   :  { %v4020_v43 = vadd.f32 %v8259_v29, %v4000_v28  ;;  %v3910_v58 = vpop.f32.mrf.mxu0  ;;  %v3768_v51 = vadd.f32 %v3756_v20, %v3535_v59  ;;  %v3536_v28 = vadd.f32 %v8352_v31, %v3303_v0 }
 0x395   :  { %v3998_v18 = vadd.f32 %v3910_v58, %v3765_v26  ;;  %v9686_v58 = vld [vmem:[#allocation15_spill] sm:$0xff] }
 0x396   :  { %v8380_v19 = vmax.f32 %v4020_v43, 0.0  ;;  %v3912_v4 = vpop.f32.mrf.mxu0  ;;  %v4001_v63 = vadd.f32 %v3989_v21, %v3768_v51  ;;  %v3769_v47 = vadd.f32 %v8368_v38, %v3536_v28  ;;  %v4507_v43 = vsel %vm458_vm1, %v8282_v46, %v8285_v32  ;;  %v9685_v38 = vld [vmem:[#allocation13_spill] sm:$0xff] }
 0x397   :  { %v4018_v49 = vadd.f32 %v8259_v29, %v3998_v18  ;;  %v3999_v45 = vadd.f32 %v3912_v4, %v3766_v54  ;;  %v3305_v50 = vadd.f32 %v9686_v58, %v9685_v38  ;;  %v9687_v54 = vld [vmem:[#allocation9_spill] sm:$0xff]  ;;  %v9688_v4 = vld [vmem:[#allocation10_spill] sm:$0xff]  ;;  %v5298_v51 = vsel %vm923_vm3, %v8372_v17, %v8307_v8 }
 0x398   :  { %9683 = vst [vmem:[#allocation18_spill] sm:$0xff] %v8380_v19  ;;  %v5308_v52 = vmul.f32 %v8389_v33, %v8380_v19  ;;  %v4021_v62 = vadd.f32 %v8259_v29, %v4001_v63  ;;  %v3916_v27 = vpop.f32.mrf.mxu0  ;;  %v4104_v55 = vmul.f32 %v8481_v3, %v8380_v19  ;;  %v4516_v37 = vmul.f32 %v4507_v43, %v8380_v19  ;;  %v9692_v63 = vld [vmem:[#allocation16_spill] sm:$0xff] }
 0x399   :  { %v8392_v15 = vmax.f32 %v4018_v49, 0.0  ;;  %v4019_v22 = vadd.f32 %v8259_v29, %v3999_v45  ;;  %v8462_v29 = vsel %vm896_vm5, %v8303_v36, %v8364_v2  ;;  %v4002_v26 = vadd.f32 %v3916_v27, %v3769_v47  ;;  %v9689_v45 = vld [vmem:[#allocation17_spill] sm:$0xff] }
 0x39a   :  { %5333 = vrot.lane.b32.xlu0 %v5308_v52, %s7308_s21  ;;  %v8465_v44 = vmax.f32 %v4021_v62, 0.0  ;;  %v4768_v49 = vsel %vm677_vm2, %v8294_v1, %v9688_v4  ;;  %v3538_v46 = vadd.f32 %v9689_v45, %v3305_v50  ;;  %v3918_v62 = vpop.f32.mrf.mxu0  ;;  %v8536_v8 = vsel %vm923_vm3, %v8383_v61, %v9693_v30 }
 0x39b   :  { %v8403_v39 = vmax.f32 %v4019_v22, 0.0  ;;  %v4102_v10 = vmul.f32 %v8400_v7, %v8392_v15  ;;  %v4514_v40 = vmul.f32 %v8419_v56, %v8392_v15  ;;  %v4775_v20 = vmul.f32 %v8435_v42, %v8392_v15  ;;  %v3993_v22 = vpop.f32.mrf.mxu1 }
 0x39c   :  { %v5036_v16 = vmul.f32 %v8452_v48, %v8392_v15  ;;  %9684 = vst [vmem:[#allocation19_spill] sm:$0xff] %v8465_v44  ;;  %v5306_v34 = vmul.f32 %v8372_v17, %v8392_v15  ;;  %v4105_v36 = vmul.f32 %v8273_v41, %v8465_v44  ;;  %v4517_v31 = vmul.f32 %v8285_v32, %v8465_v44 }
 0x39d   :  { %4125 = vrot.lane.b32.xlu1 %v4102_v10, %s7312_s30  ;;  %v4103_v6 = vmul.f32 %v8411_v23, %v8403_v39  ;;  %v4515_v53 = vmul.f32 %v8427_v35, %v8403_v39  ;;  %v4776_v11 = vmul.f32 %v8443_v5, %v8403_v39  ;;  %v5037_v25 = vmul.f32 %v8462_v29, %v8403_v39  ;;  %v9690_v10 = vld [vmem:[#allocation11_spill] sm:$0xff] }
 0x39e   :  { %v4022_v18 = vadd.f32 %v9687_v54, %v4002_v26  ;;  %v4778_v14 = vmul.f32 %v9688_v4, %v8465_v44  ;;  %v4777_v60 = vmul.f32 %v4768_v49, %v8380_v19  ;;  %v3771_v52 = vadd.f32 %v8366_v57, %v3538_v46  ;;  %v3995_v26 = vpop.f32.mrf.mxu1 }
 0x39f   :  { %4127 = vrot.lane.b32.xlu0 %v4103_v6, %s7312_s30  ;;  %v5039_v59 = vmul.f32 %v9690_v10, %v8465_v44  ;;  %v5029_v1 = vsel %vm896_vm5, %v8364_v2, %v9690_v10  ;;  %v5307_v2 = vmul.f32 %v5298_v51, %v8403_v39 }
 0x3a0   :  { %v8508_v13 = vmax.f32 %v4022_v18, 0.0  ;;  %v4004_v6 = vadd.f32 %v3993_v22, %v3771_v52  ;;  %v5038_v21 = vmul.f32 %v5029_v1, %v8380_v19 }
 0x3a1   :  { %4538 = vrot.lane.b32.xlu1 %v4514_v40, %s7311_s29  ;;  %v9691_v40 = vld [vmem:[#allocation14_spill] sm:$0xff] }
 0x3a2   :  { %v4107_v57 = vmul.f32 %v8400_v7, %v8508_v13  ;;  %v4519_v7 = vmul.f32 %v8419_v56, %v8508_v13  ;;  %v4780_v56 = vmul.f32 %v8435_v42, %v8508_v13 }
 0x3a3   :  { %4540 = vrot.lane.b32.xlu0 %v4515_v53, %s7311_s29  ;;  %v3537_v53 = vadd.f32 %v9692_v63, %v9691_v40 }
 0x3a5   :  { %4799 = vrot.lane.b32.xlu1 %v4775_v20, %s7310_s27  ;;  %v4024_v20 = vadd.f32 %v9687_v54, %v4004_v6 }
 0x3a7   :  { %4801 = vrot.lane.b32.xlu0 %v4776_v11, %s7310_s27  ;;  %v3770_v11 = vadd.f32 %v8374_v12, %v3537_v53  ;;  %v8540_v24 = vmax.f32 %v4024_v20, 0.0  ;;  %v5309_v12 = vmul.f32 %v8536_v8, %v8465_v44 }
 0x3a9   :  { %5060 = vrot.lane.b32.xlu1 %v5036_v16, %s7309_s24  ;;  %v8538_v16 = vpop.permute.xlu0 %5551  ;;  %9694 = vst [vmem:[#allocation13_spill] sm:$0xff] %v8540_v24  ;;  %v5313_v61 = vmul.f32 %v8389_v33, %v8540_v24  ;;  %v5311_v33 = vmul.f32 %v8372_v17, %v8508_v13  ;;  %v4521_v17 = vmul.f32 %v4507_v43, %v8540_v24 }
 0x3aa   :  { %v5043_v43 = vmul.f32 %v5029_v1, %v8540_v24  ;;  %v5572_v22 = vmul.f32 %v8538_v16, %v8508_v13 }
 0x3ab   :  { %5062 = vrot.lane.b32.xlu0 %v5037_v25, %s7309_s24  ;;  %v4003_v25 = vadd.f32 %v3918_v62, %v3770_v11 }
 0x3ad   :  { %5329 = vrot.lane.b32.xlu1 %v5306_v34, %s7308_s21  ;;  %v4023_v0 = vadd.f32 %v9687_v54, %v4003_v25  ;;  %v5554_v34 = vpop.permute.xlu1 %5553  ;;  %v5556_v28 = vpop.permute.xlu0 %5555 }
 0x3ae   :  { %v5560_v27 = vsel %vm704_vm6, %v5554_v34, %v5556_v28 }
 0x3af   :  { %4131 = vrot.lane.b32.xlu0 %v4105_v36, %s7312_s30  ;;  %v5041_v36 = vmul.f32 %v8452_v48, %v8508_v13  ;;  %v8556_v47 = vmax.f32 %v4023_v0, 0.0  ;;  %v5574_v42 = vmul.f32 %v5560_v27, %v8540_v24  ;;  %v4109_v48 = vmul.f32 %v8481_v3, %v8540_v24 }
 0x3b0   :  { %v5569_v1 = vmul.f32 %v5560_v27, %v8380_v19 }
 0x3b1   :  { %4129 = vrot.lane.b32.xlu1 %v4104_v55, %s7312_s30  ;;  %v4108_v55 = vmul.f32 %v8411_v23, %v8556_v47  ;;  %v4781_v23 = vmul.f32 %v8443_v5, %v8556_v47  ;;  %v5558_v58 = vpop.permute.xlu1 %5557  ;;  %v8588_v50 = vpop.permute.xlu0 %5812  ;;  %v5312_v18 = vmul.f32 %v5298_v51, %v8556_v47  ;;  %v5567_v51 = vmul.f32 %v8538_v16, %v8392_v15 }
 0x3b2   :  { %v5561_v46 = vsel %vm704_vm6, %v5556_v28, %v5558_v58  ;;  %v5833_v62 = vmul.f32 %v8588_v50, %v8508_v13 }
 0x3b3   :  { %4544 = vrot.lane.b32.xlu0 %v4517_v31, %s7311_s29  ;;  %v4005_v31 = vadd.f32 %v3995_v26, %v8370_v9  ;;  %v4782_v9 = vmul.f32 %v4768_v49, %v8540_v24 }
 0x3b5   :  { %4542 = vrot.lane.b32.xlu1 %v4516_v37, %s7311_s29  ;;  %v4520_v37 = vmul.f32 %v8427_v35, %v8556_v47  ;;  %v4025_v38 = vadd.f32 %v9687_v54, %v4005_v31  ;;  %v5042_v35 = vmul.f32 %v8462_v29, %v8556_v47  ;;  %v5571_v54 = vmul.f32 0.0, %v5558_v58  ;;  %v5817_v49 = vpop.permute.xlu0 %5816 }
 0x3b6   :  { %v5559_v29 = vsel %vm704_vm6, %v8538_v16, %v5554_v34 }
 0x3b7   :  { %4805 = vrot.lane.b32.xlu0 %v4778_v14, %s7310_s27  ;;  %v8581_v3 = vmax.f32 %v4025_v38, 0.0  ;;  %v5815_v14 = vpop.permute.xlu1 %5814  ;;  %v5573_v45 = vmul.f32 %v5559_v29, %v8556_v47 }
 0x3b8   :  { %v5820_v40 = vsel %vm485_vm7, %v8588_v50, %v5815_v14  ;;  %v5821_v11 = vsel %vm485_vm7, %v5815_v14, %v5817_v49 }
 0x3b9   :  { %4803 = vrot.lane.b32.xlu1 %v4777_v60, %s7310_s27  ;;  %9695 = vst [vmem:[#allocation15_spill] sm:$0xff] %v8581_v3  ;;  %v4110_v5 = vmul.f32 %v8273_v41, %v8581_v3  ;;  %v5568_v41 = vmul.f32 %v5559_v29, %v8403_v39  ;;  %v8606_v52 = vpop.permute.xlu0 %4133  ;;  %v5834_v53 = vmul.f32 %v5820_v40, %v8556_v47 }
 0x3ba   :  { %v5835_v30 = vmul.f32 %v5821_v11, %v8540_v24  ;;  %v5314_v28 = vmul.f32 %v8536_v8, %v8581_v3 }
 0x3bb   :  { %5066 = vrot.lane.b32.xlu0 %v5039_v59, %s7309_s24  ;;  %v5819_v60 = vpop.permute.xlu1 %5818  ;;  %v5570_v59 = vmul.f32 %v5561_v46, %v8465_v44 }
 0x3bc   :  { %v5822_v27 = vsel %vm485_vm7, %v5817_v49, %v5819_v60 }
 0x3bd   :  { %5064 = vrot.lane.b32.xlu1 %v5038_v21, %s7309_s24  ;;  %v4522_v21 = vmul.f32 %v8285_v32, %v8581_v3  ;;  %v4783_v32 = vmul.f32 %v9688_v4, %v8581_v3  ;;  %v5830_v4 = vmul.f32 %v5821_v11, %v8380_v19  ;;  %v5831_v8 = vmul.f32 %v5822_v27, %v8465_v44  ;;  %v6837_v11 = vld [vmem:[%s9615_s10] sm:$0x7] }
 0x3bf   :  { %4135 = vrot.lane.b32.xlu0 %v4107_v57, %s7312_s30  ;;  %v8612_v6 = vpop.permute.xlu1 %6073  ;;  %v6076_v57 = vpop.permute.xlu0 %6075 }
 0x3c0   :  { %v6094_v38 = vmul.f32 %v8612_v6, %v8508_v13 }
 0x3c1   :  { %5331 = vrot.lane.b32.xlu1 %v5307_v2, %s7308_s21 }
 0x3c3   :  { %4548 = vrot.lane.b32.xlu0 %v4519_v7, %s7311_s29  ;;  %v8623_v63 = vpop.permute.xlu1 %6077  ;;  %v6080_v20 = vpop.permute.xlu0 %6079 }
 0x3c5   :  { %5335 = vrot.lane.b32.xlu1 %v5309_v12, %s7308_s21  ;;  %v5044_v12 = vmul.f32 %v9690_v10, %v8581_v3  ;;  %v5829_v10 = vmul.f32 %v5820_v40, %v8403_v39 }
 0x3c7   :  { %4809 = vrot.lane.b32.xlu0 %v4780_v56, %s7310_s27  ;;  %v8630_v2 = vpop.permute.xlu1 %4123  ;;  %v8636_v7 = vpop.permute.xlu0 %4546  ;;  %v5832_v56 = vmul.f32 0.0, %v5819_v60 }
 0x3c9   :  { %5343 = vrot.lane.b32.xlu1 %v5313_v61, %s7308_s21 }
 0x3cb   :  { %5070 = vrot.lane.b32.xlu0 %v5041_v36, %s7309_s24  ;;  %v8640_v16 = vpop.permute.xlu1 %4536  ;;  %v8644_v25 = vpop.permute.xlu0 %4807 }
 0x3cd   :  { %5604 = vrot.lane.b32.xlu1 %v5574_v42, %s7307_s18  ;;  %v6081_v42 = vsel %vm112_vm8, %v8612_v6, %v6076_v57 }
 0x3ce   :  { %v6090_v49 = vmul.f32 %v6081_v42, %v8403_v39 }
 0x3cf   :  { %5339 = vrot.lane.b32.xlu0 %v5311_v33, %s7308_s21  ;;  %v8649_v0 = vpop.permute.xlu1 %4797  ;;  %v8653_v61 = vpop.permute.xlu0 %5068 }
 0x3d1   :  { %4137 = vrot.lane.b32.xlu1 %v4108_v55, %s7312_s30  ;;  %v6095_v55 = vmul.f32 %v6081_v42, %v8556_v47 }
 0x3d3   :  { %4139 = vrot.lane.b32.xlu0 %v4109_v48, %s7312_s30  ;;  %v8655_v34 = vpop.permute.xlu1 %5058  ;;  %v8661_v36 = vpop.permute.xlu0 %5337  ;;  %v5575_v48 = vmul.f32 %v5561_v46, %v8581_v3 }
 0x3d5   :  { %4550 = vrot.lane.b32.xlu1 %v4520_v37, %s7311_s29  ;;  %v5828_v37 = vmul.f32 %v8588_v50, %v8392_v15  ;;  %v6093_v50 = vmul.f32 0.0, %v6080_v20 }
 0x3d7   :  { %4552 = vrot.lane.b32.xlu0 %v4521_v17, %s7311_s29  ;;  %v8668_v33 = vpop.permute.xlu1 %5347 }
 0x3d9   :  { %4811 = vrot.lane.b32.xlu1 %v4781_v23, %s7310_s27  ;;  %v6082_v23 = vsel %vm112_vm8, %v6076_v57, %v8623_v63  ;;  %v6089_v57 = vmul.f32 %v8612_v6, %v8392_v15  ;;  %v6541_v6 = vld [vmem:[%s9614_s8] sm:$0x7] }
 0x3db   :  { %4813 = vrot.lane.b32.xlu0 %v4782_v9, %s7310_s27  ;;  %v6096_v9 = vmul.f32 %v6082_v23, %v8540_v24 }
 0x3dd   :  { %5072 = vrot.lane.b32.xlu1 %v5042_v35, %s7309_s24 }
 0x3df   :  { %5074 = vrot.lane.b32.xlu0 %v5043_v43, %s7309_s24  ;;  %v5836_v43 = vmul.f32 %v5822_v27, %v8581_v3 }
 0x3e1   :  { %4141 = vrot.lane.b32.xlu1 %v4110_v5, %s7312_s30 }
 0x3e3   :  { %5341 = vrot.lane.b32.xlu0 %v5312_v18, %s7308_s21 }
 0x3e5   :  { %5608 = vrot.lane.b32.xlu1 %v5571_v54, %s7307_s18 }
 0x3e7   :  { %5602 = vrot.lane.b32.xlu0 %v5573_v45, %s7307_s18  ;;  %v6083_v45 = vsel %vm112_vm8, %v8623_v63, %v6080_v20  ;;  %v6317_v63 = vld [vmem:[%s9613_s6 + $0x8] sm:$0xff] }
 0x3e9   :  { %5592 = vrot.lane.b32.xlu1 %v5568_v41, %s7307_s18  ;;  %v6097_v41 = vmul.f32 %v6083_v45, %v8581_v3 }
 0x3eb   :  { %5600 = vrot.lane.b32.xlu0 %v5572_v22, %s7307_s18  ;;  %v6092_v22 = vmul.f32 %v6083_v45, %v8465_v44 }
 0x3ed   :  { %5596 = vrot.lane.b32.xlu1 %v5570_v59, %s7307_s18 }
 0x3ef   :  { %5594 = vrot.lane.b32.xlu0 %v5569_v1, %s7307_s18 }
 0x3f1   :  { %4554 = vrot.lane.b32.xlu1 %v4522_v21, %s7311_s29 }
 0x3f3   :  { %5598 = vrot.lane.b32.xlu0 %v5571_v54, %s7307_s18  ;;  %v6091_v54 = vmul.f32 %v6082_v23, %v8380_v19 }
 0x3f5   :  { %5590 = vrot.lane.b32.xlu1 %v5567_v51, %s7307_s18  ;;  %v6316_v51 = vld [vmem:[%s9613_s6] sm:$0xff] }
 0x3f7   :  { %5863 = vrot.lane.b32.xlu0 %v5834_v53, %s7305_s0 }
 0x3f9   :  { %4815 = vrot.lane.b32.xlu1 %v4783_v32, %s7310_s27 }
 0x3fb   :  { %5861 = vrot.lane.b32.xlu0 %v5833_v62, %s7305_s0 }
 0x3fd   :  { %5865 = vrot.lane.b32.xlu1 %v5835_v30, %s7305_s0 }
 0x3ff   :  { %5855 = vrot.lane.b32.xlu0 %v5830_v4, %s7305_s0 }
 0x401   :  { %5076 = vrot.lane.b32.xlu1 %v5044_v12, %s7309_s24 }
 0x403   :  { %5859 = vrot.lane.b32.xlu0 %v5832_v56, %s7305_s0 }
 0x405   :  { %5869 = vrot.lane.b32.xlu1 %v5832_v56, %s7305_s0 }
 0x407   :  { %5345 = vrot.lane.b32.xlu0 %v5314_v28, %s7308_s21 }
 0x409   :  { %5853 = vrot.lane.b32.xlu1 %v5829_v10, %s7305_s0 }
 0x40b   :  { %6124 = vrot.lane.b32.xlu0 %v6095_v55, %s7306_s28 }
 0x40c   :  { %v8673_v26 = vpop.permute.xlu0 %5333 }
 0x40d   :  { %5857 = vrot.lane.b32.xlu1 %v5831_v8, %s7305_s0 }
 0x40f   :  { %v8677_v31 = vpop.permute.xlu1 %4125  ;;  %5606 = vrot.lane.b32.xlu0 %v5575_v48, %s7307_s18 }
 0x411   :  { %5851 = vrot.lane.b32.xlu1 %v5828_v37, %s7305_s0  ;;  %v8683_v17 = vpop.permute.xlu0 %4127 }
 0x413   :  { %v8690_v35 = vpop.permute.xlu1 %4538  ;;  %6122 = vrot.lane.b32.xlu0 %v6094_v38, %s7306_s28 }
 0x415   :  { %6126 = vrot.lane.b32.xlu1 %v6096_v9, %s7306_s28  ;;  %v8694_v58 = vpop.permute.xlu0 %4540 }
 0x417   :  { %v8697_v5 = vpop.permute.xlu1 %4799  ;;  %5867 = vrot.lane.b32.xlu0 %v5836_v43, %s7305_s0 }
 0x419   :  { %6130 = vrot.lane.b32.xlu1 %v6093_v50, %s7306_s28  ;;  %v4802_v18 = vpop.permute.xlu0 %4801 }
 0x41a   :  { %v8704_v14 = vsel %vm704_vm6, %v8697_v5, %v4802_v18 }
 0x41b   :  { %v8706_v29 = vpop.permute.xlu1 %5060  ;;  %6116 = vrot.lane.b32.xlu0 %v6091_v54, %s7306_s28 }
 0x41d   :  { %6114 = vrot.lane.b32.xlu1 %v6090_v49, %s7306_s28  ;;  %v5063_v46 = vpop.permute.xlu0 %5062 }
 0x41e   :  { %v8716_v60 = vsel %vm923_vm3, %v8706_v29, %v5063_v46 }
 0x41f   :  { %v8719_v59 = vpop.permute.xlu1 %5329  ;;  %6128 = vrot.lane.b32.xlu0 %v6097_v41, %s7306_s28 }
 0x421   :  { %6118 = vrot.lane.b32.xlu1 %v6092_v22, %s7306_s28  ;;  %v8723_v1 = vpop.permute.xlu0 %4131  ;;  %v4143_v22 = vsel %vm112_vm8, %v8630_v2, %v8677_v31 }
 0x423   :  { %v8725_v21 = vpop.permute.xlu1 %4129  ;;  %6120 = vrot.lane.b32.xlu0 %v6093_v50, %s7306_s28 }
 0x425   :  { %6112 = vrot.lane.b32.xlu1 %v6089_v57, %s7306_s28  ;;  %v4545_v40 = vpop.permute.xlu0 %4544 }
 0x427   :  { %v4543_v53 = vpop.permute.xlu1 %4542  ;;  %6320 = vperm.xlu0 %7300, %v6316_v51   ;;  %v9696_v51 = vmov 0.0  }
 0x428   :  { %v8739_v20 = vsel %vm485_vm7, %v8694_v58, %v4543_v53  ;;  %v8745_v32 = vsel %vm485_vm7, %v4543_v53, %v4545_v40  ;;  %v4112_v40 = vld [vmem:[%s9616_s5 + $0x8] sm:$0xff]  ;;  %v7065_v53 = vld [vmem:[%s9616_s5 + $0x40] sm:$0xff] }
 0x429   :  { %6325 = vperm.xlu1 %7301, %v6317_v63   ;;  %v4806_v62 = vpop.permute.xlu0 %4805 }
 0x42b   :  { %v4804_v30 = vpop.permute.xlu1 %4803  ;;  %6544 = vperm.xlu0 %7300, %v6541_v6  }
 0x42c   :  { %v8751_v4 = vsel %vm704_vm6, %v4802_v18, %v4804_v30  ;;  %v8754_v12 = vsel %vm704_vm6, %v4804_v30, %v4806_v62  ;;  %v4557_v30 = vsel %vm485_vm7, %v8690_v35, %v8694_v58 }
 0x42d   :  { %6840 = vperm.xlu1 %7301, %v6837_v11   ;;  %v5067_v56 = vpop.permute.xlu0 %5066 }
 0x42f   :  { %v5065_v28 = vpop.permute.xlu1 %5064 }
 0x430   :  { %v8757_v10 = vsel %vm923_vm3, %v5063_v46, %v5065_v28  ;;  %v8760_v27 = vsel %vm923_vm3, %v5065_v28, %v5067_v56  ;;  %v4111_v46 = vld [vmem:[%s9616_s5] sm:$0xff]  ;;  %v4556_v56 = vsel %vm485_vm7, %v8640_v16, %v8690_v35  ;;  %v4146_v16 = vsel %vm112_vm8, %v8725_v21, %v8723_v1 }
 0x431   :  { %v4136_v42 = vpop.permute.xlu0 %4135  ;;  %v4145_v35 = vsel %vm112_vm8, %v8683_v17, %v8725_v21  ;;  %v4817_v21 = vsel %vm704_vm6, %v8649_v0, %v8697_v5  ;;  %v7083_v5 = vld [vmem:[%s9616_s5 + $0x20] sm:$0xff] }
 0x432   :  { %v4147_v45 = vsel %vm112_vm8, %v8606_v52, %v4136_v42 }
 0x433   :  { %v8762_v55 = vpop.permute.xlu1 %5331 }
 0x435   :  { %v4549_v8 = vpop.permute.xlu0 %4548 }
 0x436   :  { %v4560_v62 = vsel %vm485_vm7, %v8636_v7, %v4549_v8  ;;  %v7066_v7 = vld [vmem:[%s9616_s5 + $0x48] sm:$0xff] }
 0x437   :  { %v5336_v48 = vpop.permute.xlu1 %5335 }
 0x438   :  { %v8766_v37 = vsel %vm896_vm5, %v8673_v26, %v5336_v48  ;;  %v8770_v38 = vsel %vm896_vm5, %v5336_v48, %v8661_v36  ;;  %v4144_v36 = vsel %vm112_vm8, %v8677_v31, %v8683_v17 }
 0x439   :  { %v8772_v23 = vpop.permute.xlu0 %4809 }
 0x43a   :  { %v4821_v17 = vsel %vm704_vm6, %v8644_v25, %v8772_v23  ;;  %v7077_v25 = vld [vmem:[%s9616_s5 + $0x18] sm:$0xff] }
 0x43b   :  { %v8774_v9 = vpop.permute.xlu1 %5343 }
 0x43d   :  { %v8776_v43 = vpop.permute.xlu0 %5070 }
 0x43f   :  { %v8778_v50 = vpop.permute.xlu1 %5604 }
 0x441   :  { %v8780_v54 = vpop.permute.xlu0 %5339 }
 0x443   :  { %v4138_v18 = vpop.permute.xlu1 %4137 }
 0x444   :  { %v4148_v49 = vsel %vm112_vm8, %v4136_v42, %v4138_v18 }
 0x445   :  { %4193 = vmatprep.subr.mxu0 %v4148_v49  ;;  %v4140_v41 = vpop.permute.xlu0 %4139 }
 0x446   :  { %4194 = vmatpush1.msra.mxu0 %v4147_v45  ;;  %v4149_v58 = vsel %vm112_vm8, %v4138_v18, %v4140_v41  ;;  %v7076_v18 = vld [vmem:[%s9616_s5 + $0x10] sm:$0xff] }
 0x447   :  { %v8794_v57 = vpop.permute.xlu1 %4550  ;;  %4195 = vmatprep.subr.mxu0 %v4144_v36  ;;  %v5082_v36 = vsel %vm923_vm3, %v8653_v61, %v8776_v43  ;;  %v8909_v61 = vld [vmem:[%s9616_s5 + $0x28] sm:$0xff] }
 0x448   :  { %4196 = vmatpush1.msra.mxu0 %v4143_v22  ;;  %v4561_v2 = vsel %vm485_vm7, %v4549_v8, %v8794_v57 }
 0x449   :  { %7067 = vmatmul.mubr.msk.f32.vlgmr.msra.gmra.mxu0 %vm485_vm7, %v4111_v46  ;;  %4353 = vmatprep.subr.mxu0 %v8556_v47  ;;  %v8798_v52 = vpop.permute.xlu0 %4552 }
 0x44a   :  { %4354 = vmatpush1.msra.mxu0 %v8508_v13  ;;  %4235 = vmatprep.mubr.f32.mxu0 %v9696_v51 }
 0x44b   :  { %v8805_v63 = vpop.permute.xlu1 %4811  ;;  %4355 = vmatprep.subr.mxu0 %v8403_v39 }
 0x44c   :  { %4356 = vmatpush1.msra.mxu0 %v8392_v15  ;;  %v4822_v42 = vsel %vm704_vm6, %v8772_v23, %v8805_v63 }
 0x44d   :  { %7068 = vmatmul.mubr.msk.f32.gmra.mxu0 %vm485_vm7, %v4112_v40  ;;  %4606 = vmatprep.subr.mxu0 %v4561_v2  ;;  %v8812_v31 = vpop.permute.xlu0 %4813 }
 0x44e   :  { %4389 = vmatprep.mubr.f32.mxu0 %v9696_v51 }
 0x44f   :  { %v8818_v6 = vpop.permute.xlu1 %5072 }
 0x450   :  { %v5083_v23 = vsel %vm923_vm3, %v8776_v43, %v8818_v6 }
 0x451   :  { %7071 = vmatmul.mubr.msk.f32.vlgmr.msra.gmra.mxu0 %vm485_vm7, %v7065_v53  ;;  %v8823_v11 = vpop.permute.xlu0 %5074 }
 0x452   :  { %4607 = vmatpush1.msra.mxu0 %v4560_v62  ;;  %4395 = vmatprep.mubr.f32.mxu0 %v9696_v51  ;;  %v8949_v62 = vld [vmem:[%s9616_s5 + $0x38] sm:$0xff] }
 0x453   :  { %4608 = vmatprep.subr.mxu0 %v4557_v30  ;;  %v4142_v28 = vpop.permute.xlu1 %4141  ;;  %v5349_v30 = vsel %vm896_vm5, %v8719_v59, %v8762_v55  ;;  %v7097_v59 = vld [vmem:[%s9616_s5 + $0x50] sm:$0xff] }
 0x454   :  { %4609 = vmatpush1.msra.mxu0 %v4556_v56  ;;  %v4150_v8 = vsel %vm112_vm8, %v4140_v41, %v4142_v28  ;;  %v4823_v28 = vsel %vm704_vm6, %v8805_v63, %v8812_v31 }
 0x455   :  { %4867 = vmatprep.subr.mxu0 %v4822_v42  ;;  %4270 = vmatprep.subr.mxu1 %v4150_v8  ;;  %v8840_v48 = vpop.permute.xlu0 %5341  ;;  %v7098_v8 = vld [vmem:[%s9616_s5 + $0x58] sm:$0xff] }
 0x456   :  { %7072 = vmatmul.mubr.msk.f32.gmra.mxu0 %vm485_vm7, %v7066_v7  ;;  %4271 = vmatpush1.msra.mxu1 %v4149_v58  ;;  %v5354_v2 = vsel %vm896_vm5, %v8840_v48, %v8774_v9 }
 0x457   :  { %v8849_v49 = vpop.permute.xlu1 %5608  ;;  %4272 = vmatprep.subr.mxu1 %v4146_v16  ;;  %4642 = vmatprep.mubr.f32.mxu0 %v9696_v51  ;;  %v5084_v16 = vsel %vm923_vm3, %v8818_v6, %v8823_v11 }
 0x458   :  { %4273 = vmatpush1.msra.mxu1 %v4145_v35 }
 0x459   :  { %7069 = vmatmul.mubr.msk.f32.vlgmr.msra.gmra.mxu1 %vm485_vm7, %v4111_v46  ;;  %4430 = vmatprep.subr.mxu1 %v8581_v3  ;;  %v8857_v45 = vpop.permute.xlu0 %5602  ;;  %v9422_v3 = vld [vmem:[%s9617_s12 + $0x188] sm:$0xff] }
 0x45a   :  { %7078 = vmatmul.mubr.msk.f32.vlgmr.msra.gmra.mxu0 %vm485_vm7, %v7076_v18  ;;  %4431 = vmatpush1.msra.mxu1 %v8540_v24  ;;  %v5615_v56 = vsel %vm677_vm2, %v8857_v45, %v8778_v50  ;;  %v6338_v24 = vld [vmem:[%s9617_s12 + $0x10] sm:$0xff]  ;;  %9727 = vst [vmem:[#allocation39_spill] sm:$0xff] %v9422_v3 }
 0x45b   :  { %4868 = vmatpush1.msra.mxu0 %v4821_v17  ;;  %v8864_v1 = vpop.permute.xlu1 %5592  ;;  %4432 = vmatprep.subr.mxu1 %v8465_v44 }
 0x45c   :  { %4869 = vmatprep.subr.mxu0 %v8704_v14  ;;  %4312 = vmatprep.mubr.f32.mxu1 %v9696_v51 }
 0x45d   :  { %4870 = vmatpush1.msra.mxu0 %v4817_v21  ;;  %4433 = vmatpush1.msra.mxu1 %v8380_v19  ;;  %v8879_v41 = vpop.permute.xlu0 %5600  ;;  %v6353_v19 = vld [vmem:[%s9617_s12 + $0x88] sm:$0xff] }
 0x45e   :  { %4648 = vmatprep.mubr.f32.mxu0 %v9696_v51  ;;  %5128 = vmatprep.subr.mxu0 %v5083_v23 }
 0x45f   :  { %7070 = vmatmul.mubr.msk.f32.gmra.mxu1 %vm485_vm7, %v4112_v40  ;;  %7079 = vmatmul.mubr.msk.f32.gmra.mxu0 %vm485_vm7, %v7077_v25  ;;  %v8884_v0 = vpop.permute.xlu1 %5596  ;;  %v5078_v40 = vsel %vm923_vm3, %v8655_v34, %v8706_v29  ;;  %v4562_v34 = vsel %vm485_vm7, %v8794_v57, %v8798_v52 }
 0x460   :  { %4466 = vmatprep.mubr.f32.mxu1 %v9696_v51  ;;  %4903 = vmatprep.mubr.f32.mxu0 %v9696_v51 }
 0x461   :  { %v8891_v14 = vpop.permute.xlu0 %5594 }
 0x463   :  { %7073 = vmatmul.mubr.msk.f32.vlgmr.msra.gmra.mxu1 %vm485_vm7, %v7065_v53  ;;  %7085 = vmatmul.mubr.msk.f32.vlgmr.msra.gmra.mxu0 %vm485_vm7, %v7083_v5  ;;  %v4555_v46 = vpop.permute.xlu1 %4554 }
 0x464   :  { %5129 = vmatpush1.msra.mxu0 %v5082_v36  ;;  %4472 = vmatprep.mubr.f32.mxu1 %v9696_v51  ;;  %v4563_v22 = vsel %vm485_vm7, %v8798_v52, %v4555_v46  ;;  %v7112_v46 = vld [vmem:[%s9616_s5 + $0x78] sm:$0xff] }
 0x465   :  { %5130 = vmatprep.subr.mxu0 %v8716_v60  ;;  %4909 = vmatprep.mubr.f32.mxu0 %v9696_v51  ;;  %v8911_v43 = vpop.permute.xlu0 %5598  ;;  %v8927_v60 = vld [vmem:[%s9616_s5 + $0x30] sm:$0xff] }
 0x466   :  { %5131 = vmatpush1.msra.mxu0 %v5078_v40  ;;  %4683 = vmatprep.subr.mxu1 %v4563_v22 }
 0x467   :  { %5399 = vmatprep.subr.mxu0 %v5354_v2  ;;  %7074 = vmatmul.mubr.msk.f32.gmra.mxu1 %vm485_vm7, %v7066_v7  ;;  %v5591_v29 = vpop.permute.xlu1 %5590 }
 0x468   :  { %7086 = vmatmul.mubr.msk.f32.gmra.mxu0 %vm485_vm7, %v8909_v61  ;;  %4684 = vmatpush1.msra.mxu1 %v4562_v34  ;;  %v5610_v42 = vsel %vm677_vm2, %v5591_v29, %v8864_v1 }
 0x469   :  { %4685 = vmatprep.subr.mxu1 %v8745_v32  ;;  %4719 = vmatprep.mubr.f32.mxu1 %v9696_v51  ;;  %v8929_v53 = vpop.permute.xlu0 %5863  ;;  %v5353_v32 = vsel %vm896_vm5, %v8780_v54, %v8840_v48 }
 0x46a   :  { %4686 = vmatpush1.msra.mxu1 %v8739_v20  ;;  %5164 = vmatprep.mubr.f32.mxu0 %v9696_v51  ;;  %v5350_v20 = vsel %vm896_vm5, %v8762_v55, %v8673_v26 }
 0x46b   :  { %7080 = vmatmul.mubr.msk.f32.vlgmr.msra.gmra.mxu1 %vm485_vm7, %v7076_v18  ;;  %v4816_v57 = vpop.permute.xlu1 %4815  ;;  %v7104_v18 = vld [vmem:[%s9616_s5 + $0x60] sm:$0xff] }
 0x46c   :  { %7092 = vmatmul.mubr.msk.f32.vlgmr.msra.gmra.mxu0 %vm485_vm7, %v8927_v60  ;;  %4725 = vmatprep.mubr.f32.mxu1 %v9696_v51  ;;  %v4824_v52 = vsel %vm704_vm6, %v8812_v31, %v4816_v57  ;;  %v5614_v31 = vsel %vm677_vm2, %v8879_v41, %v8857_v45  ;;  %v5612_v41 = vsel %vm677_vm2, %v8891_v14, %v8884_v0 }
 0x46d   :  { %5400 = vmatpush1.msra.mxu0 %v5353_v32  ;;  %5170 = vmatprep.mubr.f32.mxu0 %v9696_v51  ;;  %v5862_v54 = vpop.permute.xlu0 %5861 }
 0x46e   :  { %5401 = vmatprep.subr.mxu0 %v5350_v20  ;;  %4944 = vmatprep.subr.mxu1 %v4824_v52 }
 0x46f   :  { %5402 = vmatpush1.msra.mxu0 %v5349_v30  ;;  %7081 = vmatmul.mubr.msk.f32.gmra.mxu1 %vm485_vm7, %v7077_v25  ;;  %v8958_v26 = vpop.permute.xlu1 %5865  ;;  %v9082_v30 = vld [vmem:[%s9617_s12 + $0x1f8] sm:$0xff] }
 0x470   :  { %5660 = vmatprep.subr.mxu0 %v5615_v56  ;;  %7093 = vmatmul.mubr.msk.f32.gmra.mxu0 %vm485_vm7, %v8949_v62  ;;  %v5876_v58 = vsel %vm458_vm1, %v8929_v53, %v8958_v26  ;;  %9697 = vst [vmem:[#allocation9_spill] sm:$0xff] %v9082_v30 }
 0x471   :  { %4945 = vmatpush1.msra.mxu1 %v4823_v28  ;;  %4980 = vmatprep.mubr.f32.mxu1 %v9696_v51  ;;  %v8969_v55 = vpop.permute.xlu0 %5855  ;;  %v7118_v28 = vld [vmem:[%s9616_s5 + $0x80] sm:$0xff] }
 0x472   :  { %4946 = vmatprep.subr.mxu1 %v8754_v12  ;;  %5435 = vmatprep.mubr.f32.mxu0 %v9696_v51  ;;  %v5611_v12 = vsel %vm677_vm2, %v8864_v1, %v8891_v14 }
 0x473   :  { %4947 = vmatpush1.msra.mxu1 %v8751_v4  ;;  %v5077_v63 = vpop.permute.xlu1 %5076 }
 0x474   :  { %7087 = vmatmul.mubr.msk.f32.vlgmr.msra.gmra.mxu1 %vm485_vm7, %v7083_v5  ;;  %7099 = vmatmul.mubr.msk.f32.vlgmr.msra.gmra.mxu0 %vm485_vm7, %v7097_v59  ;;  %v5085_v7 = vsel %vm923_vm3, %v8823_v11, %v5077_v63  ;;  %v9105_v63 = vld [vmem:[%s9617_s12 + $0x178] sm:$0xff] }
 0x475   :  { %5661 = vmatpush1.msra.mxu0 %v5614_v31  ;;  %4986 = vmatprep.mubr.f32.mxu1 %v9696_v51  ;;  %v8985_v4 = vpop.permute.xlu0 %5859  ;;  %9698 = vst [vmem:[#allocation10_spill] sm:$0xff] %v9105_v63  ;;  %v9112_v31 = vld [vmem:[%s9617_s12 + $0x1f0] sm:$0xff] }
 0x476   :  { %5662 = vmatprep.subr.mxu0 %v5611_v12  ;;  %5441 = vmatprep.mubr.f32.mxu0 %v9696_v51  ;;  %9699 = vst [vmem:[#allocation17_spill] sm:$0xff] %v9112_v31  ;;  %v9124_v12 = vld [vmem:[%s9617_s12 + $0x170] sm:$0xff] }
 0x477   :  { %5663 = vmatpush1.msra.mxu0 %v5610_v42  ;;  %5205 = vmatprep.subr.mxu1 %v5085_v7  ;;  %v8996_v48 = vpop.permute.xlu1 %5869  ;;  %v9117_v7 = vld [vmem:[%s9617_s12 + $0xf0] sm:$0xff]  ;;  %9700 = vst [vmem:[#allocation11_spill] sm:$0xff] %v9124_v12 }
 0x478   :  { %5921 = vmatprep.subr.mxu0 %v5876_v58  ;;  %7088 = vmatmul.mubr.msk.f32.gmra.mxu1 %vm485_vm7, %v8909_v61  ;;  %v9134_v42 = vld [vmem:[%s9617_s12 + $0x70] sm:$0xff]  ;;  %v9148_v58 = vld [vmem:[%s9617_s12 + $0xe8] sm:$0xff] }
 0x479   :  { %7100 = vmatmul.mubr.msk.f32.gmra.mxu0 %vm485_vm7, %v7098_v8  ;;  %5206 = vmatpush1.msra.mxu1 %v5084_v16  ;;  %v5346_v35 = vpop.permute.xlu0 %5345  ;;  %v9160_v16 = vld [vmem:[%s9617_s12 + $0x68] sm:$0xff] }
 0x47a   :  { %5207 = vmatprep.subr.mxu1 %v8760_v27  ;;  %5241 = vmatprep.mubr.f32.mxu1 %v9696_v51  ;;  %v5356_v45 = vsel %vm896_vm5, %v5346_v35, %v8668_v33  ;;  %v5355_v6 = vsel %vm896_vm5, %v8774_v9, %v5346_v35  ;;  %v5875_v27 = vsel %vm458_vm1, %v5862_v54, %v8929_v53  ;;  %v7105_v9 = vld [vmem:[%s9616_s5 + $0x68] sm:$0xff]  ;;  %v9167_v35 = vld [vmem:[%s9617_s12 + $0x1e0] sm:$0xff] }
 0x47b   :  { %5208 = vmatpush1.msra.mxu1 %v8757_v10  ;;  %5696 = vmatprep.mubr.f32.mxu0 %v9696_v51  ;;  %v5854_v11 = vpop.permute.xlu1 %5853  ;;  %9703 = vst [vmem:[#allocation12_spill] sm:$0xff] %v9167_v35 }
 0x47c   :  { %7094 = vmatmul.mubr.msk.f32.vlgmr.msra.gmra.mxu1 %vm485_vm7, %v8927_v60  ;;  %5476 = vmatprep.subr.mxu1 %v5356_v45  ;;  %v5872_v33 = vsel %vm458_vm1, %v5854_v11, %v8969_v55  ;;  %v9179_v45 = vld [vmem:[%s9617_s12 + $0x160] sm:$0xff] }
 0x47d   :  { %7106 = vmatmul.mubr.msk.f32.vlgmr.msra.gmra.mxu0 %vm485_vm7, %v7104_v18  ;;  %5247 = vmatprep.mubr.f32.mxu1 %v9696_v51  ;;  %v6125_v10 = vpop.permute.xlu0 %6124  ;;  %9704 = vst [vmem:[#allocation20_spill] sm:$0xff] %v9179_v45 }
 0x47e   :  { %5922 = vmatpush1.msra.mxu0 %v5875_v27  ;;  %5477 = vmatpush1.msra.mxu1 %v5355_v6  ;;  %v9705_v6 = vld [vmem:[#allocation8_spill] sm:$0xff]  ;;  %v9191_v27 = vld [vmem:[%s9617_s12 + $0x1d8] sm:$0xff] }
 0x47f   :  { %5702 = vmatprep.mubr.f32.mxu0 %v9696_v51  ;;  %5478 = vmatprep.subr.mxu1 %v8770_v38  ;;  %v5858_v17 = vpop.permute.xlu1 %5857  ;;  %9706 = vst [vmem:[#allocation8_spill] sm:$0xff] %v9191_v27 }
 0x480   :  { %7095 = vmatmul.mubr.msk.f32.gmra.mxu1 %vm485_vm7, %v8949_v62  ;;  %5923 = vmatprep.subr.mxu0 %v5872_v33  ;;  %v5873_v34 = vsel %vm458_vm1, %v8969_v55, %v5858_v17  ;;  %v9099_v55 = vld [vmem:[%s9617_s12 + $0x78] sm:$0xff]  ;;  %v9707_v33 = vld [vmem:[#allocation7_spill] sm:$0xff] }
 0x481   :  { %7107 = vmatmul.mubr.msk.f32.gmra.mxu0 %vm485_vm7, %v7105_v9  ;;  %5479 = vmatpush1.msra.mxu1 %v8766_v37  ;;  %v5607_v1 = vpop.permute.xlu0 %5606  ;;  %v7111_v37 = vld [vmem:[%s9616_s5 + $0x70] sm:$0xff] }
 0x482   :  { %5512 = vmatprep.mubr.f32.mxu1 %v9696_v51  ;;  %v5616_v21 = vsel %vm677_vm2, %v8778_v50, %v5607_v1  ;;  %v5617_v25 = vsel %vm677_vm2, %v5607_v1, %v8849_v49  ;;  %5957 = vmatprep.mubr.f32.mxu0 %v9696_v51  ;;  %v5613_v50 = vsel %vm677_vm2, %v8884_v0, %v8911_v43  ;;  %v9215_v1 = vld [vmem:[%s9617_s12 + $0x1d0] sm:$0xff] }
 0x483   :  { %v5852_v38 = vpop.permute.xlu1 %5851  ;;  %5737 = vmatprep.subr.mxu1 %v5617_v25  ;;  %v5874_v43 = vsel %vm458_vm1, %v5858_v17, %v8985_v4  ;;  %v7119_v4 = vld [vmem:[%s9616_s5 + $0x88] sm:$0xff]  ;;  %v9210_v17 = vld [vmem:[%s9617_s12 + $0x58] sm:$0xff]  ;;  %9709 = vst [vmem:[#allocation21_spill] sm:$0xff] %v9215_v1  ;;  %v9227_v25 = vld [vmem:[%s9617_s12 + $0x150] sm:$0xff] }
 0x484   :  { %7101 = vmatmul.mubr.msk.f32.vlgmr.msra.gmra.mxu1 %vm485_vm7, %v7097_v59  ;;  %v5871_v23 = vsel %vm458_vm1, %v5852_v38, %v5854_v11  ;;  %v9093_v59 = vld [vmem:[%s9617_s12 + $0xf8] sm:$0xff]  ;;  %v9186_v11 = vld [vmem:[%s9617_s12 + $0x60] sm:$0xff]  ;;  %9710 = vst [vmem:[#allocation22_spill] sm:$0xff] %v9227_v25  ;;  %v9234_v38 = vld [vmem:[%s9617_s12 + $0x50] sm:$0xff] }
 0x485   :  { %5518 = vmatprep.mubr.f32.mxu1 %v9696_v51  ;;  %5738 = vmatpush1.msra.mxu1 %v5616_v21  ;;  %v6123_v49 = vpop.permute.xlu0 %6122  ;;  %v9222_v21 = vld [vmem:[%s9617_s12 + $0xd0] sm:$0xff] }
 0x486   :  { %5739 = vmatprep.subr.mxu1 %v5613_v50  ;;  %5924 = vmatpush1.msra.mxu0 %v5871_v23  ;;  %v6136_v22 = vsel %vm85_vm0, %v6123_v49, %v6125_v10  ;;  %v9239_v23 = vld [vmem:[%s9617_s12 + $0x1c8] sm:$0xff] }
 0x487   :  { %5740 = vmatpush1.msra.mxu1 %v5612_v41  ;;  %7113 = vmatmul.mubr.msk.f32.vlgmr.msra.gmra.mxu0 %vm485_vm7, %v7111_v37  ;;  %v6127_v5 = vpop.permute.xlu1 %6126  ;;  %9711 = vst [vmem:[#allocation23_spill] sm:$0xff] %v9239_v23  ;;  %v9251_v50 = vld [vmem:[%s9617_s12 + $0x148] sm:$0xff]  ;;  %v9263_v41 = vld [vmem:[%s9617_s12 + $0x1c0] sm:$0xff] }
 0x488   :  { %7102 = vmatmul.mubr.msk.f32.gmra.mxu1 %vm485_vm7, %v7098_v8  ;;  %5963 = vmatprep.mubr.f32.mxu0 %v9696_v51  ;;  %v6137_v36 = vsel %vm85_vm0, %v6125_v10, %v6127_v5  ;;  %v9141_v8 = vld [vmem:[%s9617_s12 + $0x1e8] sm:$0xff]  ;;  %v9198_v10 = vld [vmem:[%s9617_s12 + $0xd8] sm:$0xff]  ;;  %9712 = vst [vmem:[#allocation24_spill] sm:$0xff] %v9251_v50  ;;  %9713 = vst [vmem:[#allocation25_spill] sm:$0xff] %v9263_v41 }
 0x489   :  { %5773 = vmatprep.mubr.f32.mxu1 %v9696_v51  ;;  %6182 = vmatprep.subr.mxu0 %v6137_v36  ;;  %v5868_v0 = vpop.permute.xlu0 %5867  ;;  %9701 = vst [vmem:[#allocation14_spill] sm:$0xff] %v9141_v8  ;;  %v9258_v49 = vld [vmem:[%s9617_s12 + $0x48] sm:$0xff]  ;;  %v9275_v36 = vld [vmem:[%s9617_s12 + $0x140] sm:$0xff] }
 0x48a   :  { %v5877_v14 = vsel %vm458_vm1, %v8958_v26, %v5868_v0  ;;  %6183 = vmatpush1.msra.mxu0 %v6136_v22  ;;  %v5878_v40 = vsel %vm458_vm1, %v5868_v0, %v8996_v48  ;;  %v9153_v48 = vld [vmem:[%s9617_s12 + $0x168] sm:$0xff]  ;;  %9714 = vst [vmem:[#allocation26_spill] sm:$0xff] %v9275_v36  ;;  %v9287_v22 = vld [vmem:[%s9617_s12 + $0x1b8] sm:$0xff] }
 0x48b   :  { %7114 = vmatmul.mubr.msk.f32.gmra.mxu0 %vm485_vm7, %v7112_v46  ;;  %v6131_v61 = vpop.permute.xlu1 %6130  ;;  %5998 = vmatprep.subr.mxu1 %v5878_v40  ;;  %9702 = vst [vmem:[#allocation16_spill] sm:$0xff] %v9153_v48  ;;  %9715 = vst [vmem:[#allocation27_spill] sm:$0xff] %v9287_v22  ;;  %v9294_v0 = vld [vmem:[%s9617_s12 + $0xb8] sm:$0xff] }
 0x48c   :  { %7108 = vmatmul.mubr.msk.f32.vlgmr.msra.gmra.mxu1 %vm485_vm7, %v7104_v18  ;;  %6218 = vmatprep.mubr.f32.mxu0 %v9696_v51  ;;  %v9174_v18 = vld [vmem:[%s9617_s12 + $0xe0] sm:$0xff]  ;;  %v9306_v40 = vld [vmem:[%s9617_s12 + $0x38] sm:$0xff] }
 0x48d   :  { %5779 = vmatprep.mubr.f32.mxu1 %v9696_v51  ;;  %5999 = vmatpush1.msra.mxu1 %v5877_v14  ;;  %v6117_v2 = vpop.permute.xlu0 %6116  ;;  %v9299_v14 = vld [vmem:[%s9617_s12 + $0x138] sm:$0xff] }
 0x48e   :  { %6000 = vmatprep.subr.mxu1 %v5874_v43  ;;  %9716 = vst [vmem:[#allocation28_spill] sm:$0xff] %v9299_v14  ;;  %v9318_v43 = vld [vmem:[%s9617_s12 + $0xb0] sm:$0xff] }
 0x48f   :  { %6001 = vmatpush1.msra.mxu1 %v5873_v34  ;;  %v6115_v29 = vpop.permute.xlu1 %6114  ;;  %v9330_v34 = vld [vmem:[%s9617_s12 + $0x30] sm:$0xff] }
 0x490   :  { %7109 = vmatmul.mubr.msk.f32.gmra.mxu1 %vm485_vm7, %v7105_v9  ;;  %v6133_v60 = vsel %vm85_vm0, %v6115_v29, %v6117_v2  ;;  %v9203_v9 = vld [vmem:[%s9617_s12 + $0x158] sm:$0xff] }
 0x491   :  { %6034 = vmatprep.mubr.f32.mxu1 %v9696_v51  ;;  %6184 = vmatprep.subr.mxu0 %v6133_v60  ;;  %v6129_v53 = vpop.permute.xlu0 %6128  ;;  %9708 = vst [vmem:[#allocation7_spill] sm:$0xff] %v9203_v9  ;;  %v9342_v60 = vld [vmem:[%s9617_s12 + $0xa8] sm:$0xff] }
 0x492   :  { %v6138_v57 = vsel %vm85_vm0, %v6127_v5, %v6129_v53  ;;  %v6139_v32 = vsel %vm85_vm0, %v6129_v53, %v6131_v61  ;;  %v9270_v5 = vld [vmem:[%s9617_s12 + $0xc0] sm:$0xff]  ;;  %v9311_v61 = vld [vmem:[%s9617_s12 + $0x1b0] sm:$0xff]  ;;  %v9347_v53 = vld [vmem:[%s9617_s12 + $0x128] sm:$0xff] }
 0x493   :  { %v6119_v52 = vpop.permute.xlu1 %6118  ;;  %6259 = vmatprep.subr.mxu1 %v6139_v32  ;;  %9717 = vst [vmem:[#allocation29_spill] sm:$0xff] %v9311_v61  ;;  %9720 = vst [vmem:[#allocation32_spill] sm:$0xff] %v9347_v53  ;;  %v9359_v32 = vld [vmem:[%s9617_s12 + $0x1a0] sm:$0xff] }
 0x494   :  { %7115 = vmatmul.mubr.msk.f32.vlgmr.msra.gmra.mxu1 %vm485_vm7, %v7111_v37  ;;  %v6134_v56 = vsel %vm85_vm0, %v6117_v2, %v6119_v52  ;;  %v9246_v37 = vld [vmem:[%s9617_s12 + $0xc8] sm:$0xff]  ;;  %v9323_v2 = vld [vmem:[%s9617_s12 + $0x130] sm:$0xff]  ;;  %9721 = vst [vmem:[#allocation33_spill] sm:$0xff] %v9359_v32 }
 0x495   :  { %6040 = vmatprep.mubr.f32.mxu1 %v9696_v51  ;;  %6260 = vmatpush1.msra.mxu1 %v6138_v57  ;;  %v6121_v20 = vpop.permute.xlu0 %6120  ;;  %9718 = vst [vmem:[#allocation30_spill] sm:$0xff] %v9323_v2  ;;  %v9354_v57 = vld [vmem:[%s9617_s12 + $0x28] sm:$0xff] }
 0x496   :  { %v6135_v62 = vsel %vm85_vm0, %v6119_v52, %v6121_v20  ;;  %v9366_v52 = vld [vmem:[%s9617_s12 + $0xa0] sm:$0xff] }
 0x497   :  { %v6113_v54 = vpop.permute.xlu1 %6112  ;;  %6261 = vmatprep.subr.mxu1 %v6135_v62  ;;  %v9371_v20 = vld [vmem:[%s9617_s12 + $0x120] sm:$0xff] }
 0x498   :  { %7116 = vmatmul.mubr.msk.f32.gmra.mxu1 %vm485_vm7, %v7112_v46  ;;  %v6132_v26 = vsel %vm85_vm0, %v6113_v54, %v6115_v29  ;;  %v9282_v46 = vld [vmem:[%s9617_s12 + $0x40] sm:$0xff]  ;;  %v9335_v29 = vld [vmem:[%s9617_s12 + $0x1a8] sm:$0xff]  ;;  %9722 = vst [vmem:[#allocation34_spill] sm:$0xff] %v9371_v20  ;;  %v9383_v54 = vld [vmem:[%s9617_s12 + $0x198] sm:$0xff] }
 0x499   :  { %6262 = vmatpush1.msra.mxu1 %v6134_v56  ;;  %6295 = vmatprep.mubr.f32.mxu1 %v9696_v51  ;;  %9719 = vst [vmem:[#allocation31_spill] sm:$0xff] %v9335_v29  ;;  %v9378_v62 = vld [vmem:[%s9617_s12 + $0x20] sm:$0xff]  ;;  %9723 = vst [vmem:[#allocation35_spill] sm:$0xff] %v9383_v54  ;;  %v6355_v56 = vld [vmem:[%s9617_s12 + $0x98] sm:$0xff] }
 0x49a   :  { %6185 = vmatpush1.msra.mxu0 %v6132_v26  ;;  %7161 = vmatprep.subr.mxu1 %v9082_v30  ;;  %v9393_v26 = vld [vmem:[%s9617_s12 + $0x118] sm:$0xff] }
 0x49b   :  { %7120 = vmatmul.mubr.msk.f32.vlgmr.msra.gmra.mxu0 %vm485_vm7, %v7118_v28  ;;  %7126 = vmatprep.subr.mxu0 %v9093_v59  ;;  %9724 = vst [vmem:[#allocation36_spill] sm:$0xff] %v9393_v26 }
 0x49c   :  { %7122 = vmatmul.mubr.msk.f32.vlgmr.msra.gmra.mxu1 %vm485_vm7, %v7118_v28  ;;  %7127 = vmatpush3.msra.mxu0 %v9099_v55  ;;  %v6339_v28 = vld [vmem:[%s9617_s12 + $0x18] sm:$0xff] }
 0x49d   :  { %7162 = vmatpush3.msra.mxu1 %v9105_v63  ;;  %6301 = vmatprep.mubr.f32.mxu1 %v9696_v51 }
 0x49e   :  { %7163 = vmatprep.subr.mxu1 %v9112_v31  ;;  %7128 = vmatprep.subr.mxu0 %v9117_v7 }
 0x49f   :  { %7164 = vmatpush3.msra.mxu1 %v9124_v12  ;;  %6224 = vmatprep.mubr.f32.mxu0 %v9696_v51 }
 0x4a0   :  { %7123 = vmatmul.mubr.msk.f32.gmra.mxu1 %vm485_vm7, %v7119_v4  ;;  %7129 = vmatpush3.msra.mxu0 %v9134_v42 }
 0x4a1   :  { %7165 = vmatprep.subr.mxu1 %v9141_v8  ;;  %7121 = vmatmul.mubr.msk.f32.gmra.mxu0 %vm485_vm7, %v7119_v4  ;;  %v9403_v4 = vld [vmem:[%s9617_s12 + $0x190] sm:$0xff] }
 0x4a2   :  { %7130 = vmatprep.subr.mxu0 %v9148_v58  ;;  %7166 = vmatpush3.msra.mxu1 %v9153_v48  ;;  %9725 = vst [vmem:[#allocation37_spill] sm:$0xff] %v9403_v4 }
 0x4a3   :  { %6534 = vmatprep.mubr.f32.mxu1 %v9705_v6  ;;  %7131 = vmatpush3.msra.mxu0 %v9160_v16  ;;  %v6354_v6 = vld [vmem:[%s9617_s12 + $0x90] sm:$0xff] }
 0x4a4   :  { %6464 = vmatprep.mubr.f32.mxu0 %v9707_v33  ;;  %7167 = vmatprep.subr.mxu1 %v9167_v35  ;;  %v9413_v33 = vld [vmem:[%s9617_s12 + $0x110] sm:$0xff] }
 0x4a5   :  { %7132 = vmatprep.subr.mxu0 %v9174_v18  ;;  %7168 = vmatpush3.msra.mxu1 %v9179_v45  ;;  %9726 = vst [vmem:[#allocation38_spill] sm:$0xff] %v9413_v33 }
 0x4a6   :  { %7133 = vmatpush3.msra.mxu0 %v9186_v11  ;;  %7169 = vmatprep.subr.mxu1 %v9191_v27 }
 0x4a7   :  { %7134 = vmatprep.subr.mxu0 %v9198_v10  ;;  %7170 = vmatpush3.msra.mxu1 %v9203_v9 }
 0x4a8   :  { %7135 = vmatpush3.msra.mxu0 %v9210_v17  ;;  %7171 = vmatprep.subr.mxu1 %v9215_v1 }
 0x4a9   :  { %7136 = vmatprep.subr.mxu0 %v9222_v21  ;;  %7172 = vmatpush3.msra.mxu1 %v9227_v25 }
 0x4aa   :  { %7137 = vmatpush3.msra.mxu0 %v9234_v38  ;;  %7173 = vmatprep.subr.mxu1 %v9239_v23 }
 0x4ab   :  { %7138 = vmatprep.subr.mxu0 %v9246_v37  ;;  %7174 = vmatpush3.msra.mxu1 %v9251_v50 }
 0x4ac   :  { %7139 = vmatpush3.msra.mxu0 %v9258_v49  ;;  %7175 = vmatprep.subr.mxu1 %v9263_v41 }
 0x4ad   :  { %7140 = vmatprep.subr.mxu0 %v9270_v5  ;;  %7176 = vmatpush3.msra.mxu1 %v9275_v36 }
 0x4ae   :  { %7141 = vmatpush3.msra.mxu0 %v9282_v46  ;;  %7177 = vmatprep.subr.mxu1 %v9287_v22 }
 0x4af   :  { %7142 = vmatprep.subr.mxu0 %v9294_v0  ;;  %7178 = vmatpush3.msra.mxu1 %v9299_v14 }
 0x4b0   :  { %7143 = vmatpush3.msra.mxu0 %v9306_v40  ;;  %7179 = vmatprep.subr.mxu1 %v9311_v61 }
 0x4b1   :  { %7144 = vmatprep.subr.mxu0 %v9318_v43  ;;  %7180 = vmatpush3.msra.mxu1 %v9323_v2 }
 0x4b2   :  { %7145 = vmatpush3.msra.mxu0 %v9330_v34  ;;  %7181 = vmatprep.subr.mxu1 %v9335_v29 }
 0x4b3   :  { %7146 = vmatprep.subr.mxu0 %v9342_v60  ;;  %7182 = vmatpush3.msra.mxu1 %v9347_v53  ;;  %v9732_v53 = vld [vmem:[#allocation5_spill] sm:$0xff] }
 0x4b4   :  { %7147 = vmatpush3.msra.mxu0 %v9354_v57  ;;  %7183 = vmatprep.subr.mxu1 %v9359_v32  ;;  %v6336_v32 = vld [vmem:[%s9617_s12] sm:$0xff] }
 0x4b5   :  { %7148 = vmatprep.subr.mxu0 %v9366_v52  ;;  %7184 = vmatpush3.msra.mxu1 %v9371_v20  ;;  %v6352_v20 = vld [vmem:[%s9617_s12 + $0x80] sm:$0xff] }
 0x4b6   :  { %7149 = vmatpush3.msra.mxu0 %v9378_v62  ;;  %7185 = vmatprep.subr.mxu1 %v9383_v54  ;;  %v6337_v54 = vld [vmem:[%s9617_s12 + $0x8] sm:$0xff] }
 0x4b7   :  { %7150 = vmatprep.subr.mxu0 %v6355_v56  ;;  %7186 = vmatpush3.msra.mxu1 %v9393_v26  ;;  %v9431_v26 = vld [vmem:[%s9617_s12 + $0x108] sm:$0xff] }
 0x4b8   :  { %7151 = vmatpush3.msra.mxu0 %v6339_v28  ;;  %7187 = vmatprep.subr.mxu1 %v9403_v4  ;;  %9728 = vst [vmem:[#allocation40_spill] sm:$0xff] %v9431_v26  ;;  %v9440_v4 = vld [vmem:[%s9617_s12 + $0x180] sm:$0xff] }
 0x4b9   :  { %7152 = vmatprep.subr.mxu0 %v6354_v6  ;;  %7188 = vmatpush3.msra.mxu1 %v9413_v33  ;;  %9729 = vst [vmem:[#allocation41_spill] sm:$0xff] %v9440_v4  ;;  %v9449_v33 = vld [vmem:[%s9617_s12 + $0x100] sm:$0xff] }
 0x4ba   :  { %7153 = vmatpush3.msra.mxu0 %v6338_v24  ;;  %7189 = vmatprep.subr.mxu1 %v9422_v3  ;;  %9730 = vst [vmem:[#allocation42_spill] sm:$0xff] %v9449_v33  ;;  %v9731_v3 = vld [vmem:[#allocation6_spill] sm:$0xff] }
 0x4bb   :  { %7154 = vmatprep.subr.mxu0 %v6353_v19  ;;  %7190 = vmatpush3.msra.mxu1 %v9431_v26 }
 0x4bc   :  { %7155 = vmatpush3.msra.mxu0 %v6337_v54  ;;  %7191 = vmatprep.subr.mxu1 %v9440_v4 }
 0x4bd   :  { %7156 = vmatprep.subr.mxu0 %v6352_v20  ;;  %7192 = vmatpush3.msra.mxu1 %v9449_v33 }
 0x4be   :  { %7157 = vmatpush3.msra.mxu0 %v6336_v32  ;;  %6535 = vmatmul.mubr.f32.vlgmr.msra.gmra.mxu1 %v9731_v3 }
 0x4bf   :  { %7198 = vmatprep.subr.mxu1 %v9093_v59  ;;  %6465 = vmatmul.mubr.f32.vlgmr.msra.gmra.mxu0 %v9732_v53 }
 0x4c0   :  { %7199 = vmatpush3.msra.mxu1 %v9099_v55  ;;  %6750 = vmatprep.mubr.f32.mxu1 %v8403_v39 }
 0x4c1   :  { %7200 = vmatprep.subr.mxu1 %v9117_v7  ;;  %7277 = vmatprep.subr.mxu0 %v9696_v51 }
 0x4c2   :  { %7201 = vmatpush3.msra.mxu1 %v9134_v42  ;;  %7279 = vmatprep.mubr.msk.f32.mxu0 %vm7314_vm11, %v9696_v51 }
 0x4c3   :  { %7202 = vmatprep.subr.mxu1 %v9148_v58 }
 0x4c4   :  { %7203 = vmatpush3.msra.mxu1 %v9160_v16 }
 0x4c5   :  { %7204 = vmatprep.subr.mxu1 %v9174_v18 }
 0x4c6   :  { %7205 = vmatpush3.msra.mxu1 %v9186_v11 }
 0x4c7   :  { %7206 = vmatprep.subr.mxu1 %v9198_v10 }
 0x4c8   :  { %7207 = vmatpush3.msra.mxu1 %v9210_v17 }
 0x4c9   :  { %7208 = vmatprep.subr.mxu1 %v9222_v21 }
 0x4ca   :  { %7209 = vmatpush3.msra.mxu1 %v9234_v38 }
 0x4cb   :  { %7210 = vmatprep.subr.mxu1 %v9246_v37 }
 0x4cc   :  { %7211 = vmatpush3.msra.mxu1 %v9258_v49 }
 0x4cd   :  { %7212 = vmatprep.subr.mxu1 %v9270_v5 }
 0x4ce   :  { %7213 = vmatpush3.msra.mxu1 %v9282_v46 }
 0x4cf   :  { %7214 = vmatprep.subr.mxu1 %v9294_v0 }
 0x4d0   :  { %7215 = vmatpush3.msra.mxu1 %v9306_v40 }
 0x4d1   :  { %7216 = vmatprep.subr.mxu1 %v9318_v43 }
 0x4d2   :  { %7217 = vmatpush3.msra.mxu1 %v9330_v34 }
 0x4d3   :  { %7218 = vmatprep.subr.mxu1 %v9342_v60 }
 0x4d4   :  { %7219 = vmatpush3.msra.mxu1 %v9354_v57 }
 0x4d5   :  { %7220 = vmatprep.subr.mxu1 %v9366_v52 }
 0x4d6   :  { %7221 = vmatpush3.msra.mxu1 %v9378_v62 }
 0x4d7   :  { %7222 = vmatprep.subr.mxu1 %v6355_v56 }
 0x4d8   :  { %7223 = vmatpush3.msra.mxu1 %v6339_v28 }
 0x4d9   :  { %7224 = vmatprep.subr.mxu1 %v6354_v6 }
 0x4da   :  { %7225 = vmatpush3.msra.mxu1 %v6338_v24 }
 0x4db   :  { %7226 = vmatprep.subr.mxu1 %v6353_v19 }
 0x4dc   :  { %7227 = vmatpush3.msra.mxu1 %v6337_v54 }
 0x4dd   :  { %7228 = vmatprep.subr.mxu1 %v6352_v20 }
 0x4de   :  { %7229 = vmatpush3.msra.mxu1 %v6336_v32 }
 0x4df   :  { %6751 = vmatmul.mubr.f32.vlgmr.msra.gmra.mxu1 %v8392_v15  ;;  %7282 = vmatprep.subr.mxu1 %v9696_v51 }
 0x4e0   :  { %6755 = vmatprep.mubr.f32.mxu1 %v8556_v47 }
 0x4e3   :  { %6756 = vmatmul.mubr.f32.gmra.mxu1 %v8508_v13 }
 0x4e4   :  { %7286 = vmatprep.mubr.msk.f32.mxu1 %vm7314_vm11, %v9696_v51 }
 0x509   :  { %v4231_v39 = vpop.f32.mrf.mxu0 }
 0x50b   :  { %v4233_v3 = vpop.f32.mrf.mxu0 }
 0x50d   :  { %v4237_v24 = vpop.f32.mrf.mxu0 }
 0x50f   :  { %v9491_v19 = vpop.f32.mrf.mxu0 }
 0x511   :  { %v4391_v59 = vpop.f32.mrf.mxu0 }
 0x512   :  { %v4392_v1 = vadd.f32 %v4391_v59, %v4231_v39 }
 0x513   :  { %v4393_v55 = vpop.f32.mrf.mxu0 }
 0x514   :  { %v4394_v45 = vadd.f32 %v4393_v55, %v4233_v3 }
 0x516   :  { %v4397_v7 = vpop.f32.mrf.mxu0 }
 0x517   :  { %v4398_v30 = vadd.f32 %v4397_v7, %v4237_v24 }
 0x518   :  { %v9493_v15 = vpop.f32.mrf.mxu0 }
 0x519   :  { %v4308_v42 = vpop.f32.mrf.mxu1  ;;  %v4400_v39 = vadd.f32 %v9493_v15, %v9491_v19 }
 0x51a   :  { %v4644_v58 = vpop.f32.mrf.mxu0 }
 0x51b   :  { %v4310_v47 = vpop.f32.mrf.mxu1  ;;  %v4732_v8 = vadd.f32 %v4644_v58, %v4392_v1 }
 0x51c   :  { %v4646_v16 = vpop.f32.mrf.mxu0 }
 0x51f   :  { %v4314_v13 = vpop.f32.mrf.mxu1  ;;  %v9495_v18 = vpop.f32.mrf.mxu0 }
 0x521   :  { %v4316_v11 = vpop.f32.mrf.mxu1  ;;  %v9497_v10 = vpop.f32.mrf.mxu0 }
 0x523   :  { %v4468_v17 = vpop.f32.mrf.mxu1  ;;  %v4905_v21 = vpop.f32.mrf.mxu0 }
 0x524   :  { %v4469_v48 = vadd.f32 %v4468_v17, %v4308_v42 }
 0x525   :  { %v4470_v38 = vpop.f32.mrf.mxu1  ;;  %v4907_v37 = vpop.f32.mrf.mxu0 }
 0x526   :  { %v4471_v31 = vadd.f32 %v4470_v38, %v4310_v47 }
 0x527   :  { %v4474_v49 = vpop.f32.mrf.mxu1 }
 0x528   :  { %v9499_v5 = vpop.f32.mrf.mxu0 }
 0x529   :  { %v4476_v46 = vpop.f32.mrf.mxu1 }
 0x52a   :  { %v9501_v0 = vpop.f32.mrf.mxu0  ;;  %v4477_v55 = vadd.f32 %v4476_v46, %v4316_v11 }
 0x52b   :  { %v4721_v40 = vpop.f32.mrf.mxu1 }
 0x52c   :  { %v5166_v43 = vpop.f32.mrf.mxu0  ;;  %v4734_v44 = vadd.f32 %v4721_v40, %v4469_v48  ;;  %v4736_v48 = vadd.f32 %v9495_v18, %v4398_v30 }
 0x52d   :  { %v4723_v34 = vpop.f32.mrf.mxu1 }
 0x52e   :  { %v5168_v60 = vpop.f32.mrf.mxu0 }
 0x52f   :  { %v4727_v53 = vpop.f32.mrf.mxu1 }
 0x530   :  { %v9503_v57 = vpop.f32.mrf.mxu0 }
 0x531   :  { %9733 = vst [vmem:[#allocation6_spill] sm:$0xff] %v9503_v57  ;;  %v4729_v32 = vpop.f32.mrf.mxu1  ;;  %v4735_v57 = vadd.f32 %v4723_v34, %v4471_v31 }
 0x532   :  { %v9505_v52 = vpop.f32.mrf.mxu0  ;;  %v4739_v7 = vadd.f32 %v4729_v32, %v4477_v55 }
 0x533   :  { %9734 = vst [vmem:[#allocation5_spill] sm:$0xff] %v9505_v52  ;;  %v4475_v52 = vadd.f32 %v4474_v49, %v4314_v13  ;;  %v4737_v13 = vadd.f32 %v9497_v10, %v4400_v39 }
 0x534   :  { %v4982_v20 = vpop.f32.mrf.mxu1  ;;  %v5437_v62 = vpop.f32.mrf.mxu0 }
 0x535   :  { %v4738_v42 = vadd.f32 %v4727_v53, %v4475_v52  ;;  %v4998_v30 = vadd.f32 %v9501_v0, %v4737_v13 }
 0x536   :  { %v4984_v54 = vpop.f32.mrf.mxu1  ;;  %v5439_v56 = vpop.f32.mrf.mxu0 }
 0x537   :  { %v4996_v1 = vadd.f32 %v4984_v54, %v4735_v57 }
 0x538   :  { %v4988_v28 = vpop.f32.mrf.mxu1 }
 0x539   :  { %v9507_v6 = vpop.f32.mrf.mxu0 }
 0x53a   :  { %9735 = vst [vmem:[#allocation43_spill] sm:$0xff] %v9507_v6  ;;  %v4990_v51 = vpop.f32.mrf.mxu1  ;;  %v4993_v6 = vadd.f32 %v4905_v21, %v4732_v8 }
 0x53b   :  { %v9509_v33 = vpop.f32.mrf.mxu0  ;;  %v5000_v17 = vadd.f32 %v4990_v51, %v4739_v7 }
 0x53c   :  { %9736 = vst [vmem:[#allocation44_spill] sm:$0xff] %v9509_v33  ;;  %v5243_v4 = vpop.f32.mrf.mxu1  ;;  %v4733_v33 = vadd.f32 %v4646_v16, %v4394_v45  ;;  %v4999_v16 = vadd.f32 %v4988_v28, %v4738_v42 }
 0x53d   :  { %v5698_v29 = vpop.f32.mrf.mxu0 }
 0x53e   :  { %v5245_v26 = vpop.f32.mrf.mxu1  ;;  %v4994_v59 = vadd.f32 %v4907_v37, %v4733_v33  ;;  %v4997_v33 = vadd.f32 %v9499_v5, %v4736_v48  ;;  %v6326_v48 = vpop.permute.xlu1 %6325 }
 0x53f   :  { %v5700_v14 = vpop.f32.mrf.mxu0  ;;  %v5257_v31 = vadd.f32 %v5245_v26, %v4996_v1 }
 0x540   :  { %v5249_v2 = vpop.f32.mrf.mxu1  ;;  %v5255_v24 = vadd.f32 %v5168_v60, %v4994_v59  ;;  %v6321_v60 = vpop.permute.xlu0 %6320 }
 0x541   :  { %v9511_v41 = vpop.f32.mrf.mxu0  ;;  %v5260_v21 = vadd.f32 %v5249_v2, %v4999_v16  ;;  %v9742_v34 = vld [vmem:[#allocation43_spill] sm:$0xff] }
 0x542   :  { %v5251_v61 = vpop.f32.mrf.mxu1  ;;  %9737 = vst [vmem:[#allocation45_spill] sm:$0xff] %v9511_v41  ;;  %v5526_v19 = vadd.f32 %v5439_v56, %v5255_v24 }
 0x543   :  { %v9515_v25 = vpop.f32.mrf.mxu0  ;;  %v9744_v52 = vld [vmem:[#allocation44_spill] sm:$0xff] }
 0x544   :  { %v5514_v22 = vpop.f32.mrf.mxu1  ;;  %9739 = vst [vmem:[#allocation47_spill] sm:$0xff] %v9515_v25  ;;  %v5254_v25 = vadd.f32 %v5166_v43, %v4993_v6  ;;  %v5787_v37 = vadd.f32 %v5700_v14, %v5526_v19  ;;  %v9741_v43 = vld [vmem:[#allocation5_spill] sm:$0xff] }
 0x546   :  { %v5516_v36 = vpop.f32.mrf.mxu1  ;;  %v5525_v45 = vadd.f32 %v5437_v62, %v5254_v25  ;;  %v9740_v25 = vld [vmem:[#allocation6_spill] sm:$0xff] }
 0x547   :  { %v5959_v27 = vpop.f32.mrf.mxu0  ;;  %v5258_v18 = vadd.f32 %v9740_v25, %v4997_v33  ;;  %v9748_v25 = vld [vmem:[#allocation10_spill] sm:$0xff] }
 0x548   :  { %v5520_v50 = vpop.f32.mrf.mxu1  ;;  %v5786_v15 = vadd.f32 %v5698_v29, %v5525_v45  ;;  %v5259_v29 = vadd.f32 %v9741_v43, %v4998_v30  ;;  %v9747_v30 = vld [vmem:[#allocation9_spill] sm:$0xff] }
 0x549   :  { %v5961_v63 = vpop.f32.mrf.mxu0  ;;  %v5531_v46 = vadd.f32 %v5520_v50, %v5260_v21  ;;  %v5529_v51 = vadd.f32 %v9742_v34, %v5258_v18  ;;  %v9745_v50 = vld [vmem:[#allocation45_spill] sm:$0xff]  ;;  %v9749_v18 = vld [vmem:[#allocation19_spill] sm:$0xff] }
 0x54a   :  { %v9513_v23 = vpop.f32.mrf.mxu1  ;;  %v6047_v49 = vadd.f32 %v5959_v27, %v5786_v15  ;;  %v6048_v2 = vadd.f32 %v5961_v63, %v5787_v37  ;;  %v9750_v37 = vld [vmem:[#allocation17_spill] sm:$0xff]  ;;  %v9760_v34 = vld [vmem:[#allocation23_spill] sm:$0xff] }
 0x54b   :  { %9738 = vst [vmem:[#allocation46_spill] sm:$0xff] %v9513_v23  ;;  %v4995_v23 = vadd.f32 %v4982_v20, %v4734_v44  ;;  %v5965_v47 = vpop.f32.mrf.mxu0  ;;  %v9746_v39 = vld [vmem:[#allocation47_spill] sm:$0xff]  ;;  %v9758_v43 = vld [vmem:[#allocation21_spill] sm:$0xff] }
 0x54c   :  { %v5775_v9 = vpop.f32.mrf.mxu1 }
 0x54d   :  { %v5256_v58 = vadd.f32 %v5243_v4, %v4995_v23  ;;  %v5528_v23 = vadd.f32 %v5516_v36, %v5257_v31  ;;  %v5967_v38 = vpop.f32.mrf.mxu0 }
 0x54e   :  { %v5777_v35 = vpop.f32.mrf.mxu1 }
 0x54f   :  { %v5527_v44 = vadd.f32 %v5514_v22, %v5256_v58  ;;  %v5261_v22 = vadd.f32 %v5251_v61, %v5000_v17  ;;  %v5789_v10 = vadd.f32 %v5777_v35, %v5528_v23  ;;  %v5530_v61 = vadd.f32 %v9744_v52, %v5259_v29  ;;  %v9759_v29 = vld [vmem:[#allocation22_spill] sm:$0xff]  ;;  %v9772_v52 = vld [vmem:[#allocation35_spill] sm:$0xff] }
 0x550   :  { %v5781_v12 = vpop.f32.mrf.mxu1  ;;  %v5790_v35 = vadd.f32 %v9745_v50, %v5529_v51  ;;  %v9761_v51 = vld [vmem:[#allocation24_spill] sm:$0xff]  ;;  %v9774_v50 = vld [vmem:[#allocation37_spill] sm:$0xff] }
 0x551   :  { %v5788_v4 = vadd.f32 %v5775_v9, %v5527_v44  ;;  %v5792_v57 = vadd.f32 %v5781_v12, %v5531_v46  ;;  %v5791_v59 = vadd.f32 %v9746_v39, %v5530_v61  ;;  %v9754_v46 = vld [vmem:[#allocation12_spill] sm:$0xff]  ;;  %v6545_v39 = vpop.permute.xlu0 %6544 }
 0x552   :  { %v5783_v41 = vpop.f32.mrf.mxu1  ;;  %v9743_v53 = vld [vmem:[#allocation46_spill] sm:$0xff]  ;;  %v9773_v61 = vld [vmem:[#allocation36_spill] sm:$0xff] }
 0x553   :  { %v5532_v0 = vadd.f32 %v9743_v53, %v5261_v22  ;;  %v6052_v24 = vadd.f32 %v5967_v38, %v5791_v59  ;;  %v6540_v38 = vld [vmem:[%s9619_s7] sm:$0x7]  ;;  %v9753_v22 = vld [vmem:[#allocation16_spill] sm:$0xff]  ;;  %v9766_v53 = vld [vmem:[#allocation29_spill] sm:$0xff] }
 0x554   :  { %v6036_v3 = vpop.f32.mrf.mxu1 }
 0x555   :  { %v6049_v40 = vadd.f32 %v6036_v3, %v5788_v4  ;;  %v5793_v56 = vadd.f32 %v5783_v41, %v5532_v0  ;;  %v6051_v3 = vadd.f32 %v5965_v47, %v5790_v35  ;;  %v9767_v0 = vld [vmem:[#allocation30_spill] sm:$0xff] }
 0x556   :  { %v6038_v8 = vpop.f32.mrf.mxu1  ;;  %v9775_v35 = vld [vmem:[#allocation38_spill] sm:$0xff] }
 0x557   :  { %v6050_v32 = vadd.f32 %v6038_v8, %v5789_v10  ;;  %v9755_v10 = vld [vmem:[#allocation20_spill] sm:$0xff] }
 0x558   :  { %v6042_v11 = vpop.f32.mrf.mxu1 }
 0x559   :  { %v6053_v28 = vadd.f32 %v6042_v11, %v5792_v57  ;;  %v9768_v57 = vld [vmem:[#allocation31_spill] sm:$0xff] }
 0x55a   :  { %v6044_v26 = vpop.f32.mrf.mxu1 }
 0x55b   :  { %v6220_v5 = vpop.f32.mrf.mxu0  ;;  %v6054_v42 = vadd.f32 %v6044_v26, %v5793_v56  ;;  %v9752_v26 = vld [vmem:[#allocation14_spill] sm:$0xff] }
 0x55c   :  { %v6297_v36 = vpop.f32.mrf.mxu1  ;;  %v6308_v9 = vadd.f32 %v6220_v5, %v6047_v49  ;;  %v9751_v49 = vld [vmem:[#allocation11_spill] sm:$0xff]  ;;  %v9779_v56 = vld [vmem:[#allocation42_spill] sm:$0xff] }
 0x55d   :  { %v6310_v14 = vadd.f32 %v6297_v36, %v6049_v40  ;;  %v6222_v27 = vpop.f32.mrf.mxu0  ;;  %v9756_v40 = vld [vmem:[#allocation8_spill] sm:$0xff]  ;;  %v9757_v5 = vld [vmem:[#allocation7_spill] sm:$0xff]  ;;  %v9763_v36 = vld [vmem:[#allocation26_spill] sm:$0xff] }
 0x55e   :  { %v6328_v20 = vadd.f32 %v6321_v60, %v6308_v9  ;;  %v6299_v62 = vpop.f32.mrf.mxu1  ;;  %v6309_v54 = vadd.f32 %v6222_v27, %v6048_v2  ;;  %v9762_v2 = vld [vmem:[#allocation25_spill] sm:$0xff]  ;;  %v9764_v9 = vld [vmem:[#allocation27_spill] sm:$0xff]  ;;  %v9771_v27 = vld [vmem:[#allocation34_spill] sm:$0xff] }
 0x55f   :  { %v6330_v6 = vadd.f32 %v6321_v60, %v6310_v14  ;;  %v6311_v63 = vadd.f32 %v6299_v62, %v6050_v32  ;;  %v9769_v32 = vld [vmem:[#allocation32_spill] sm:$0xff]  ;;  %v9770_v14 = vld [vmem:[#allocation33_spill] sm:$0xff] }
 0x560   :  { %6917 = vst [vmem:[%s9618_s15] sm:$0xff] %v6328_v20  ;;  %v6329_v12 = vadd.f32 %v6321_v60, %v6309_v54  ;;  %v6303_v55 = vpop.f32.mrf.mxu1  ;;  %v9776_v20 = vld [vmem:[#allocation39_spill] sm:$0xff]  ;;  %v9777_v62 = vld [vmem:[#allocation40_spill] sm:$0xff]  ;;  %v9778_v54 = vld [vmem:[#allocation41_spill] sm:$0xff] }
 0x561   :  { %6919 = vst [vmem:[%s9618_s15 + $0x10] sm:$0xff] %v6330_v6  ;;  %v6331_v1 = vadd.f32 %v6321_v60, %v6311_v63  ;;  %v6314_v58 = vadd.f32 %v6303_v55, %v6053_v28  ;;  %v6226_v41 = vpop.f32.mrf.mxu0  ;;  %v9765_v60 = vld [vmem:[#allocation28_spill] sm:$0xff]  ;;  %v9780_v28 = vld [vmem:[#allocation18_spill] sm:$0xff]  ;;  %v9781_v6 = vld [vmem:[#allocation15_spill] sm:$0xff] }
 0x562   :  { %6918 = vst [vmem:[%s9618_s15 + $0x8] sm:$0xff] %v6329_v12  ;;  %v6312_v47 = vadd.f32 %v6226_v41, %v6051_v3  ;;  %v6305_v45 = vpop.f32.mrf.mxu1  ;;  %v9782_v63 = vld [vmem:[#allocation13_spill] sm:$0xff] }
 0x563   :  { %6920 = vst [vmem:[%s9618_s15 + $0x18] sm:$0xff] %v6331_v1  ;;  %v6334_v8 = vadd.f32 %v6326_v48, %v6314_v58  ;;  %v6315_v7 = vadd.f32 %v6305_v45, %v6054_v42  ;;  %v6228_v16 = vpop.f32.mrf.mxu0 }
 0x564   :  { %v6332_v31 = vadd.f32 %v6326_v48, %v6312_v47  ;;  %v6313_v44 = vadd.f32 %v6228_v16, %v6052_v24 }
 0x565   :  { %6923 = vst [vmem:[%s9618_s15 + $0x30] sm:$0xff] %v6334_v8  ;;  %v6335_v13 = vadd.f32 %v6326_v48, %v6315_v7 }
 0x566   :  { %6921 = vst [vmem:[%s9618_s15 + $0x20] sm:$0xff] %v6332_v31  ;;  %v6333_v33 = vadd.f32 %v6326_v48, %v6313_v44 }
 0x567   :  { %6924 = vst [vmem:[%s9618_s15 + $0x38] sm:$0xff] %v6335_v13  ;;  %v6836_v13 = vld [vmem:[%s9621_s9] sm:$0x7] }
 0x568   :  { %6922 = vst [vmem:[%s9618_s15 + $0x28] sm:$0xff] %v6333_v33  ;;  %v9783_v33 = vmov 0.0  }
 0x57e   :  { %v7193_v19 = vpop.f32.mrf.mxu1 }
 0x57f   :  { %v7158_v15 = vpop.f32.mrf.mxu0 }
 0x580   :  { %v7194_v11 = vpop.f32.mrf.mxu1 }
 0x581   :  { %v7195_v17 = vadd.f32 %v7194_v11, %v7193_v19  ;;  %v7159_v21 = vpop.f32.mrf.mxu0  ;;  %v6841_v19 = vpop.permute.xlu1 %6840 }
 0x582   :  { %v7160_v23 = vadd.f32 %v7159_v21, %v7158_v15 }
 0x584   :  { %v6537_v4 = vadd.f32 %v7195_v17, %v7160_v23 }
 0x586   :  { %7278 = vmatpush3.msra.mxu0 %v6537_v4 }
 0x587   :  { %7280 = vmatmul.mubr.msk.f32.vlgmr.msra.gmra.mxu0 %vm2049_vm10, %v6540_v38  ;;  %7236 = vmatprep.subr.mxu0 %v9747_v30 }
 0x588   :  { %7237 = vmatpush3.msra.mxu0 %v9748_v25  ;;  %6825 = vmatprep.mubr.f32.mxu0 %v9749_v18 }
 0x589   :  { %7238 = vmatprep.subr.mxu0 %v9750_v37 }
 0x58a   :  { %7239 = vmatpush3.msra.mxu0 %v9751_v49 }
 0x58b   :  { %7240 = vmatprep.subr.mxu0 %v9752_v26 }
 0x58c   :  { %7241 = vmatpush3.msra.mxu0 %v9753_v22 }
 0x58d   :  { %7242 = vmatprep.subr.mxu0 %v9754_v46 }
 0x58e   :  { %7243 = vmatpush3.msra.mxu0 %v9755_v10 }
 0x58f   :  { %7244 = vmatprep.subr.mxu0 %v9756_v40 }
 0x590   :  { %7245 = vmatpush3.msra.mxu0 %v9757_v5 }
 0x591   :  { %7246 = vmatprep.subr.mxu0 %v9758_v43 }
 0x592   :  { %7247 = vmatpush3.msra.mxu0 %v9759_v29 }
 0x593   :  { %7248 = vmatprep.subr.mxu0 %v9760_v34 }
 0x594   :  { %7249 = vmatpush3.msra.mxu0 %v9761_v51 }
 0x595   :  { %7250 = vmatprep.subr.mxu0 %v9762_v2 }
 0x596   :  { %7251 = vmatpush3.msra.mxu0 %v9763_v36 }
 0x597   :  { %7252 = vmatprep.subr.mxu0 %v9764_v9 }
 0x598   :  { %7253 = vmatpush3.msra.mxu0 %v9765_v60 }
 0x599   :  { %7254 = vmatprep.subr.mxu0 %v9766_v53 }
 0x59a   :  { %7255 = vmatpush3.msra.mxu0 %v9767_v0 }
 0x59b   :  { %7256 = vmatprep.subr.mxu0 %v9768_v57 }
 0x59c   :  { %7257 = vmatpush3.msra.mxu0 %v9769_v32 }
 0x59d   :  { %7258 = vmatprep.subr.mxu0 %v9770_v14 }
 0x59e   :  { %7259 = vmatpush3.msra.mxu0 %v9771_v27 }
 0x59f   :  { %7260 = vmatprep.subr.mxu0 %v9772_v52  ;;  %v7230_v55 = vpop.f32.mrf.mxu1 }
 0x5a0   :  { %7261 = vmatpush3.msra.mxu0 %v9773_v61 }
 0x5a1   :  { %7262 = vmatprep.subr.mxu0 %v9774_v50  ;;  %v7231_v42 = vpop.f32.mrf.mxu1 }
 0x5a2   :  { %7263 = vmatpush3.msra.mxu0 %v9775_v35  ;;  %v7232_v16 = vadd.f32 %v7231_v42, %v7230_v55 }
 0x5a3   :  { %7264 = vmatprep.subr.mxu0 %v9776_v20  ;;  %v7233_v1 = vpop.f32.mrf.mxu1 }
 0x5a4   :  { %7265 = vmatpush3.msra.mxu0 %v9777_v62 }
 0x5a5   :  { %7266 = vmatprep.subr.mxu0 %v9778_v54  ;;  %v7234_v48 = vpop.f32.mrf.mxu1 }
 0x5a6   :  { %7267 = vmatpush3.msra.mxu0 %v9779_v56  ;;  %v7235_v45 = vadd.f32 %v7234_v48, %v7233_v1 }
 0x5a7   :  { %6826 = vmatmul.mubr.f32.vlgmr.msra.gmra.mxu0 %v9780_v28 }
 0x5a8   :  { %6830 = vmatprep.mubr.f32.mxu0 %v9781_v6 }
 0x5ab   :  { %6831 = vmatmul.mubr.f32.gmra.mxu0 %v9782_v63 }
 0x647   :  { %v6616_v59 = vpop.f32.mrf.mxu0 }
 0x648   :  { %v6617_v3 = vadd.f32 %v6616_v59, %v6545_v39 }
 0x649   :  { %v7281_v12 = vpop.f32.mrf.mxu0 }
 0x64a   :  { %6621 = vst.msk [vmem:[%s9620_s13] sm:$0x7] %vm6620_vm12, %v6617_v3 }
 0x667   :  { %v7268_v58 = vpop.f32.mrf.mxu0 }
 0x669   :  { %v7269_v41 = vpop.f32.mrf.mxu0 }
 0x66a   :  { %v7270_v8 = vadd.f32 %v7269_v41, %v7268_v58 }
 0x66b   :  { %v7271_v24 = vpop.f32.mrf.mxu0 }
 0x66c   :  { %v6828_v44 = vadd.f32 %v7270_v8, %v7232_v16 }
 0x66d   :  { %v7272_v47 = vpop.f32.mrf.mxu0 }
 0x66e   :  { %v7273_v7 = vadd.f32 %v7272_v47, %v7271_v24 }
 0x670   :  { %v6833_v31 = vadd.f32 %v7273_v7, %v7235_v45 }
 0x672   :  { %7283 = vmatpush3.msra.mxu1 %v6833_v31 }
 0x673   :  { %7284 = vmatprep.subr.mxu1 %v9783_v33 }
 0x674   :  { %7285 = vmatpush3.msra.mxu1 %v6828_v44 }
 0x675   :  { %7287 = vmatmul.mubr.msk.f32.vlgmr.msra.gmra.mxu1 %vm485_vm7, %v6836_v13 }
 0x735   :  { %v6912_v15 = vpop.f32.mrf.mxu1 }
 0x736   :  { %v6913_v11 = vadd.f32 %v6912_v15, %v6841_v19 }
 0x737   :  { %v7288_v17 = vpop.f32.mrf.mxu1 }
 0x738   :  { %6916 = vst.msk [vmem:[%s9622_s14] sm:$0x7] %vm6620_vm12, %v6913_v11 }

</bundles_post_ra>
